<compile_context>
chip_gen: v7x
topology: tpu7x:2x2x1
jax: 0.10.0
libtpu: 0.0.40
codegen_flags: <defaults>
</compile_context>

<pallas_src>
import math

import jax
import jax.numpy as jnp
from jax import lax
from jax.experimental import pallas as pl
from jax.experimental.pallas import tpu as pltpu

F32 = jnp.float32
BN_EPS = 1e-5


# ----------------------------------------------------------------------------
# In-kernel helpers (traced inside Pallas kernels; operate on values)
# ----------------------------------------------------------------------------
def _relu(x):
    return jnp.maximum(x, 0.0)


def _bn_train(x, gamma, beta):
    # nn.BatchNorm1d in training mode: biased batch statistics over the rows.
    mean = jnp.mean(x, axis=0, keepdims=True)
    var = jnp.mean((x - mean) ** 2, axis=0, keepdims=True)
    return (x - mean) * lax.rsqrt(var + BN_EPS) * gamma + beta


def _lstm_cell(x, h, c, w_ih, w_hh, b_ih, b_hh):
    # PyTorch LSTM gate order: i, f, g, o. Weights are (in, 4H) / (H, 4H).
    H = h.shape[1]
    gates = (jnp.dot(x, w_ih, preferred_element_type=F32) + b_ih
             + jnp.dot(h, w_hh, preferred_element_type=F32) + b_hh)
    i = jax.nn.sigmoid(gates[:, 0 * H:1 * H])
    f = jax.nn.sigmoid(gates[:, 1 * H:2 * H])
    g = jnp.tanh(gates[:, 2 * H:3 * H])
    o = jax.nn.sigmoid(gates[:, 3 * H:4 * H])
    c_new = f * c + i * g
    h_new = o * jnp.tanh(c_new)
    return h_new, c_new


def _pool_block(pos, hid, se_w, se_b, w1e, w1h, b1, g1, bt1, w2, b2, g2, bt2):
    """PoolHiddenNet: row (i*N + j) sees rel = pos[j]-pos[i], hidden = hid[j];
    2-layer MLP (BN+ReLU) then max over j.  Fully vectorized, no concat."""
    N, D = pos.shape
    rel = (pos[None, :, :] - pos[:, None, :]).reshape(N * N, D)        # (N*N, D)
    emb = jnp.dot(rel, se_w, preferred_element_type=F32) + se_b        # (N*N, emb)
    # split-weight form of cat([emb, hid_rep]) @ W1
    h1 = jnp.dot(emb, w1e, preferred_element_type=F32)                 # (N*N, 512)
    hid_part = jnp.dot(hid, w1h, preferred_element_type=F32)           # (N, 512)
    h1 = h1 + jnp.tile(hid_part, (N, 1)) + b1                          # row i*N+j -> hid[j]
    h1 = _relu(_bn_train(h1, g1, bt1))
    h2 = jnp.dot(h1, w2, preferred_element_type=F32) + b2              # (N*N, bott)
    h2 = _relu(_bn_train(h2, g2, bt2))
    return jnp.max(h2.reshape(N, N, -1), axis=1)                       # (N, bott)


def _mlp2_block(a, b, w1a, w1b, b1, g1, bt1, w2, b2, g2, bt2):
    """make_mlp([da+db, hidden, out]) with BN+ReLU; split-weight for cat([a,b]) @ W1."""
    h = (jnp.dot(a, w1a, preferred_element_type=F32)
         + jnp.dot(b, w1b, preferred_element_type=F32) + b1)
    h = _relu(_bn_train(h, g1, bt1))
    h = jnp.dot(h, w2, preferred_element_type=F32) + b2
    return _relu(_bn_train(h, g2, bt2))


# ----------------------------------------------------------------------------
# Fused kernel 1: Encoder LSTM + PoolHiddenNet + mlp_decoder_context
# ----------------------------------------------------------------------------
def enc_ctx_kernel(obs_rel_ref, end_pos_ref,
                   e_se_w, e_se_b, e_wih, e_whh, e_bih, e_bhh,
                   p_se_w, p_se_b, p_w1e, p_w1h, p_b1, p_g1, p_bt1,
                   p_w2, p_b2, p_g2, p_bt2,
                   c_w1h, c_w1p, c_b1, c_g1, c_bt1, c_w2, c_b2, c_g2, c_bt2,
                   dec_h_out):
    T, N, _ = obs_rel_ref.shape
    He = e_whh.shape[0]

    se_w, se_b = e_se_w[...], e_se_b[...]
    w_ih, w_hh = e_wih[...], e_whh[...]
    b_ih, b_hh = e_bih[...], e_bhh[...]

    def step(t, carry):
        h, c = carry
        x = jnp.dot(obs_rel_ref[t], se_w, preferred_element_type=F32) + se_b
        return _lstm_cell(x, h, c, w_ih, w_hh, b_ih, b_hh)

    final_h, _ = lax.fori_loop(0, T, step,
                               (jnp.zeros((N, He), F32), jnp.zeros((N, He), F32)))

    pool_h = _pool_block(end_pos_ref[...], final_h,
                         p_se_w[...], p_se_b[...], p_w1e[...], p_w1h[...],
                         p_b1[...], p_g1[...], p_bt1[...],
                         p_w2[...], p_b2[...], p_g2[...], p_bt2[...])

    dec_h_out[...] = _mlp2_block(final_h, pool_h,
                                 c_w1h[...], c_w1p[...], c_b1[...], c_g1[...],
                                 c_bt1[...], c_w2[...], c_b2[...], c_g2[...],
                                 c_bt2[...])


# ----------------------------------------------------------------------------
# Fused kernel 2: full decoder rollout (pred_len steps inside ONE pallas_call)
# ----------------------------------------------------------------------------
def decoder_rollout_kernel(last_pos_ref, prev_rel_ref, h0_ref,
                           d_se_w, d_se_b, d_wih, d_whh, d_bih, d_bhh,
                           h2p_w, h2p_b,
                           p_se_w, p_se_b, p_w1e, p_w1h, p_b1, p_g1, p_bt1,
                           p_w2, p_b2, p_g2, p_bt2,
                           m_w1h, m_w1p, m_b1, m_g1, m_bt1,
                           m_w2, m_b2, m_g2, m_bt2,
                           preds_ref,
                           h_sc, c_sc, pos_sc, rel_sc):
    pred_len = preds_ref.shape[0]

    # Hoist the small, hot LSTM / embedding / hidden2pos weights out of the loop.
    se_w, se_b = d_se_w[...], d_se_b[...]
    w_ih, w_hh = d_wih[...], d_whh[...]
    b_ih, b_hh = d_bih[...], d_bhh[...]
    hp_w, hp_b = h2p_w[...], h2p_b[...]

    # Carried state lives in VMEM scratch (never round-trips through HBM).
    h_sc[...] = h0_ref[...]
    c_sc[...] = jnp.zeros_like(c_sc)
    pos_sc[...] = last_pos_ref[...]
    rel_sc[...] = prev_rel_ref[...]

    @pl.loop(0, pred_len)
    def _(t):
        x = jnp.dot(rel_sc[...], se_w, preferred_element_type=F32) + se_b
        h, c = _lstm_cell(x, h_sc[...], c_sc[...], w_ih, w_hh, b_ih, b_hh)
        rel = jnp.dot(h, hp_w, preferred_element_type=F32) + hp_b
        curr_pos = pos_sc[...] + rel

        pool_h = _pool_block(curr_pos, h,
                             p_se_w[...], p_se_b[...], p_w1e[...], p_w1h[...],
                             p_b1[...], p_g1[...], p_bt1[...],
                             p_w2[...], p_b2[...], p_g2[...], p_bt2[...])
        h_next = _mlp2_block(h, pool_h,
                             m_w1h[...], m_w1p[...], m_b1[...], m_g1[...],
                             m_bt1[...], m_w2[...], m_b2[...], m_g2[...],
                             m_bt2[...])

        preds_ref[t] = rel          # accumulate into the VMEM output slab
        h_sc[...] = h_next          # mlp output replaces hidden (per reference)
        c_sc[...] = c
        pos_sc[...] = curr_pos
        rel_sc[...] = rel


# ----------------------------------------------------------------------------
# pallas_call wrapper (whole-array VMEM blocks; shapes are tiny, no grid)
# ----------------------------------------------------------------------------
def _vmem_call(kernel, args, out_shapes, scratch_shapes=()):
    vm = lambda: pl.BlockSpec(memory_space=pltpu.MemorySpace.VMEM)
    multi = isinstance(out_shapes, (tuple, list))
    out_specs = tuple(vm() for _ in out_shapes) if multi else vm()
    return pl.pallas_call(
        kernel,
        out_shape=out_shapes,
        in_specs=[vm() for _ in args],
        out_specs=out_specs,
        scratch_shapes=list(scratch_shapes),
    )(*args)


# ----------------------------------------------------------------------------
# Deterministic parameter construction (pre-transposed to (in, out) layout)
# ----------------------------------------------------------------------------
def _linear_t(key, in_d, out_d):
    kw, kb = jax.random.split(key)
    s = 1.0 / math.sqrt(in_d)
    w = jax.random.uniform(kw, (in_d, out_d), F32, -s, s)   # == PyTorch W.T
    b = jax.random.uniform(kb, (1, out_d), F32, -s, s)
    return w, b


def _bn_params(d):
    return jnp.ones((1, d), F32), jnp.zeros((1, d), F32)


def _lstm_t(key, in_d, h_d):
    k1, k2, k3, k4 = jax.random.split(key, 4)
    s = 1.0 / math.sqrt(h_d)
    return dict(
        w_ih=jax.random.uniform(k1, (in_d, 4 * h_d), F32, -s, s),
        w_hh=jax.random.uniform(k2, (h_d, 4 * h_d), F32, -s, s),
        b_ih=jax.random.uniform(k3, (1, 4 * h_d), F32, -s, s),
        b_hh=jax.random.uniform(k4, (1, 4 * h_d), F32, -s, s),
    )


def _pool_net(key, input_dim, emb, h_dim, bottleneck, pre_pool_hidden=512):
    # mlp_pre_pool_dims = [embedding_dim + h_dim, 512, bottleneck_dim]
    k1, k2, k3 = jax.random.split(key, 3)
    se_w, se_b = _linear_t(k1, input_dim, emb)
    w1, b1 = _linear_t(k2, emb + h_dim, pre_pool_hidden)
    g1, bt1 = _bn_params(pre_pool_hidden)
    w2, b2 = _linear_t(k3, pre_pool_hidden, bottleneck)
    g2, bt2 = _bn_params(bottleneck)
    return dict(se_w=se_w, se_b=se_b,
                w1e=w1[:emb], w1h=w1[emb:],        # split for concat-free matmul
                b1=b1, g1=g1, bt1=bt1,
                w2=w2, b2=b2, g2=g2, bt2=bt2)


def _mlp2(key, d_a, d_b, d_hidden, d_out):
    k1, k2 = jax.random.split(key)
    w1, b1 = _linear_t(k1, d_a + d_b, d_hidden)
    g1, bt1 = _bn_params(d_hidden)
    w2, b2 = _linear_t(k2, d_hidden, d_out)
    g2, bt2 = _bn_params(d_out)
    return dict(w1a=w1[:d_a], w1b=w1[d_a:], b1=b1, g1=g1, bt1=bt1,
                w2=w2, b2=b2, g2=g2, bt2=bt2)


def init_params(key, cfg):
    keys = jax.random.split(key, 9)
    d_in, emb = cfg['input_dim'], cfg['embedding_dim']
    enc_h, dec_h = cfg['encoder_h_dim'], cfg['decoder_h_dim']
    mlp_dim, bott = cfg['mlp_dim'], cfg['bottleneck_dim']

    se_w, se_b = _linear_t(keys[0], d_in, emb)
    encoder = dict(se_w=se_w, se_b=se_b, **_lstm_t(keys[1], emb, enc_h))

    gen_pool = _pool_net(keys[2], d_in, emb, enc_h, bott)
    # mlp_decoder_context exists because encoder_h_dim != decoder_h_dim.
    ctx_mlp = _mlp2(keys[3], enc_h, bott, mlp_dim, dec_h)

    dse_w, dse_b = _linear_t(keys[4], d_in, emb)
    h2p_w, h2p_b = _linear_t(keys[5], dec_h, d_in)
    decoder = dict(se_w=dse_w, se_b=dse_b, h2p_w=h2p_w, h2p_b=h2p_b,
                   **_lstm_t(keys[6], emb, dec_h))
    dec_pool = _pool_net(keys[7], d_in, emb, dec_h, bott)
    dec_mlp = _mlp2(keys[8], dec_h, bott, mlp_dim, dec_h)

    return dict(encoder=encoder, gen_pool=gen_pool, ctx_mlp=ctx_mlp,
                decoder=decoder, dec_pool=dec_pool, dec_mlp=dec_mlp)


# ----------------------------------------------------------------------------
# TrajectoryGenerator.forward
# ----------------------------------------------------------------------------
def trajectory_generator_forward(params, obs_traj, obs_traj_rel, num_nodes, pred_len):
    del num_nodes  # unused by the reference forward as well
    _, N, D = obs_traj.shape
    if N == 0:
        return None

    enc, gp, cm = params['encoder'], params['gen_pool'], params['ctx_mlp']
    dec, dp, dm = params['decoder'], params['dec_pool'], params['dec_mlp']
    dec_h_dim = dec['w_hh'].shape[0]

    end_pos = obs_traj[-1]
    prev_rel = obs_traj_rel[-1]

    # Fused: encoder LSTM + social pooling on final_h + mlp_decoder_context.
    # (noise_dim=(0,) -> add_noise is identity, so this IS the initial decoder_h.)
    decoder_h0 = _vmem_call(
        enc_ctx_kernel,
        (obs_traj_rel, end_pos,
         enc['se_w'], enc['se_b'], enc['w_ih'], enc['w_hh'], enc['b_ih'], enc['b_hh'],
         gp['se_w'], gp['se_b'], gp['w1e'], gp['w1h'], gp['b1'], gp['g1'], gp['bt1'],
         gp['w2'], gp['b2'], gp['g2'], gp['bt2'],
         cm['w1a'], cm['w1b'], cm['b1'], cm['g1'], cm['bt1'],
         cm['w2'], cm['b2'], cm['g2'], cm['bt2']),
        jax.ShapeDtypeStruct((N, dec_h_dim), F32))

    # Fused decoder rollout: all pred_len steps in one kernel; state in VMEM scratch.
    preds = _vmem_call(
        decoder_rollout_kernel,
        (end_pos, prev_rel, decoder_h0,
         dec['se_w'], dec['se_b'], dec['w_ih'], dec['w_hh'], dec['b_ih'], dec['b_hh'],
         dec['h2p_w'], dec['h2p_b'],
         dp['se_w'], dp['se_b'], dp['w1e'], dp['w1h'], dp['b1'], dp['g1'], dp['bt1'],
         dp['w2'], dp['b2'], dp['g2'], dp['bt2'],
         dm['w1a'], dm['w1b'], dm['b1'], dm['g1'], dm['bt1'],
         dm['w2'], dm['b2'], dm['g2'], dm['bt2']),
        jax.ShapeDtypeStruct((pred_len, N, D), F32),
        scratch_shapes=(pltpu.VMEM((N, dec_h_dim), F32),   # h
                        pltpu.VMEM((N, dec_h_dim), F32),   # c
                        pltpu.VMEM((N, D), F32),           # last_pos
                        pltpu.VMEM((N, D), F32)))          # prev rel_pos
    return preds  # (pred_len, batch, input_dim)


if __name__ == "__main__":
    cfg = dict(obs_len=4, pred_len=4, input_dim=2, embedding_dim=16,
               encoder_h_dim=16, decoder_h_dim=32, mlp_dim=64, bottleneck_dim=32)
    N = 3  # number of agents ("batch")

    key = jax.random.PRNGKey(0)
    k_obs, k_rel, k_par = jax.random.split(key, 3)
    obs_traj = jax.random.normal(k_obs, (cfg['obs_len'], N, cfg['input_dim']), F32)
    obs_traj_rel = jax.random.normal(k_rel, (cfg['obs_len'], N, cfg['input_dim']), F32)
    params = init_params(k_par, cfg)

    fwd = jax.jit(lambda p, ot, otr: trajectory_generator_forward(
        p, ot, otr, num_nodes=N, pred_len=cfg['pred_len']))

    pred_traj_fake_rel = fwd(params, obs_traj, obs_traj_rel)
    pred_traj_fake_rel = jax.block_until_ready(pred_traj_fake_rel)

    assert pred_traj_fake_rel.shape == (cfg['pred_len'], N, cfg['input_dim'])
    assert bool(jnp.all(jnp.isfinite(pred_traj_fake_rel)))
    print("KERNEL_OK")
</pallas_src>

<mosaic_0001>
module attributes {stable_mosaic.version = 11 : i64} {
  func.func @enc_ctx_kernel(%arg0: memref<4x3x2xf32, #tpu.memory_space<vmem>>, %arg1: memref<3x2xf32, #tpu.memory_space<vmem>>, %arg2: memref<2x16xf32, #tpu.memory_space<vmem>>, %arg3: memref<1x16xf32, #tpu.memory_space<vmem>>, %arg4: memref<16x64xf32, #tpu.memory_space<vmem>>, %arg5: memref<16x64xf32, #tpu.memory_space<vmem>>, %arg6: memref<1x64xf32, #tpu.memory_space<vmem>>, %arg7: memref<1x64xf32, #tpu.memory_space<vmem>>, %arg8: memref<2x16xf32, #tpu.memory_space<vmem>>, %arg9: memref<1x16xf32, #tpu.memory_space<vmem>>, %arg10: memref<16x512xf32, #tpu.memory_space<vmem>>, %arg11: memref<16x512xf32, #tpu.memory_space<vmem>>, %arg12: memref<1x512xf32, #tpu.memory_space<vmem>>, %arg13: memref<1x512xf32, #tpu.memory_space<vmem>>, %arg14: memref<1x512xf32, #tpu.memory_space<vmem>>, %arg15: memref<512x32xf32, #tpu.memory_space<vmem>>, %arg16: memref<1x32xf32, #tpu.memory_space<vmem>>, %arg17: memref<1x32xf32, #tpu.memory_space<vmem>>, %arg18: memref<1x32xf32, #tpu.memory_space<vmem>>, %arg19: memref<16x64xf32, #tpu.memory_space<vmem>>, %arg20: memref<32x64xf32, #tpu.memory_space<vmem>>, %arg21: memref<1x64xf32, #tpu.memory_space<vmem>>, %arg22: memref<1x64xf32, #tpu.memory_space<vmem>>, %arg23: memref<1x64xf32, #tpu.memory_space<vmem>>, %arg24: memref<64x32xf32, #tpu.memory_space<vmem>>, %arg25: memref<1x32xf32, #tpu.memory_space<vmem>>, %arg26: memref<1x32xf32, #tpu.memory_space<vmem>>, %arg27: memref<1x32xf32, #tpu.memory_space<vmem>>, %arg28: memref<3x32xf32, #tpu.memory_space<vmem>>) attributes {dimension_semantics = [], scalar_prefetch = 0 : i64, scratch_operands = 0 : i64, tpu.core_type = #tpu.core_type<tc>} {
    %c0 = arith.constant 0 : index
    %c0_0 = arith.constant 0 : index
    %0 = vector.load %arg2[%c0, %c0_0] : memref<2x16xf32, #tpu.memory_space<vmem>>, vector<2x16xf32>
    %c0_1 = arith.constant 0 : index
    %c0_2 = arith.constant 0 : index
    %1 = vector.load %arg3[%c0_1, %c0_2] : memref<1x16xf32, #tpu.memory_space<vmem>>, vector<1x16xf32>
    %c0_3 = arith.constant 0 : index
    %c0_4 = arith.constant 0 : index
    %2 = vector.load %arg4[%c0_3, %c0_4] : memref<16x64xf32, #tpu.memory_space<vmem>>, vector<16x64xf32>
    %c0_5 = arith.constant 0 : index
    %c0_6 = arith.constant 0 : index
    %3 = vector.load %arg5[%c0_5, %c0_6] : memref<16x64xf32, #tpu.memory_space<vmem>>, vector<16x64xf32>
    %c0_7 = arith.constant 0 : index
    %c0_8 = arith.constant 0 : index
    %4 = vector.load %arg6[%c0_7, %c0_8] : memref<1x64xf32, #tpu.memory_space<vmem>>, vector<1x64xf32>
    %c0_9 = arith.constant 0 : index
    %c0_10 = arith.constant 0 : index
    %5 = vector.load %arg7[%c0_9, %c0_10] : memref<1x64xf32, #tpu.memory_space<vmem>>, vector<1x64xf32>
    %cst = arith.constant 0.000000e+00 : f32
    %6 = vector.broadcast %cst : f32 to vector<3x16xf32>
    %cst_11 = arith.constant 0.000000e+00 : f32
    %7 = vector.broadcast %cst_11 : f32 to vector<3x16xf32>
    %c0_i32 = arith.constant 0 : i32
    %c4_i32 = arith.constant 4 : i32
    %8 = arith.addi %c0_i32, %c4_i32 : i32
    %c1_i32 = arith.constant 1 : i32
    %9:2 = scf.for %arg29 = %c0_i32 to %8 step %c1_i32 iter_args(%arg30 = %6, %arg31 = %7) -> (vector<3x16xf32>, vector<3x16xf32>)  : i32 {
      %156 = arith.index_cast %arg29 : i32 to index
      %c0_89 = arith.constant 0 : index
      %c0_90 = arith.constant 0 : index
      %157 = vector.load %arg0[%156, %c0_89, %c0_90] : memref<4x3x2xf32, #tpu.memory_space<vmem>>, vector<1x3x2xf32>
      %158 = vector.shape_cast %157 : vector<1x3x2xf32> to vector<3x2xf32>
      %cst_91 = arith.constant dense<0.000000e+00> : vector<3x16xf32>
      %159 = tpu.matmul %158, %0, %cst_91 {dimension_numbers = #tpu.dot_dimension_numbers<[1], [0], [0], [1], [0, 0, 1, 1], [], []>} : vector<3x2xf32>, vector<2x16xf32>, vector<3x16xf32> -> vector<3x16xf32>
      %160 = vector.broadcast %1 : vector<1x16xf32> to vector<3x16xf32>
      %161 = arith.addf %159, %160 : vector<3x16xf32>
      %cst_92 = arith.constant dense<0.000000e+00> : vector<3x64xf32>
      %162 = tpu.matmul %161, %2, %cst_92 {dimension_numbers = #tpu.dot_dimension_numbers<[1], [0], [0], [1], [0, 0, 1, 1], [], []>} : vector<3x16xf32>, vector<16x64xf32>, vector<3x64xf32> -> vector<3x64xf32>
      %163 = vector.broadcast %4 : vector<1x64xf32> to vector<3x64xf32>
      %164 = arith.addf %162, %163 : vector<3x64xf32>
      %cst_93 = arith.constant dense<0.000000e+00> : vector<3x64xf32>
      %165 = tpu.matmul %arg30, %3, %cst_93 {dimension_numbers = #tpu.dot_dimension_numbers<[1], [0], [0], [1], [0, 0, 1, 1], [], []>} : vector<3x16xf32>, vector<16x64xf32>, vector<3x64xf32> -> vector<3x64xf32>
      %166 = arith.addf %164, %165 : vector<3x64xf32>
      %167 = vector.broadcast %5 : vector<1x64xf32> to vector<3x64xf32>
      %168 = arith.addf %166, %167 : vector<3x64xf32>
      %169 = vector.extract_strided_slice %168 {offsets = [0, 0], sizes = [3, 16], strides = [1, 1]} : vector<3x64xf32> to vector<3x16xf32>
      %170 = arith.negf %169 : vector<3x16xf32>
      %171 = math.exp %170 : vector<3x16xf32>
      %cst_94 = arith.constant 1.000000e+00 : f32
      %172 = vector.broadcast %cst_94 : f32 to vector<3x16xf32>
      %173 = arith.addf %172, %171 : vector<3x16xf32>
      %174 = arith.divf %172, %173 : vector<3x16xf32>
      %175 = vector.extract_strided_slice %168 {offsets = [0, 16], sizes = [3, 16], strides = [1, 1]} : vector<3x64xf32> to vector<3x16xf32>
      %176 = arith.negf %175 : vector<3x16xf32>
      %177 = math.exp %176 : vector<3x16xf32>
      %cst_95 = arith.constant 1.000000e+00 : f32
      %178 = vector.broadcast %cst_95 : f32 to vector<3x16xf32>
      %179 = arith.addf %178, %177 : vector<3x16xf32>
      %180 = arith.divf %178, %179 : vector<3x16xf32>
      %181 = vector.extract_strided_slice %168 {offsets = [0, 32], sizes = [3, 16], strides = [1, 1]} : vector<3x64xf32> to vector<3x16xf32>
      %182 = math.tanh %181 : vector<3x16xf32>
      %183 = vector.extract_strided_slice %168 {offsets = [0, 48], sizes = [3, 16], strides = [1, 1]} : vector<3x64xf32> to vector<3x16xf32>
      %184 = arith.negf %183 : vector<3x16xf32>
      %185 = math.exp %184 : vector<3x16xf32>
      %cst_96 = arith.constant 1.000000e+00 : f32
      %186 = vector.broadcast %cst_96 : f32 to vector<3x16xf32>
      %187 = arith.addf %186, %185 : vector<3x16xf32>
      %188 = arith.divf %186, %187 : vector<3x16xf32>
      %189 = arith.mulf %180, %arg31 : vector<3x16xf32>
      %190 = arith.mulf %174, %182 : vector<3x16xf32>
      %191 = arith.addf %189, %190 : vector<3x16xf32>
      %192 = math.tanh %191 : vector<3x16xf32>
      %193 = arith.mulf %188, %192 : vector<3x16xf32>
      scf.yield %193, %191 : vector<3x16xf32>, vector<3x16xf32>
    }
    %c4_i32_12 = arith.constant 4 : i32
    %c0_13 = arith.constant 0 : index
    %c0_14 = arith.constant 0 : index
    %10 = vector.load %arg1[%c0_13, %c0_14] : memref<3x2xf32, #tpu.memory_space<vmem>>, vector<3x2xf32>
    %c0_15 = arith.constant 0 : index
    %c0_16 = arith.constant 0 : index
    %11 = vector.load %arg8[%c0_15, %c0_16] : memref<2x16xf32, #tpu.memory_space<vmem>>, vector<2x16xf32>
    %c0_17 = arith.constant 0 : index
    %c0_18 = arith.constant 0 : index
    %12 = vector.load %arg9[%c0_17, %c0_18] : memref<1x16xf32, #tpu.memory_space<vmem>>, vector<1x16xf32>
    %c0_19 = arith.constant 0 : index
    %c0_20 = arith.constant 0 : index
    %13 = vector.load %arg10[%c0_19, %c0_20] : memref<16x512xf32, #tpu.memory_space<vmem>>, vector<16x512xf32>
    %c0_21 = arith.constant 0 : index
    %c0_22 = arith.constant 0 : index
    %14 = vector.load %arg11[%c0_21, %c0_22] : memref<16x512xf32, #tpu.memory_space<vmem>>, vector<16x512xf32>
    %c0_23 = arith.constant 0 : index
    %c0_24 = arith.constant 0 : index
    %15 = vector.load %arg12[%c0_23, %c0_24] : memref<1x512xf32, #tpu.memory_space<vmem>>, vector<1x512xf32>
    %c0_25 = arith.constant 0 : index
    %c0_26 = arith.constant 0 : index
    %16 = vector.load %arg13[%c0_25, %c0_26] : memref<1x512xf32, #tpu.memory_space<vmem>>, vector<1x512xf32>
    %c0_27 = arith.constant 0 : index
    %c0_28 = arith.constant 0 : index
    %17 = vector.load %arg14[%c0_27, %c0_28] : memref<1x512xf32, #tpu.memory_space<vmem>>, vector<1x512xf32>
    %c0_29 = arith.constant 0 : index
    %c0_30 = arith.constant 0 : index
    %18 = vector.load %arg15[%c0_29, %c0_30] : memref<512x32xf32, #tpu.memory_space<vmem>>, vector<512x32xf32>
    %c0_31 = arith.constant 0 : index
    %c0_32 = arith.constant 0 : index
    %19 = vector.load %arg16[%c0_31, %c0_32] : memref<1x32xf32, #tpu.memory_space<vmem>>, vector<1x32xf32>
    %c0_33 = arith.constant 0 : index
    %c0_34 = arith.constant 0 : index
    %20 = vector.load %arg17[%c0_33, %c0_34] : memref<1x32xf32, #tpu.memory_space<vmem>>, vector<1x32xf32>
    %c0_35 = arith.constant 0 : index
    %c0_36 = arith.constant 0 : index
    %21 = vector.load %arg18[%c0_35, %c0_36] : memref<1x32xf32, #tpu.memory_space<vmem>>, vector<1x32xf32>
    %22 = vector.shape_cast %10 : vector<3x2xf32> to vector<1x3x2xf32>
    %23 = vector.shape_cast %10 : vector<3x2xf32> to vector<3x1x2xf32>
    %24 = vector.broadcast %22 : vector<1x3x2xf32> to vector<3x3x2xf32>
    %25 = vector.broadcast %23 : vector<3x1x2xf32> to vector<3x3x2xf32>
    %26 = arith.subf %24, %25 : vector<3x3x2xf32>
    %27 = vector.shape_cast %26 : vector<3x3x2xf32> to vector<9x2xf32>
    %cst_37 = arith.constant dense<0.000000e+00> : vector<9x16xf32>
    %28 = tpu.matmul %27, %11, %cst_37 {dimension_numbers = #tpu.dot_dimension_numbers<[1], [0], [0], [1], [0, 0, 1, 1], [], []>} : vector<9x2xf32>, vector<2x16xf32>, vector<9x16xf32> -> vector<9x16xf32>
    %29 = vector.broadcast %12 : vector<1x16xf32> to vector<9x16xf32>
    %30 = arith.addf %28, %29 : vector<9x16xf32>
    %cst_38 = arith.constant dense<0.000000e+00> : vector<9x512xf32>
    %31 = tpu.matmul %30, %13, %cst_38 {dimension_numbers = #tpu.dot_dimension_numbers<[1], [0], [0], [1], [0, 0, 1, 1], [], []>} : vector<9x16xf32>, vector<16x512xf32>, vector<9x512xf32> -> vector<9x512xf32>
    %cst_39 = arith.constant dense<0.000000e+00> : vector<3x512xf32>
    %32 = tpu.matmul %9#0, %14, %cst_39 {dimension_numbers = #tpu.dot_dimension_numbers<[1], [0], [0], [1], [0, 0, 1, 1], [], []>} : vector<3x16xf32>, vector<16x512xf32>, vector<3x512xf32> -> vector<3x512xf32>
    %33 = tpu.concatenate %32, %32, %32 in 0 : vector<3x512xf32>, vector<3x512xf32>, vector<3x512xf32> -> vector<9x512xf32>
    %34 = arith.addf %31, %33 : vector<9x512xf32>
    %35 = vector.broadcast %15 : vector<1x512xf32> to vector<9x512xf32>
    %36 = arith.addf %34, %35 : vector<9x512xf32>
    %cst_40 = arith.constant dense<0.000000e+00> : vector<512xf32>
    %37 = vector.multi_reduction <add>, %36, %cst_40 [0] : vector<9x512xf32> to vector<512xf32>
    %38 = vector.shape_cast %37 : vector<512xf32> to vector<1x512xf32>
    %cst_41 = arith.constant 9.000000e+00 : f32
    %39 = vector.broadcast %cst_41 : f32 to vector<1x512xf32>
    %40 = arith.divf %38, %39 : vector<1x512xf32>
    %41 = vector.broadcast %40 : vector<1x512xf32> to vector<9x512xf32>
    %42 = arith.subf %36, %41 : vector<9x512xf32>
    %43 = arith.mulf %42, %42 : vector<9x512xf32>
    %cst_42 = arith.constant dense<0.000000e+00> : vector<512xf32>
    %44 = vector.multi_reduction <add>, %43, %cst_42 [0] : vector<9x512xf32> to vector<512xf32>
    %45 = vector.shape_cast %44 : vector<512xf32> to vector<1x512xf32>
    %cst_43 = arith.constant 9.000000e+00 : f32
    %46 = vector.broadcast %cst_43 : f32 to vector<1x512xf32>
    %47 = arith.divf %45, %46 : vector<1x512xf32>
    %48 = vector.broadcast %40 : vector<1x512xf32> to vector<9x512xf32>
    %49 = arith.subf %36, %48 : vector<9x512xf32>
    %cst_44 = arith.constant 9.99999974E-6 : f32
    %50 = vector.broadcast %cst_44 : f32 to vector<1x512xf32>
    %51 = arith.addf %47, %50 : vector<1x512xf32>
    %52 = math.rsqrt %51 : vector<1x512xf32>
    %53 = vector.broadcast %52 : vector<1x512xf32> to vector<9x512xf32>
    %54 = arith.mulf %49, %53 : vector<9x512xf32>
    %55 = vector.broadcast %16 : vector<1x512xf32> to vector<9x512xf32>
    %56 = arith.mulf %54, %55 : vector<9x512xf32>
    %57 = vector.broadcast %17 : vector<1x512xf32> to vector<9x512xf32>
    %58 = arith.addf %56, %57 : vector<9x512xf32>
    %cst_45 = arith.constant 0.000000e+00 : f32
    %59 = vector.broadcast %cst_45 : f32 to vector<9x512xf32>
    %60 = arith.maximumf %58, %59 : vector<9x512xf32>
    %cst_46 = arith.constant dense<0.000000e+00> : vector<9x32xf32>
    %61 = tpu.matmul %60, %18, %cst_46 {dimension_numbers = #tpu.dot_dimension_numbers<[1], [0], [0], [1], [0, 0, 1, 1], [], []>} : vector<9x512xf32>, vector<512x32xf32>, vector<9x32xf32> -> vector<9x32xf32>
    %62 = vector.broadcast %19 : vector<1x32xf32> to vector<9x32xf32>
    %63 = arith.addf %61, %62 : vector<9x32xf32>
    %cst_47 = arith.constant dense<0.000000e+00> : vector<32xf32>
    %64 = vector.multi_reduction <add>, %63, %cst_47 [0] : vector<9x32xf32> to vector<32xf32>
    %65 = vector.shape_cast %64 : vector<32xf32> to vector<1x32xf32>
    %cst_48 = arith.constant 9.000000e+00 : f32
    %66 = vector.broadcast %cst_48 : f32 to vector<1x32xf32>
    %67 = arith.divf %65, %66 : vector<1x32xf32>
    %68 = vector.broadcast %67 : vector<1x32xf32> to vector<9x32xf32>
    %69 = arith.subf %63, %68 : vector<9x32xf32>
    %70 = arith.mulf %69, %69 : vector<9x32xf32>
    %cst_49 = arith.constant dense<0.000000e+00> : vector<32xf32>
    %71 = vector.multi_reduction <add>, %70, %cst_49 [0] : vector<9x32xf32> to vector<32xf32>
    %72 = vector.shape_cast %71 : vector<32xf32> to vector<1x32xf32>
    %cst_50 = arith.constant 9.000000e+00 : f32
    %73 = vector.broadcast %cst_50 : f32 to vector<1x32xf32>
    %74 = arith.divf %72, %73 : vector<1x32xf32>
    %75 = vector.broadcast %67 : vector<1x32xf32> to vector<9x32xf32>
    %76 = arith.subf %63, %75 : vector<9x32xf32>
    %cst_51 = arith.constant 9.99999974E-6 : f32
    %77 = vector.broadcast %cst_51 : f32 to vector<1x32xf32>
    %78 = arith.addf %74, %77 : vector<1x32xf32>
    %79 = math.rsqrt %78 : vector<1x32xf32>
    %80 = vector.broadcast %79 : vector<1x32xf32> to vector<9x32xf32>
    %81 = arith.mulf %76, %80 : vector<9x32xf32>
    %82 = vector.broadcast %20 : vector<1x32xf32> to vector<9x32xf32>
    %83 = arith.mulf %81, %82 : vector<9x32xf32>
    %84 = vector.broadcast %21 : vector<1x32xf32> to vector<9x32xf32>
    %85 = arith.addf %83, %84 : vector<9x32xf32>
    %cst_52 = arith.constant 0.000000e+00 : f32
    %86 = vector.broadcast %cst_52 : f32 to vector<9x32xf32>
    %87 = arith.maximumf %85, %86 : vector<9x32xf32>
    %88 = vector.shape_cast %87 : vector<9x32xf32> to vector<3x3x32xf32>
    %cst_53 = arith.constant dense<0xFF800000> : vector<3x32xf32>
    %89 = vector.multi_reduction <maximumf>, %88, %cst_53 [1] : vector<3x3x32xf32> to vector<3x32xf32>
    %c0_54 = arith.constant 0 : index
    %c0_55 = arith.constant 0 : index
    %90 = vector.load %arg19[%c0_54, %c0_55] : memref<16x64xf32, #tpu.memory_space<vmem>>, vector<16x64xf32>
    %c0_56 = arith.constant 0 : index
    %c0_57 = arith.constant 0 : index
    %91 = vector.load %arg20[%c0_56, %c0_57] : memref<32x64xf32, #tpu.memory_space<vmem>>, vector<32x64xf32>
    %c0_58 = arith.constant 0 : index
    %c0_59 = arith.constant 0 : index
    %92 = vector.load %arg21[%c0_58, %c0_59] : memref<1x64xf32, #tpu.memory_space<vmem>>, vector<1x64xf32>
    %c0_60 = arith.constant 0 : index
    %c0_61 = arith.constant 0 : index
    %93 = vector.load %arg22[%c0_60, %c0_61] : memref<1x64xf32, #tpu.memory_space<vmem>>, vector<1x64xf32>
    %c0_62 = arith.constant 0 : index
    %c0_63 = arith.constant 0 : index
    %94 = vector.load %arg23[%c0_62, %c0_63] : memref<1x64xf32, #tpu.memory_space<vmem>>, vector<1x64xf32>
    %c0_64 = arith.constant 0 : index
    %c0_65 = arith.constant 0 : index
    %95 = vector.load %arg24[%c0_64, %c0_65] : memref<64x32xf32, #tpu.memory_space<vmem>>, vector<64x32xf32>
    %c0_66 = arith.constant 0 : index
    %c0_67 = arith.constant 0 : index
    %96 = vector.load %arg25[%c0_66, %c0_67] : memref<1x32xf32, #tpu.memory_space<vmem>>, vector<1x32xf32>
    %c0_68 = arith.constant 0 : index
    %c0_69 = arith.constant 0 : index
    %97 = vector.load %arg26[%c0_68, %c0_69] : memref<1x32xf32, #tpu.memory_space<vmem>>, vector<1x32xf32>
    %c0_70 = arith.constant 0 : index
    %c0_71 = arith.constant 0 : index
    %98 = vector.load %arg27[%c0_70, %c0_71] : memref<1x32xf32, #tpu.memory_space<vmem>>, vector<1x32xf32>
    %cst_72 = arith.constant dense<0.000000e+00> : vector<3x64xf32>
    %99 = tpu.matmul %9#0, %90, %cst_72 {dimension_numbers = #tpu.dot_dimension_numbers<[1], [0], [0], [1], [0, 0, 1, 1], [], []>} : vector<3x16xf32>, vector<16x64xf32>, vector<3x64xf32> -> vector<3x64xf32>
    %cst_73 = arith.constant dense<0.000000e+00> : vector<3x64xf32>
    %100 = tpu.matmul %89, %91, %cst_73 {dimension_numbers = #tpu.dot_dimension_numbers<[1], [0], [0], [1], [0, 0, 1, 1], [], []>} : vector<3x32xf32>, vector<32x64xf32>, vector<3x64xf32> -> vector<3x64xf32>
    %101 = arith.addf %99, %100 : vector<3x64xf32>
    %102 = vector.broadcast %92 : vector<1x64xf32> to vector<3x64xf32>
    %103 = arith.addf %101, %102 : vector<3x64xf32>
    %cst_74 = arith.constant dense<0.000000e+00> : vector<64xf32>
    %104 = vector.multi_reduction <add>, %103, %cst_74 [0] : vector<3x64xf32> to vector<64xf32>
    %105 = vector.shape_cast %104 : vector<64xf32> to vector<1x64xf32>
    %cst_75 = arith.constant 3.000000e+00 : f32
    %106 = vector.broadcast %cst_75 : f32 to vector<1x64xf32>
    %107 = arith.divf %105, %106 : vector<1x64xf32>
    %108 = vector.broadcast %107 : vector<1x64xf32> to vector<3x64xf32>
    %109 = arith.subf %103, %108 : vector<3x64xf32>
    %110 = arith.mulf %109, %109 : vector<3x64xf32>
    %cst_76 = arith.constant dense<0.000000e+00> : vector<64xf32>
    %111 = vector.multi_reduction <add>, %110, %cst_76 [0] : vector<3x64xf32> to vector<64xf32>
    %112 = vector.shape_cast %111 : vector<64xf32> to vector<1x64xf32>
    %cst_77 = arith.constant 3.000000e+00 : f32
    %113 = vector.broadcast %cst_77 : f32 to vector<1x64xf32>
    %114 = arith.divf %112, %113 : vector<1x64xf32>
    %115 = vector.broadcast %107 : vector<1x64xf32> to vector<3x64xf32>
    %116 = arith.subf %103, %115 : vector<3x64xf32>
    %cst_78 = arith.constant 9.99999974E-6 : f32
    %117 = vector.broadcast %cst_78 : f32 to vector<1x64xf32>
    %118 = arith.addf %114, %117 : vector<1x64xf32>
    %119 = math.rsqrt %118 : vector<1x64xf32>
    %120 = vector.broadcast %119 : vector<1x64xf32> to vector<3x64xf32>
    %121 = arith.mulf %116, %120 : vector<3x64xf32>
    %122 = vector.broadcast %93 : vector<1x64xf32> to vector<3x64xf32>
    %123 = arith.mulf %121, %122 : vector<3x64xf32>
    %124 = vector.broadcast %94 : vector<1x64xf32> to vector<3x64xf32>
    %125 = arith.addf %123, %124 : vector<3x64xf32>
    %cst_79 = arith.constant 0.000000e+00 : f32
    %126 = vector.broadcast %cst_79 : f32 to vector<3x64xf32>
    %127 = arith.maximumf %125, %126 : vector<3x64xf32>
    %cst_80 = arith.constant dense<0.000000e+00> : vector<3x32xf32>
    %128 = tpu.matmul %127, %95, %cst_80 {dimension_numbers = #tpu.dot_dimension_numbers<[1], [0], [0], [1], [0, 0, 1, 1], [], []>} : vector<3x64xf32>, vector<64x32xf32>, vector<3x32xf32> -> vector<3x32xf32>
    %129 = vector.broadcast %96 : vector<1x32xf32> to vector<3x32xf32>
    %130 = arith.addf %128, %129 : vector<3x32xf32>
    %cst_81 = arith.constant dense<0.000000e+00> : vector<32xf32>
    %131 = vector.multi_reduction <add>, %130, %cst_81 [0] : vector<3x32xf32> to vector<32xf32>
    %132 = vector.shape_cast %131 : vector<32xf32> to vector<1x32xf32>
    %cst_82 = arith.constant 3.000000e+00 : f32
    %133 = vector.broadcast %cst_82 : f32 to vector<1x32xf32>
    %134 = arith.divf %132, %133 : vector<1x32xf32>
    %135 = vector.broadcast %134 : vector<1x32xf32> to vector<3x32xf32>
    %136 = arith.subf %130, %135 : vector<3x32xf32>
    %137 = arith.mulf %136, %136 : vector<3x32xf32>
    %cst_83 = arith.constant dense<0.000000e+00> : vector<32xf32>
    %138 = vector.multi_reduction <add>, %137, %cst_83 [0] : vector<3x32xf32> to vector<32xf32>
    %139 = vector.shape_cast %138 : vector<32xf32> to vector<1x32xf32>
    %cst_84 = arith.constant 3.000000e+00 : f32
    %140 = vector.broadcast %cst_84 : f32 to vector<1x32xf32>
    %141 = arith.divf %139, %140 : vector<1x32xf32>
    %142 = vector.broadcast %134 : vector<1x32xf32> to vector<3x32xf32>
    %143 = arith.subf %130, %142 : vector<3x32xf32>
    %cst_85 = arith.constant 9.99999974E-6 : f32
    %144 = vector.broadcast %cst_85 : f32 to vector<1x32xf32>
    %145 = arith.addf %141, %144 : vector<1x32xf32>
    %146 = math.rsqrt %145 : vector<1x32xf32>
    %147 = vector.broadcast %146 : vector<1x32xf32> to vector<3x32xf32>
    %148 = arith.mulf %143, %147 : vector<3x32xf32>
    %149 = vector.broadcast %97 : vector<1x32xf32> to vector<3x32xf32>
    %150 = arith.mulf %148, %149 : vector<3x32xf32>
    %151 = vector.broadcast %98 : vector<1x32xf32> to vector<3x32xf32>
    %152 = arith.addf %150, %151 : vector<3x32xf32>
    %cst_86 = arith.constant 0.000000e+00 : f32
    %153 = vector.broadcast %cst_86 : f32 to vector<3x32xf32>
    %154 = arith.maximumf %152, %153 : vector<3x32xf32>
    %c0_87 = arith.constant 0 : index
    %c0_88 = arith.constant 0 : index
    %155 = vector.load %arg28[%c0_87, %c0_88] : memref<3x32xf32, #tpu.memory_space<vmem>>, vector<3x32xf32>
    tpu.vector_store %arg28[%c0_87, %c0_88], %154 {strides = array<i32>} : memref<3x32xf32, #tpu.memory_space<vmem>>, vector<3x32xf32>,
    return
  }
}

module attributes {stable_mosaic.version = 11 : i64} {
  func.func @decoder_rollout_kernel(%arg0: memref<3x2xf32, #tpu.memory_space<vmem>>, %arg1: memref<3x2xf32, #tpu.memory_space<vmem>>, %arg2: memref<3x32xf32, #tpu.memory_space<vmem>>, %arg3: memref<2x16xf32, #tpu.memory_space<vmem>>, %arg4: memref<1x16xf32, #tpu.memory_space<vmem>>, %arg5: memref<16x128xf32, #tpu.memory_space<vmem>>, %arg6: memref<32x128xf32, #tpu.memory_space<vmem>>, %arg7: memref<1x128xf32, #tpu.memory_space<vmem>>, %arg8: memref<1x128xf32, #tpu.memory_space<vmem>>, %arg9: memref<32x2xf32, #tpu.memory_space<vmem>>, %arg10: memref<1x2xf32, #tpu.memory_space<vmem>>, %arg11: memref<2x16xf32, #tpu.memory_space<vmem>>, %arg12: memref<1x16xf32, #tpu.memory_space<vmem>>, %arg13: memref<16x512xf32, #tpu.memory_space<vmem>>, %arg14: memref<32x512xf32, #tpu.memory_space<vmem>>, %arg15: memref<1x512xf32, #tpu.memory_space<vmem>>, %arg16: memref<1x512xf32, #tpu.memory_space<vmem>>, %arg17: memref<1x512xf32, #tpu.memory_space<vmem>>, %arg18: memref<512x32xf32, #tpu.memory_space<vmem>>, %arg19: memref<1x32xf32, #tpu.memory_space<vmem>>, %arg20: memref<1x32xf32, #tpu.memory_space<vmem>>, %arg21: memref<1x32xf32, #tpu.memory_space<vmem>>, %arg22: memref<32x64xf32, #tpu.memory_space<vmem>>, %arg23: memref<32x64xf32, #tpu.memory_space<vmem>>, %arg24: memref<1x64xf32, #tpu.memory_space<vmem>>, %arg25: memref<1x64xf32, #tpu.memory_space<vmem>>, %arg26: memref<1x64xf32, #tpu.memory_space<vmem>>, %arg27: memref<64x32xf32, #tpu.memory_space<vmem>>, %arg28: memref<1x32xf32, #tpu.memory_space<vmem>>, %arg29: memref<1x32xf32, #tpu.memory_space<vmem>>, %arg30: memref<1x32xf32, #tpu.memory_space<vmem>>, %arg31: memref<4x3x2xf32, #tpu.memory_space<vmem>>, %arg32: memref<3x32xf32, #tpu.memory_space<vmem>>, %arg33: memref<3x32xf32, #tpu.memory_space<vmem>>, %arg34: memref<3x2xf32, #tpu.memory_space<vmem>>, %arg35: memref<3x2xf32, #tpu.memory_space<vmem>>) attributes {dimension_semantics = [], scalar_prefetch = 0 : i64, scratch_operands = 4 : i64, tpu.core_type = #tpu.core_type<tc>} {
    %c0 = arith.constant 0 : index
    %c0_0 = arith.constant 0 : index
    %0 = vector.load %arg3[%c0, %c0_0] : memref<2x16xf32, #tpu.memory_space<vmem>>, vector<2x16xf32>
    %c0_1 = arith.constant 0 : index
    %c0_2 = arith.constant 0 : index
    %1 = vector.load %arg4[%c0_1, %c0_2] : memref<1x16xf32, #tpu.memory_space<vmem>>, vector<1x16xf32>
    %c0_3 = arith.constant 0 : index
    %c0_4 = arith.constant 0 : index
    %2 = vector.load %arg5[%c0_3, %c0_4] : memref<16x128xf32, #tpu.memory_space<vmem>>, vector<16x128xf32>
    %c0_5 = arith.constant 0 : index
    %c0_6 = arith.constant 0 : index
    %3 = vector.load %arg6[%c0_5, %c0_6] : memref<32x128xf32, #tpu.memory_space<vmem>>, vector<32x128xf32>
    %c0_7 = arith.constant 0 : index
    %c0_8 = arith.constant 0 : index
    %4 = vector.load %arg7[%c0_7, %c0_8] : memref<1x128xf32, #tpu.memory_space<vmem>>, vector<1x128xf32>
    %c0_9 = arith.constant 0 : index
    %c0_10 = arith.constant 0 : index
    %5 = vector.load %arg8[%c0_9, %c0_10] : memref<1x128xf32, #tpu.memory_space<vmem>>, vector<1x128xf32>
    %c0_11 = arith.constant 0 : index
    %c0_12 = arith.constant 0 : index
    %6 = vector.load %arg9[%c0_11, %c0_12] : memref<32x2xf32, #tpu.memory_space<vmem>>, vector<32x2xf32>
    %c0_13 = arith.constant 0 : index
    %c0_14 = arith.constant 0 : index
    %7 = vector.load %arg10[%c0_13, %c0_14] : memref<1x2xf32, #tpu.memory_space<vmem>>, vector<1x2xf32>
    %c0_15 = arith.constant 0 : index
    %c0_16 = arith.constant 0 : index
    %8 = vector.load %arg2[%c0_15, %c0_16] : memref<3x32xf32, #tpu.memory_space<vmem>>, vector<3x32xf32>
    %c0_17 = arith.constant 0 : index
    %c0_18 = arith.constant 0 : index
    %9 = vector.load %arg32[%c0_17, %c0_18] : memref<3x32xf32, #tpu.memory_space<vmem>>, vector<3x32xf32>
    tpu.vector_store %arg32[%c0_17, %c0_18], %8 {strides = array<i32>} : memref<3x32xf32, #tpu.memory_space<vmem>>, vector<3x32xf32>,
    %cst = arith.constant 0.000000e+00 : f32
    %10 = vector.broadcast %cst : f32 to vector<3x32xf32>
    %c0_19 = arith.constant 0 : index
    %c0_20 = arith.constant 0 : index
    %11 = vector.load %arg33[%c0_19, %c0_20] : memref<3x32xf32, #tpu.memory_space<vmem>>, vector<3x32xf32>
    tpu.vector_store %arg33[%c0_19, %c0_20], %10 {strides = array<i32>} : memref<3x32xf32, #tpu.memory_space<vmem>>, vector<3x32xf32>,
    %c0_21 = arith.constant 0 : index
    %c0_22 = arith.constant 0 : index
    %12 = vector.load %arg0[%c0_21, %c0_22] : memref<3x2xf32, #tpu.memory_space<vmem>>, vector<3x2xf32>
    %c0_23 = arith.constant 0 : index
    %c0_24 = arith.constant 0 : index
    %13 = vector.load %arg34[%c0_23, %c0_24] : memref<3x2xf32, #tpu.memory_space<vmem>>, vector<3x2xf32>
    tpu.vector_store %arg34[%c0_23, %c0_24], %12 {strides = array<i32>} : memref<3x2xf32, #tpu.memory_space<vmem>>, vector<3x2xf32>,
    %c0_25 = arith.constant 0 : index
    %c0_26 = arith.constant 0 : index
    %14 = vector.load %arg1[%c0_25, %c0_26] : memref<3x2xf32, #tpu.memory_space<vmem>>, vector<3x2xf32>
    %c0_27 = arith.constant 0 : index
    %c0_28 = arith.constant 0 : index
    %15 = vector.load %arg35[%c0_27, %c0_28] : memref<3x2xf32, #tpu.memory_space<vmem>>, vector<3x2xf32>
    tpu.vector_store %arg35[%c0_27, %c0_28], %14 {strides = array<i32>} : memref<3x2xf32, #tpu.memory_space<vmem>>, vector<3x2xf32>,
    %c0_i32 = arith.constant 0 : i32
    %c4_i32 = arith.constant 4 : i32
    %16 = arith.addi %c0_i32, %c4_i32 : i32
    %c1_i32 = arith.constant 1 : i32
    scf.for %arg36 = %c0_i32 to %16 step %c1_i32  : i32 {
      %c1_i32_30 = arith.constant 1 : i32
      %17 = arith.muli %arg36, %c1_i32_30 : i32
      %c0_i32_31 = arith.constant 0 : i32
      %18 = arith.addi %c0_i32_31, %17 : i32
      %c0_32 = arith.constant 0 : index
      %c0_33 = arith.constant 0 : index
      %19 = vector.load %arg35[%c0_32, %c0_33] : memref<3x2xf32, #tpu.memory_space<vmem>>, vector<3x2xf32>
      %cst_34 = arith.constant dense<0.000000e+00> : vector<3x16xf32>
      %20 = tpu.matmul %19, %0, %cst_34 {dimension_numbers = #tpu.dot_dimension_numbers<[1], [0], [0], [1], [0, 0, 1, 1], [], []>} : vector<3x2xf32>, vector<2x16xf32>, vector<3x16xf32> -> vector<3x16xf32>
      %21 = vector.broadcast %1 : vector<1x16xf32> to vector<3x16xf32>
      %22 = arith.addf %20, %21 : vector<3x16xf32>
      %c0_35 = arith.constant 0 : index
      %c0_36 = arith.constant 0 : index
      %23 = vector.load %arg32[%c0_35, %c0_36] : memref<3x32xf32, #tpu.memory_space<vmem>>, vector<3x32xf32>
      %c0_37 = arith.constant 0 : index
      %c0_38 = arith.constant 0 : index
      %24 = vector.load %arg33[%c0_37, %c0_38] : memref<3x32xf32, #tpu.memory_space<vmem>>, vector<3x32xf32>
      %cst_39 = arith.constant dense<0.000000e+00> : vector<3x128xf32>
      %25 = tpu.matmul %22, %2, %cst_39 {dimension_numbers = #tpu.dot_dimension_numbers<[1], [0], [0], [1], [0, 0, 1, 1], [], []>} : vector<3x16xf32>, vector<16x128xf32>, vector<3x128xf32> -> vector<3x128xf32>
      %26 = vector.broadcast %4 : vector<1x128xf32> to vector<3x128xf32>
      %27 = arith.addf %25, %26 : vector<3x128xf32>
      %cst_40 = arith.constant dense<0.000000e+00> : vector<3x128xf32>
      %28 = tpu.matmul %23, %3, %cst_40 {dimension_numbers = #tpu.dot_dimension_numbers<[1], [0], [0], [1], [0, 0, 1, 1], [], []>} : vector<3x32xf32>, vector<32x128xf32>, vector<3x128xf32> -> vector<3x128xf32>
      %29 = arith.addf %27, %28 : vector<3x128xf32>
      %30 = vector.broadcast %5 : vector<1x128xf32> to vector<3x128xf32>
      %31 = arith.addf %29, %30 : vector<3x128xf32>
      %32 = vector.extract_strided_slice %31 {offsets = [0, 0], sizes = [3, 32], strides = [1, 1]} : vector<3x128xf32> to vector<3x32xf32>
      %33 = arith.negf %32 : vector<3x32xf32>
      %34 = math.exp %33 : vector<3x32xf32>
      %cst_41 = arith.constant 1.000000e+00 : f32
      %35 = vector.broadcast %cst_41 : f32 to vector<3x32xf32>
      %36 = arith.addf %35, %34 : vector<3x32xf32>
      %37 = arith.divf %35, %36 : vector<3x32xf32>
      %38 = vector.extract_strided_slice %31 {offsets = [0, 32], sizes = [3, 32], strides = [1, 1]} : vector<3x128xf32> to vector<3x32xf32>
      %39 = arith.negf %38 : vector<3x32xf32>
      %40 = math.exp %39 : vector<3x32xf32>
      %cst_42 = arith.constant 1.000000e+00 : f32
      %41 = vector.broadcast %cst_42 : f32 to vector<3x32xf32>
      %42 = arith.addf %41, %40 : vector<3x32xf32>
      %43 = arith.divf %41, %42 : vector<3x32xf32>
      %44 = vector.extract_strided_slice %31 {offsets = [0, 64], sizes = [3, 32], strides = [1, 1]} : vector<3x128xf32> to vector<3x32xf32>
      %45 = math.tanh %44 : vector<3x32xf32>
      %46 = vector.extract_strided_slice %31 {offsets = [0, 96], sizes = [3, 32], strides = [1, 1]} : vector<3x128xf32> to vector<3x32xf32>
      %47 = arith.negf %46 : vector<3x32xf32>
      %48 = math.exp %47 : vector<3x32xf32>
      %cst_43 = arith.constant 1.000000e+00 : f32
      %49 = vector.broadcast %cst_43 : f32 to vector<3x32xf32>
      %50 = arith.addf %49, %48 : vector<3x32xf32>
      %51 = arith.divf %49, %50 : vector<3x32xf32>
      %52 = arith.mulf %43, %24 : vector<3x32xf32>
      %53 = arith.mulf %37, %45 : vector<3x32xf32>
      %54 = arith.addf %52, %53 : vector<3x32xf32>
      %55 = math.tanh %54 : vector<3x32xf32>
      %56 = arith.mulf %51, %55 : vector<3x32xf32>
      %cst_44 = arith.constant dense<0.000000e+00> : vector<3x2xf32>
      %57 = tpu.matmul %56, %6, %cst_44 {dimension_numbers = #tpu.dot_dimension_numbers<[1], [0], [0], [1], [0, 0, 1, 1], [], []>} : vector<3x32xf32>, vector<32x2xf32>, vector<3x2xf32> -> vector<3x2xf32>
      %58 = vector.broadcast %7 : vector<1x2xf32> to vector<3x2xf32>
      %59 = arith.addf %57, %58 : vector<3x2xf32>
      %c0_45 = arith.constant 0 : index
      %c0_46 = arith.constant 0 : index
      %60 = vector.load %arg34[%c0_45, %c0_46] : memref<3x2xf32, #tpu.memory_space<vmem>>, vector<3x2xf32>
      %61 = arith.addf %60, %59 : vector<3x2xf32>
      %c0_47 = arith.constant 0 : index
      %c0_48 = arith.constant 0 : index
      %62 = vector.load %arg11[%c0_47, %c0_48] : memref<2x16xf32, #tpu.memory_space<vmem>>, vector<2x16xf32>
      %c0_49 = arith.constant 0 : index
      %c0_50 = arith.constant 0 : index
      %63 = vector.load %arg12[%c0_49, %c0_50] : memref<1x16xf32, #tpu.memory_space<vmem>>, vector<1x16xf32>
      %c0_51 = arith.constant 0 : index
      %c0_52 = arith.constant 0 : index
      %64 = vector.load %arg13[%c0_51, %c0_52] : memref<16x512xf32, #tpu.memory_space<vmem>>, vector<16x512xf32>
      %c0_53 = arith.constant 0 : index
      %c0_54 = arith.constant 0 : index
      %65 = vector.load %arg14[%c0_53, %c0_54] : memref<32x512xf32, #tpu.memory_space<vmem>>, vector<32x512xf32>
      %c0_55 = arith.constant 0 : index
      %c0_56 = arith.constant 0 : index
      %66 = vector.load %arg15[%c0_55, %c0_56] : memref<1x512xf32, #tpu.memory_space<vmem>>, vector<1x512xf32>
      %c0_57 = arith.constant 0 : index
      %c0_58 = arith.constant 0 : index
      %67 = vector.load %arg16[%c0_57, %c0_58] : memref<1x512xf32, #tpu.memory_space<vmem>>, vector<1x512xf32>
      %c0_59 = arith.constant 0 : index
      %c0_60 = arith.constant 0 : index
      %68 = vector.load %arg17[%c0_59, %c0_60] : memref<1x512xf32, #tpu.memory_space<vmem>>, vector<1x512xf32>
      %c0_61 = arith.constant 0 : index
      %c0_62 = arith.constant 0 : index
      %69 = vector.load %arg18[%c0_61, %c0_62] : memref<512x32xf32, #tpu.memory_space<vmem>>, vector<512x32xf32>
      %c0_63 = arith.constant 0 : index
      %c0_64 = arith.constant 0 : index
      %70 = vector.load %arg19[%c0_63, %c0_64] : memref<1x32xf32, #tpu.memory_space<vmem>>, vector<1x32xf32>
      %c0_65 = arith.constant 0 : index
      %c0_66 = arith.constant 0 : index
      %71 = vector.load %arg20[%c0_65, %c0_66] : memref<1x32xf32, #tpu.memory_space<vmem>>, vector<1x32xf32>
      %c0_67 = arith.constant 0 : index
      %c0_68 = arith.constant 0 : index
      %72 = vector.load %arg21[%c0_67, %c0_68] : memref<1x32xf32, #tpu.memory_space<vmem>>, vector<1x32xf32>
      %73 = vector.shape_cast %61 : vector<3x2xf32> to vector<1x3x2xf32>
      %74 = vector.shape_cast %61 : vector<3x2xf32> to vector<3x1x2xf32>
      %75 = vector.broadcast %73 : vector<1x3x2xf32> to vector<3x3x2xf32>
      %76 = vector.broadcast %74 : vector<3x1x2xf32> to vector<3x3x2xf32>
      %77 = arith.subf %75, %76 : vector<3x3x2xf32>
      %78 = vector.shape_cast %77 : vector<3x3x2xf32> to vector<9x2xf32>
      %cst_69 = arith.constant dense<0.000000e+00> : vector<9x16xf32>
      %79 = tpu.matmul %78, %62, %cst_69 {dimension_numbers = #tpu.dot_dimension_numbers<[1], [0], [0], [1], [0, 0, 1, 1], [], []>} : vector<9x2xf32>, vector<2x16xf32>, vector<9x16xf32> -> vector<9x16xf32>
      %80 = vector.broadcast %63 : vector<1x16xf32> to vector<9x16xf32>
      %81 = arith.addf %79, %80 : vector<9x16xf32>
      %cst_70 = arith.constant dense<0.000000e+00> : vector<9x512xf32>
      %82 = tpu.matmul %81, %64, %cst_70 {dimension_numbers = #tpu.dot_dimension_numbers<[1], [0], [0], [1], [0, 0, 1, 1], [], []>} : vector<9x16xf32>, vector<16x512xf32>, vector<9x512xf32> -> vector<9x512xf32>
      %cst_71 = arith.constant dense<0.000000e+00> : vector<3x512xf32>
      %83 = tpu.matmul %56, %65, %cst_71 {dimension_numbers = #tpu.dot_dimension_numbers<[1], [0], [0], [1], [0, 0, 1, 1], [], []>} : vector<3x32xf32>, vector<32x512xf32>, vector<3x512xf32> -> vector<3x512xf32>
      %84 = tpu.concatenate %83, %83, %83 in 0 : vector<3x512xf32>, vector<3x512xf32>, vector<3x512xf32> -> vector<9x512xf32>
      %85 = arith.addf %82, %84 : vector<9x512xf32>
      %86 = vector.broadcast %66 : vector<1x512xf32> to vector<9x512xf32>
      %87 = arith.addf %85, %86 : vector<9x512xf32>
      %cst_72 = arith.constant dense<0.000000e+00> : vector<512xf32>
      %88 = vector.multi_reduction <add>, %87, %cst_72 [0] : vector<9x512xf32> to vector<512xf32>
      %89 = vector.shape_cast %88 : vector<512xf32> to vector<1x512xf32>
      %cst_73 = arith.constant 9.000000e+00 : f32
      %90 = vector.broadcast %cst_73 : f32 to vector<1x512xf32>
      %91 = arith.divf %89, %90 : vector<1x512xf32>
      %92 = vector.broadcast %91 : vector<1x512xf32> to vector<9x512xf32>
      %93 = arith.subf %87, %92 : vector<9x512xf32>
      %94 = arith.mulf %93, %93 : vector<9x512xf32>
      %cst_74 = arith.constant dense<0.000000e+00> : vector<512xf32>
      %95 = vector.multi_reduction <add>, %94, %cst_74 [0] : vector<9x512xf32> to vector<512xf32>
      %96 = vector.shape_cast %95 : vector<512xf32> to vector<1x512xf32>
      %cst_75 = arith.constant 9.000000e+00 : f32
      %97 = vector.broadcast %cst_75 : f32 to vector<1x512xf32>
      %98 = arith.divf %96, %97 : vector<1x512xf32>
      %99 = vector.broadcast %91 : vector<1x512xf32> to vector<9x512xf32>
      %100 = arith.subf %87, %99 : vector<9x512xf32>
      %cst_76 = arith.constant 9.99999974E-6 : f32
      %101 = vector.broadcast %cst_76 : f32 to vector<1x512xf32>
      %102 = arith.addf %98, %101 : vector<1x512xf32>
      %103 = math.rsqrt %102 : vector<1x512xf32>
      %104 = vector.broadcast %103 : vector<1x512xf32> to vector<9x512xf32>
      %105 = arith.mulf %100, %104 : vector<9x512xf32>
      %106 = vector.broadcast %67 : vector<1x512xf32> to vector<9x512xf32>
      %107 = arith.mulf %105, %106 : vector<9x512xf32>
      %108 = vector.broadcast %68 : vector<1x512xf32> to vector<9x512xf32>
      %109 = arith.addf %107, %108 : vector<9x512xf32>
      %cst_77 = arith.constant 0.000000e+00 : f32
      %110 = vector.broadcast %cst_77 : f32 to vector<9x512xf32>
      %111 = arith.maximumf %109, %110 : vector<9x512xf32>
      %cst_78 = arith.constant dense<0.000000e+00> : vector<9x32xf32>
      %112 = tpu.matmul %111, %69, %cst_78 {dimension_numbers = #tpu.dot_dimension_numbers<[1], [0], [0], [1], [0, 0, 1, 1], [], []>} : vector<9x512xf32>, vector<512x32xf32>, vector<9x32xf32> -> vector<9x32xf32>
      %113 = vector.broadcast %70 : vector<1x32xf32> to vector<9x32xf32>
      %114 = arith.addf %112, %113 : vector<9x32xf32>
      %cst_79 = arith.constant dense<0.000000e+00> : vector<32xf32>
      %115 = vector.multi_reduction <add>, %114, %cst_79 [0] : vector<9x32xf32> to vector<32xf32>
      %116 = vector.shape_cast %115 : vector<32xf32> to vector<1x32xf32>
      %cst_80 = arith.constant 9.000000e+00 : f32
      %117 = vector.broadcast %cst_80 : f32 to vector<1x32xf32>
      %118 = arith.divf %116, %117 : vector<1x32xf32>
      %119 = vector.broadcast %118 : vector<1x32xf32> to vector<9x32xf32>
      %120 = arith.subf %114, %119 : vector<9x32xf32>
      %121 = arith.mulf %120, %120 : vector<9x32xf32>
      %cst_81 = arith.constant dense<0.000000e+00> : vector<32xf32>
      %122 = vector.multi_reduction <add>, %121, %cst_81 [0] : vector<9x32xf32> to vector<32xf32>
      %123 = vector.shape_cast %122 : vector<32xf32> to vector<1x32xf32>
      %cst_82 = arith.constant 9.000000e+00 : f32
      %124 = vector.broadcast %cst_82 : f32 to vector<1x32xf32>
      %125 = arith.divf %123, %124 : vector<1x32xf32>
      %126 = vector.broadcast %118 : vector<1x32xf32> to vector<9x32xf32>
      %127 = arith.subf %114, %126 : vector<9x32xf32>
      %cst_83 = arith.constant 9.99999974E-6 : f32
      %128 = vector.broadcast %cst_83 : f32 to vector<1x32xf32>
      %129 = arith.addf %125, %128 : vector<1x32xf32>
      %130 = math.rsqrt %129 : vector<1x32xf32>
      %131 = vector.broadcast %130 : vector<1x32xf32> to vector<9x32xf32>
      %132 = arith.mulf %127, %131 : vector<9x32xf32>
      %133 = vector.broadcast %71 : vector<1x32xf32> to vector<9x32xf32>
      %134 = arith.mulf %132, %133 : vector<9x32xf32>
      %135 = vector.broadcast %72 : vector<1x32xf32> to vector<9x32xf32>
      %136 = arith.addf %134, %135 : vector<9x32xf32>
      %cst_84 = arith.constant 0.000000e+00 : f32
      %137 = vector.broadcast %cst_84 : f32 to vector<9x32xf32>
      %138 = arith.maximumf %136, %137 : vector<9x32xf32>
      %139 = vector.shape_cast %138 : vector<9x32xf32> to vector<3x3x32xf32>
      %cst_85 = arith.constant dense<0xFF800000> : vector<3x32xf32>
      %140 = vector.multi_reduction <maximumf>, %139, %cst_85 [1] : vector<3x3x32xf32> to vector<3x32xf32>
      %c0_86 = arith.constant 0 : index
      %c0_87 = arith.constant 0 : index
      %141 = vector.load %arg22[%c0_86, %c0_87] : memref<32x64xf32, #tpu.memory_space<vmem>>, vector<32x64xf32>
      %c0_88 = arith.constant 0 : index
      %c0_89 = arith.constant 0 : index
      %142 = vector.load %arg23[%c0_88, %c0_89] : memref<32x64xf32, #tpu.memory_space<vmem>>, vector<32x64xf32>
      %c0_90 = arith.constant 0 : index
      %c0_91 = arith.constant 0 : index
      %143 = vector.load %arg24[%c0_90, %c0_91] : memref<1x64xf32, #tpu.memory_space<vmem>>, vector<1x64xf32>
      %c0_92 = arith.constant 0 : index
      %c0_93 = arith.constant 0 : index
      %144 = vector.load %arg25[%c0_92, %c0_93] : memref<1x64xf32, #tpu.memory_space<vmem>>, vector<1x64xf32>
      %c0_94 = arith.constant 0 : index
      %c0_95 = arith.constant 0 : index
      %145 = vector.load %arg26[%c0_94, %c0_95] : memref<1x64xf32, #tpu.memory_space<vmem>>, vector<1x64xf32>
      %c0_96 = arith.constant 0 : index
      %c0_97 = arith.constant 0 : index
      %146 = vector.load %arg27[%c0_96, %c0_97] : memref<64x32xf32, #tpu.memory_space<vmem>>, vector<64x32xf32>
      %c0_98 = arith.constant 0 : index
      %c0_99 = arith.constant 0 : index
      %147 = vector.load %arg28[%c0_98, %c0_99] : memref<1x32xf32, #tpu.memory_space<vmem>>, vector<1x32xf32>
      %c0_100 = arith.constant 0 : index
      %c0_101 = arith.constant 0 : index
      %148 = vector.load %arg29[%c0_100, %c0_101] : memref<1x32xf32, #tpu.memory_space<vmem>>, vector<1x32xf32>
      %c0_102 = arith.constant 0 : index
      %c0_103 = arith.constant 0 : index
      %149 = vector.load %arg30[%c0_102, %c0_103] : memref<1x32xf32, #tpu.memory_space<vmem>>, vector<1x32xf32>
      %cst_104 = arith.constant dense<0.000000e+00> : vector<3x64xf32>
      %150 = tpu.matmul %56, %141, %cst_104 {dimension_numbers = #tpu.dot_dimension_numbers<[1], [0], [0], [1], [0, 0, 1, 1], [], []>} : vector<3x32xf32>, vector<32x64xf32>, vector<3x64xf32> -> vector<3x64xf32>
      %cst_105 = arith.constant dense<0.000000e+00> : vector<3x64xf32>
      %151 = tpu.matmul %140, %142, %cst_105 {dimension_numbers = #tpu.dot_dimension_numbers<[1], [0], [0], [1], [0, 0, 1, 1], [], []>} : vector<3x32xf32>, vector<32x64xf32>, vector<3x64xf32> -> vector<3x64xf32>
      %152 = arith.addf %150, %151 : vector<3x64xf32>
      %153 = vector.broadcast %143 : vector<1x64xf32> to vector<3x64xf32>
      %154 = arith.addf %152, %153 : vector<3x64xf32>
      %cst_106 = arith.constant dense<0.000000e+00> : vector<64xf32>
      %155 = vector.multi_reduction <add>, %154, %cst_106 [0] : vector<3x64xf32> to vector<64xf32>
      %156 = vector.shape_cast %155 : vector<64xf32> to vector<1x64xf32>
      %cst_107 = arith.constant 3.000000e+00 : f32
      %157 = vector.broadcast %cst_107 : f32 to vector<1x64xf32>
      %158 = arith.divf %156, %157 : vector<1x64xf32>
      %159 = vector.broadcast %158 : vector<1x64xf32> to vector<3x64xf32>
      %160 = arith.subf %154, %159 : vector<3x64xf32>
      %161 = arith.mulf %160, %160 : vector<3x64xf32>
      %cst_108 = arith.constant dense<0.000000e+00> : vector<64xf32>
      %162 = vector.multi_reduction <add>, %161, %cst_108 [0] : vector<3x64xf32> to vector<64xf32>
      %163 = vector.shape_cast %162 : vector<64xf32> to vector<1x64xf32>
      %cst_109 = arith.constant 3.000000e+00 : f32
      %164 = vector.broadcast %cst_109 : f32 to vector<1x64xf32>
      %165 = arith.divf %163, %164 : vector<1x64xf32>
      %166 = vector.broadcast %158 : vector<1x64xf32> to vector<3x64xf32>
      %167 = arith.subf %154, %166 : vector<3x64xf32>
      %cst_110 = arith.constant 9.99999974E-6 : f32
      %168 = vector.broadcast %cst_110 : f32 to vector<1x64xf32>
      %169 = arith.addf %165, %168 : vector<1x64xf32>
      %170 = math.rsqrt %169 : vector<1x64xf32>
      %171 = vector.broadcast %170 : vector<1x64xf32> to vector<3x64xf32>
      %172 = arith.mulf %167, %171 : vector<3x64xf32>
      %173 = vector.broadcast %144 : vector<1x64xf32> to vector<3x64xf32>
      %174 = arith.mulf %172, %173 : vector<3x64xf32>
      %175 = vector.broadcast %145 : vector<1x64xf32> to vector<3x64xf32>
      %176 = arith.addf %174, %175 : vector<3x64xf32>
      %cst_111 = arith.constant 0.000000e+00 : f32
      %177 = vector.broadcast %cst_111 : f32 to vector<3x64xf32>
      %178 = arith.maximumf %176, %177 : vector<3x64xf32>
      %cst_112 = arith.constant dense<0.000000e+00> : vector<3x32xf32>
      %179 = tpu.matmul %178, %146, %cst_112 {dimension_numbers = #tpu.dot_dimension_numbers<[1], [0], [0], [1], [0, 0, 1, 1], [], []>} : vector<3x64xf32>, vector<64x32xf32>, vector<3x32xf32> -> vector<3x32xf32>
      %180 = vector.broadcast %147 : vector<1x32xf32> to vector<3x32xf32>
      %181 = arith.addf %179, %180 : vector<3x32xf32>
      %cst_113 = arith.constant dense<0.000000e+00> : vector<32xf32>
      %182 = vector.multi_reduction <add>, %181, %cst_113 [0] : vector<3x32xf32> to vector<32xf32>
      %183 = vector.shape_cast %182 : vector<32xf32> to vector<1x32xf32>
      %cst_114 = arith.constant 3.000000e+00 : f32
      %184 = vector.broadcast %cst_114 : f32 to vector<1x32xf32>
      %185 = arith.divf %183, %184 : vector<1x32xf32>
      %186 = vector.broadcast %185 : vector<1x32xf32> to vector<3x32xf32>
      %187 = arith.subf %181, %186 : vector<3x32xf32>
      %188 = arith.mulf %187, %187 : vector<3x32xf32>
      %cst_115 = arith.constant dense<0.000000e+00> : vector<32xf32>
      %189 = vector.multi_reduction <add>, %188, %cst_115 [0] : vector<3x32xf32> to vector<32xf32>
      %190 = vector.shape_cast %189 : vector<32xf32> to vector<1x32xf32>
      %cst_116 = arith.constant 3.000000e+00 : f32
      %191 = vector.broadcast %cst_116 : f32 to vector<1x32xf32>
      %192 = arith.divf %190, %191 : vector<1x32xf32>
      %193 = vector.broadcast %185 : vector<1x32xf32> to vector<3x32xf32>
      %194 = arith.subf %181, %193 : vector<3x32xf32>
      %cst_117 = arith.constant 9.99999974E-6 : f32
      %195 = vector.broadcast %cst_117 : f32 to vector<1x32xf32>
      %196 = arith.addf %192, %195 : vector<1x32xf32>
      %197 = math.rsqrt %196 : vector<1x32xf32>
      %198 = vector.broadcast %197 : vector<1x32xf32> to vector<3x32xf32>
      %199 = arith.mulf %194, %198 : vector<3x32xf32>
      %200 = vector.broadcast %148 : vector<1x32xf32> to vector<3x32xf32>
      %201 = arith.mulf %199, %200 : vector<3x32xf32>
      %202 = vector.broadcast %149 : vector<1x32xf32> to vector<3x32xf32>
      %203 = arith.addf %201, %202 : vector<3x32xf32>
      %cst_118 = arith.constant 0.000000e+00 : f32
      %204 = vector.broadcast %cst_118 : f32 to vector<3x32xf32>
      %205 = arith.maximumf %203, %204 : vector<3x32xf32>
      %206 = arith.index_cast %18 : i32 to index
      %c0_119 = arith.constant 0 : index
      %c0_120 = arith.constant 0 : index
      %207 = vector.load %arg31[%206, %c0_119, %c0_120] : memref<4x3x2xf32, #tpu.memory_space<vmem>>, vector<1x3x2xf32>
      %208 = vector.shape_cast %207 : vector<1x3x2xf32> to vector<3x2xf32>
      %209 = vector.shape_cast %59 : vector<3x2xf32> to vector<1x3x2xf32>
      tpu.vector_store %arg31[%206, %c0_119, %c0_120], %209 {strides = array<i32>} : memref<4x3x2xf32, #tpu.memory_space<vmem>>, vector<1x3x2xf32>,
      %c0_121 = arith.constant 0 : index
      %c0_122 = arith.constant 0 : index
      %210 = vector.load %arg32[%c0_121, %c0_122] : memref<3x32xf32, #tpu.memory_space<vmem>>, vector<3x32xf32>
      tpu.vector_store %arg32[%c0_121, %c0_122], %205 {strides = array<i32>} : memref<3x32xf32, #tpu.memory_space<vmem>>, vector<3x32xf32>,
      %c0_123 = arith.constant 0 : index
      %c0_124 = arith.constant 0 : index
      %211 = vector.load %arg33[%c0_123, %c0_124] : memref<3x32xf32, #tpu.memory_space<vmem>>, vector<3x32xf32>
      tpu.vector_store %arg33[%c0_123, %c0_124], %54 {strides = array<i32>} : memref<3x32xf32, #tpu.memory_space<vmem>>, vector<3x32xf32>,
      %c0_125 = arith.constant 0 : index
      %c0_126 = arith.constant 0 : index
      %212 = vector.load %arg34[%c0_125, %c0_126] : memref<3x2xf32, #tpu.memory_space<vmem>>, vector<3x2xf32>
      tpu.vector_store %arg34[%c0_125, %c0_126], %61 {strides = array<i32>} : memref<3x2xf32, #tpu.memory_space<vmem>>, vector<3x2xf32>,
      %c0_127 = arith.constant 0 : index
      %c0_128 = arith.constant 0 : index
      %213 = vector.load %arg35[%c0_127, %c0_128] : memref<3x2xf32, #tpu.memory_space<vmem>>, vector<3x2xf32>
      tpu.vector_store %arg35[%c0_127, %c0_128], %59 {strides = array<i32>} : memref<3x2xf32, #tpu.memory_space<vmem>>, vector<3x2xf32>,
    }
    %c4_i32_29 = arith.constant 4 : i32
    return
  }
}

</mosaic_0001>

<bundles_post_ra>
// kernel: _lambda_.2
= control target key start
LH: loop header
LB: loop body
LE: loop exit
PB: predicated region body
PF: predicated region fallthrough
CT: control target
= control target key end

     0   :  { %v2568_v8 = vmov 0.0   ;;  %v2570_v9 = vmov 0.0   ;;  %s3119_s0 = inlined_call_operand.vmem [shape: f32[4,3,2], index: 0, kind: input, shape index: {}]   ;;  %s3120_s1 = inlined_call_operand.vmem [shape: f32[3,2], index: 1, kind: input, shape index: {}]   ;;  %s3121_s2 = inlined_call_operand.vmem [shape: f32[2,16], index: 2, kind: input, shape index: {}]   ;;  %s3122_s3 = inlined_call_operand.vmem [shape: f32[1,16], index: 3, kind: input, shape index: {}]   ;;  %s3123_s4 = inlined_call_operand.vmem [shape: f32[16,64], index: 4, kind: input, shape index: {}]   ;;  %s3124_s5 = inlined_call_operand.vmem [shape: f32[16,64], index: 5, kind: input, shape index: {}]   ;;  %s3125_s6 = inlined_call_operand.vmem [shape: f32[1,64], index: 6, kind: input, shape index: {}]   ;;  %s3126_s7 = inlined_call_operand.vmem [shape: f32[1,64], index: 7, kind: input, shape index: {}]   ;;  %s3127_s8 = inlined_call_operand.vmem [shape: f32[2,16], index: 8, kind: input, shape index: {}]   ;;  %s3128_s9 = inlined_call_operand.vmem [shape: f32[1,16], index: 9, kind: input, shape index: {}]   ;;  %s3129_s10 = inlined_call_operand.vmem [shape: f32[16,512], index: 10, kind: input, shape index: {}]   ;;  %s3130_s11 = inlined_call_operand.vmem [shape: f32[16,512], index: 11, kind: input, shape index: {}]   ;;  %s3131_s12 = inlined_call_operand.vmem [shape: f32[1,512], index: 12, kind: input, shape index: {}]   ;;  %s3132_s13 = inlined_call_operand.vmem [shape: f32[1,512], index: 13, kind: input, shape index: {}]   ;;  %s3133_s14 = inlined_call_operand.vmem [shape: f32[1,512], index: 14, kind: input, shape index: {}]   ;;  %s3134_s15 = inlined_call_operand.vmem [shape: f32[512,32], index: 15, kind: input, shape index: {}]   ;;  %s3135_s16 = inlined_call_operand.vmem [shape: f32[1,32], index: 16, kind: input, shape index: {}]   ;;  %s3136_s17 = inlined_call_operand.vmem [shape: f32[1,32], index: 17, kind: input, shape index: {}]   ;;  %s3137_s18 = inlined_call_operand.vmem [shape: f32[1,32], index: 18, kind: input, shape index: {}]   ;;  %s3138_s19 = inlined_call_operand.vmem [shape: f32[16,64], index: 19, kind: input, shape index: {}]   ;;  %s3139_s20 = inlined_call_operand.vmem [shape: f32[32,64], index: 20, kind: input, shape index: {}]   ;;  %s3140_s21 = inlined_call_operand.vmem [shape: f32[1,64], index: 21, kind: input, shape index: {}]   ;;  %s3141_s22 = inlined_call_operand.vmem [shape: f32[1,64], index: 22, kind: input, shape index: {}]   ;;  %s3142_s23 = inlined_call_operand.vmem [shape: f32[1,64], index: 23, kind: input, shape index: {}]   ;;  %s3143_s24 = inlined_call_operand.vmem [shape: f32[64,32], index: 24, kind: input, shape index: {}]   ;;  %s3144_s25 = inlined_call_operand.vmem [shape: f32[1,32], index: 25, kind: input, shape index: {}]   ;;  %s3145_s26 = inlined_call_operand.vmem [shape: f32[1,32], index: 26, kind: input, shape index: {}]   ;;  %s3146_s27 = inlined_call_operand.vmem [shape: f32[1,32], index: 27, kind: input, shape index: {}]   ;;  %s3147_s28 = inlined_call_operand.vmem [shape: f32[3,32], index: 28, kind: output, shape index: {}]  }
   0x1   :  { %3152 = sst [smem:[#allocation2_spill]] %s3119_s0  ;;  %s2572_s0 = smov 0  }
   0x2   :  { %3153 = sst [smem:[#allocation3_spill]] %s3120_s1 }
   0x3   :  { %3154 = sst [smem:[#allocation4_spill]] %s3121_s2 }
   0x4   :  { %3155 = sst [smem:[#allocation5_spill]] %s3122_s3 }
   0x5   :  { %3156 = sst [smem:[#allocation6_spill]] %s3123_s4 }
   0x6   :  { %3157 = sst [smem:[#allocation7_spill]] %s3124_s5 }
   0x7   :  { %3158 = sst [smem:[#allocation8_spill]] %s3125_s6  ;;  %s3166_s6 = sld [smem:[#allocation5_spill]] }
   0x8   :  { %3159 = sst [smem:[#allocation9_spill]] %s3126_s7  ;;  %s3168_s1 = sld [smem:[#allocation7_spill]] }
   0x9   :  { %3160 = sst [smem:[#allocation10_spill]] %s3127_s8  ;;  %s3169_s30 = sld [smem:[#allocation8_spill]] }
   0xa   :  { %3161 = sst [smem:[#allocation11_spill]] %s3128_s9  ;;  %s3165_s9 = sld [smem:[#allocation4_spill]] }
   0xb   :  { %3162 = sst [smem:[#allocation12_spill]] %s3129_s10  ;;  %s3170_s10 = sld [smem:[#allocation9_spill]] }
   0xc   :  { %3163 = sst [smem:[#allocation13_spill]] %s3130_s11  ;;  %s3167_s11 = sld [smem:[#allocation6_spill]] }
   0xd   :  { %3164 = sst [smem:[#allocation14_spill]] %s3131_s12  ;;  %v2536_v1 = vld [vmem:[%s3166_s6] ss:$0 sm:$0xff] }
   0xe   :  { %v2551_v4 = vld [vmem:[%s3168_s1] sm:$0xff]  ;;  %v2556_v5 = vld [vmem:[%s3168_s1 + $0x8] sm:$0xff] }
   0xf   :  { %v2561_v6 = vld [vmem:[%s3169_s30] ss:$0 sm:$0xff] }
  0x10   :  { %v2531_v0 = vld [vmem:[%s3165_s9] sm:$0x3] }
  0x11   :  { %v2566_v7 = vld [vmem:[%s3170_s10] ss:$0 sm:$0xff] }
  0x12   :  { %v2541_v2 = vld [vmem:[%s3167_s11] sm:$0xff]  ;;  %v2546_v3 = vld [vmem:[%s3167_s11 + $0x8] sm:$0xff] }
  0x13 LB: > { %vm118_vm0 = vcmask 1041408   ;;  %v2371_v10 = vmov 0.0   ;;  %vm2372_vm1 = vmmov 0   ;;  %s1985_s11 = sshll.u32 %s2369_s0, 2  ;;  %vm114_vm2 = vcmask 15360   ;;  %s3171_s7 = sld [smem:[#allocation2_spill]]  ;;  %s2369_s0 = sphi %s2572_s0, %s102_s0   ;;  %v2365_v9 = vphi %v2570_v9, %v3172_v9   ;;  %v2361_v8 = vphi %v2568_v8, %v372_v8  }
  0x14   : > { %2121 = vmatprep.subr.mxu0 %v2371_v10  ;;  %2123 = vmatprep.mubr.msk.f32.mxu0 %vm2372_vm1, %v2371_v10  ;;  %v2373_v11 = vmov 0.0|0.0   ;;  %s2374_s1 = smov 80   ;;  %v2183_v13 = vpack.c.bf16 %v2546_v3, %v2541_v2  ;;  %v2186_v14 = vpack.c.bf16 %v2556_v5, %v2551_v4  ;;  %vm198_vm3 = vcmask 130048   ;;  %s2375_s4 = smov 96  }
  0x15   : > { %2122 = vmatpush3.msk.msra.mxu0 %vm118_vm0, %v2531_v0  ;;  %2182 = vmatprep.subr.bf16.mxu1 %v2373_v11  ;;  %s2376_s8 = smov 16   ;;  %s2377_s5 = smov 32  }
  0x16   : > { %273 = vrot.lane.b32.xlu0 %v2365_v9, %s2374_s1  ;;  %2185 = vmatprep.subr.bf16.mxu0 %v2373_v11  ;;  %s102_s0 = sadd.s32 1, %s2369_s0  }
  0x17   : > { %2130 = vmatprep.mubr.msk.f32.mxu1 %vm2372_vm1, %v2371_v10  ;;  %2184 = vmatpush3.bf16.msra.mxu1 %v2183_v13  ;;  %p99_p0 = scmp.ge.s32.totalorder %s102_s0, 4  }
  0x18   :  { %s3173_s3 = sld [smem:[#allocation10_spill]] (%p99_p0)  ;;  %v472_v39 = vlaneseq (%p99_p0)  ;;  %v2378_v40 = vmov (%p99_p0), 1966171168   ;;  %v2380_v53 = vmov (%p99_p0), 0.0   ;;  %s3175_s10 = sld [smem:[#allocation12_spill]] (%p99_p0)  ;;  %vm903_vm4 = vcmask (%p99_p0), 1042432  }
  0x19   : > { %s106_s12 = scalar_lea.vmem %s3171_s7, %s1985_s11  ;;  %v470_v41 = vunpack.c.l.s4 (%p99_p0), %v2378_v40  ;;  %s3174_s11 = sld [smem:[#allocation13_spill]] (%p99_p0)  ;;  %vm908_vm5 = vcmask (%p99_p0), 1045504   ;;  %vm1102_vm6 = vcmask (%p99_p0), 1040384   ;;  %vm2382_vm7 = vmmov (%p99_p0), 0  }
  0x1a   : > { %v107_v12 = vld [vmem:[%s106_s12] sm:$0x7]  ;;  %v2616_v45 = vshrl.u32 (%p99_p0), %v472_v39, 7  ;;  %s2379_s12 = smov (%p99_p0), 80   ;;  %s3176_s7 = sld [smem:[#allocation3_spill]] (%p99_p0)  ;;  %vm1430_vm8 = vcmask (%p99_p0), 261120  }
  0x1b   : > { %2124 = vmatmul.mubr.msk.f32.vlgmr.msra.gmra.mrb[0].mxu0 %vm114_vm2, %v107_v12  ;;  %v471_v50 = vunpack.c.0.s8 (%p99_p0), %v470_v41  ;;  %s3177_s9 = sld [smem:[#allocation11_spill]] (%p99_p0)  ;;  %vm1432_vm9 = vcmask (%p99_p0), 253952   ;;  %vm1615_vm10 = vcmask (%p99_p0), 256000   ;;  %vm1660_vm11 = vcmask (%p99_p0), 1041409  }
  0x1c   : > { %2137 = vmatprep.mubr.msk.f32.mxu0 %vm2372_vm1, %v2371_v10  ;;  %2187 = vmatpush3.bf16.msra.mxu0 %v2186_v14  ;;  %v2642_v60 = vsub.s32 (%p99_p0), 0, %v2616_v45  ;;  %vm1662_vm12 = vcmask (%p99_p0), 1042434   ;;  %vm1813_vm13 = vcmask (%p99_p0), 518144   ;;  %vm1857_vm14 = vcmask (%p99_p0), 523264  }
  0x1d   :  { %v2638_v57 = vsub.s32 (%p99_p0), %v471_v50, %v2616_v45 }
  0x1e   :  { %v380_v38 = vld [vmem:[%s3173_s3] sm:$0x3] (%p99_p0)  ;;  %v383_v54 = vld [vmem:[%s3175_s10 + $0x8] sm:$0xff] (%p99_p0)  ;;  %v385_v40 = vld [vmem:[%s3175_s10 + $0x18] sm:$0xff] (%p99_p0) }
  0x1f   :  { %2140 = vmatprep.subr.msk.mxu0 (%p99_p0), %vm118_vm0, %v380_v38  ;;  %v391_v42 = vld [vmem:[%s3174_s11 + $0x8] sm:$0xff] (%p99_p0)  ;;  %v393_v44 = vld [vmem:[%s3174_s11 + $0x18] sm:$0xff] (%p99_p0)  ;;  %v390_v48 = vld [vmem:[%s3174_s11] sm:$0xff] (%p99_p0) }
  0x20   :  { %v395_v43 = vld [vmem:[%s3174_s11 + $0x28] sm:$0xff] (%p99_p0)  ;;  %v397_v47 = vld [vmem:[%s3174_s11 + $0x38] sm:$0xff] (%p99_p0)  ;;  %v394_v49 = vld [vmem:[%s3174_s11 + $0x20] sm:$0xff] (%p99_p0) }
  0x21   :  { %v2188_v46 = vpack.c.bf16 (%p99_p0), %v395_v43, %v391_v42  ;;  %v2192_v51 = vpack.c.bf16 (%p99_p0), %v397_v47, %v393_v44  ;;  %v2190_v52 = vpack.c.bf16 (%p99_p0), %v394_v49, %v390_v48  ;;  %v379_v55 = vld [vmem:[%s3176_s7] sm:$0x7] (%p99_p0)  ;;  %v387_v56 = vld [vmem:[%s3175_s10 + $0x28] sm:$0xff] (%p99_p0)  ;;  %v389_v41 = vld [vmem:[%s3175_s10 + $0x38] sm:$0xff] (%p99_p0) }
  0x22   :  { %v2196_v58 = vpack.c.bf16 (%p99_p0), %v387_v56, %v383_v54  ;;  %v475_v59 = vrot.slane (%p99_p0), %v379_v55, %v2638_v57  ;;  %v382_v43 = vld [vmem:[%s3175_s10] sm:$0xff] (%p99_p0)  ;;  %v384_v47 = vld [vmem:[%s3175_s10 + $0x10] sm:$0xff] (%p99_p0) }
  0x23   :  { %2189 = vmatprep.subr.bf16.mxu1 (%p99_p0), %v2188_v46  ;;  %v386_v44 = vld [vmem:[%s3175_s10 + $0x20] sm:$0xff] (%p99_p0)  ;;  %v2200_v46 = vpack.c.bf16 (%p99_p0), %v389_v41, %v385_v40  ;;  %v388_v49 = vld [vmem:[%s3175_s10 + $0x30] sm:$0xff] (%p99_p0)  ;;  %v408_v41 = vld [vmem:[%s3134_s15 + $0x38] sm:$0xff] (%p99_p0) }
  0x24   :  { %v476_v61 = vcombine.high (%p99_p0), %v475_v59, %v475_v59  ;;  %v483_v62 = vrot.slane (%p99_p0), %v475_v59, %v2638_v57  ;;  %v2198_v48 = vpack.c.bf16 (%p99_p0), %v386_v44, %v382_v43  ;;  %v2202_v50 = vpack.c.bf16 (%p99_p0), %v388_v49, %v384_v47  ;;  %v407_v40 = vld [vmem:[%s3134_s15 + $0x30] sm:$0xff] (%p99_p0)  ;;  %v440_v47 = vld [vmem:[%s3134_s15 + $0x138] sm:$0xff] (%p99_p0)  ;;  %v425_v49 = vld [vmem:[%s3134_s15 + $0xc0] sm:$0xff] (%p99_p0) }
  0x25   :  { %v2218_v44 = vpack.c.bf16 (%p99_p0), %v408_v41, %v407_v40 }
  0x26   :  { %v490_v63 = vrot.slane (%p99_p0), %v476_v61, %v2638_v57  ;;  %v491_v0 = vcombine.high (%p99_p0), %v483_v62, %v483_v62 }
  0x28   :  { %v499_v2 = vrot.slane (%p99_p0), %v490_v63, %v2642_v60  ;;  %v503_v3 = vrot.slane (%p99_p0), %v491_v0, %v2642_v60  ;;  %v417_v63 = vld [vmem:[%s3134_s15 + $0x80] sm:$0xff] (%p99_p0)  ;;  %v418_v0 = vld [vmem:[%s3134_s15 + $0x88] sm:$0xff] (%p99_p0) }
  0x2a   :  { %v508_v5 = vsub.f32 (%p99_p0), %v379_v55, %v499_v2  ;;  %v2204_v2 = vpack.c.bf16 (%p99_p0), %v418_v0, %v417_v63 }
  0x2c   :  { %v542_v10 = vrot.slane (%p99_p0), %v508_v5, %v2638_v57  ;;  %v402_v5 = vld [vmem:[%s3134_s15 + $0x8] sm:$0xff] (%p99_p0) }
  0x2e   :  { %v543_v14 = vcombine.high (%p99_p0), %v542_v10, %v542_v10 }
  0x88   : > { %v274_v15 = vpop.permute.xlu0 %273 }
  0x89   : > { %2138 = vmatmul.mubr.msk.f32.vlgmr.msra.gmra.mrb[2].mxu0 %vm198_vm3, %v274_v15  ;;  %v550_v15 = vrot.slane (%p99_p0), %v542_v10, %v2638_v57 }
  0x8a   :  { %2141 = vmatpush3.msk.msra.mxu0 (%p99_p0), %vm118_vm0, %v380_v38 }
  0x8b   :  { %2193 = vmatprep.subr.bf16.mxu0 (%p99_p0), %v2192_v51  ;;  %v1994_v51 = vld [vmem:[%s3177_s9] ss:$0 sm:$0xff] (%p99_p0) }
  0xee   : > { %v188_v16 = vpop.f32.mrb[0].mxu0 }
  0xef   : > { %v189_v17 = vadd.f32 %v2536_v1, %v188_v16  ;;  %v2125_v18 = vpop.f32.mrb[1].mxu0  ;;  %v495_v1 = vrot.slane (%p99_p0), %v483_v62, %v2642_v60 }
  0xf0   :  { %v557_v18 = vrot.slane (%p99_p0), %v543_v14, %v2638_v57 }
  0xf1   : > { %2131 = vmatmul.mubr.msk.f32.vlgmr.msra.gmra.mrb[0].mxu1 %vm198_vm3, %v189_v17  ;;  %v507_v4 = vsub.f32 (%p99_p0), %v379_v55, %v495_v1  ;;  %v449_v1 = vld [vmem:[%s3134_s15 + $0x180] sm:$0xff] (%p99_p0) }
  0xf2   :  { %805 = vmatprep.mubr.f32.mxu1 (%p99_p0), %v2380_v53  ;;  %2191 = vmatpush1.bf16.msra.mxu1 (%p99_p0), %v2190_v52 }
  0xf3   :  { %2197 = vmatprep.subr.bf16.mxu1 (%p99_p0), %v2196_v58 }
 0x15c   : > { %v343_v19 = vpop.f32.mrb[2].mxu0 }
 0x15d   : > { %v2139_v20 = vpop.f32.mrb[3].mxu0 }
 0x1c4   : > { %v268_v21 = vpop.f32.mrb[0].mxu1 }
 0x1c5   : > { %v269_v22 = vadd.f32 %v2561_v6, %v268_v21  ;;  %v2132_v23 = vpop.f32.mrb[1].mxu1  ;;  %v509_v6 = vsub.f32 (%p99_p0), %v379_v55, %v503_v3  ;;  %v450_v3 = vld [vmem:[%s3134_s15 + $0x188] sm:$0xff] (%p99_p0) }
 0x1c7   : > { %v347_v24 = vadd.f32 %v343_v19, %v269_v22  ;;  %v565_v11 = vrot.slane (%p99_p0), %v509_v6, %v2638_v57  ;;  %v558_v19 = vcombine.high (%p99_p0), %v550_v15, %v550_v15  ;;  %v2236_v6 = vpack.c.bf16 (%p99_p0), %v450_v3, %v449_v1  ;;  %v441_v1 = vld [vmem:[%s3134_s15 + $0x140] sm:$0xff] (%p99_p0) }
 0x1c9   : > { %v354_v25 = vadd.f32 %v2566_v7, %v347_v24  ;;  %v519_v7 = vrot.slane (%p99_p0), %v507_v4, %v2638_v57  ;;  %v566_v16 = vcombine.high (%p99_p0), %v565_v11, %v565_v11  ;;  %v573_v17 = vrot.slane (%p99_p0), %v565_v11, %v2638_v57  ;;  %v401_v4 = vld [vmem:[%s3134_s15] sm:$0xff] (%p99_p0)  ;;  %v419_v11 = vld [vmem:[%s3134_s15 + $0x90] sm:$0xff] (%p99_p0) }
 0x1ca   :  { %v590_v23 = vcombine.low (%p99_p0), %v557_v18, %v558_v19 }
 0x1cb   : > { %2325 = vtanh.f32 %v354_v25  ;;  %v1993_v27 = vmul.f32 -1.442695, %v354_v25  ;;  %v580_v22 = vrot.slane (%p99_p0), %v566_v16, %v2638_v57  ;;  %v403_v16 = vld [vmem:[%s3134_s15 + $0x10] sm:$0xff] (%p99_p0) }
 0x1cd   : > { %2327 = vpow2.f32 %v1993_v27  ;;  %v591_v27 = vcombine.low (%p99_p0), %v573_v17, %v580_v22 }
 0x1d5   : > { %v2326_v26 = vpop.eup %2325 }
 0x1d6   : > { %364 = vrot.lane.b32.xlu0 %v2326_v26, %s2375_s4  ;;  %v581_v26 = vcombine.high (%p99_p0), %v573_v17, %v573_v17  ;;  %v404_v17 = vld [vmem:[%s3134_s15 + $0x18] sm:$0xff] (%p99_p0) }
 0x1d7   : > { %v2328_v28 = vpop.eup %2327  ;;  %v2210_v19 = vpack.c.bf16 (%p99_p0), %v404_v17, %v403_v16  ;;  %v429_v16 = vld [vmem:[%s3134_s15 + $0xe0] sm:$0xff] (%p99_p0)  ;;  %v430_v17 = vld [vmem:[%s3134_s15 + $0xe8] sm:$0xff] (%p99_p0) }
 0x1d8   : > { %v358_v29 = vadd.f32 1.0, %v2328_v28  ;;  %v612_v28 = vrot.slane (%p99_p0), %v590_v23, %v2638_v57  ;;  %v421_v23 = vld [vmem:[%s3134_s15 + $0xa0] sm:$0xff] (%p99_p0) }
 0x1da   : > { %2329 = vrcp.f32 %v358_v29 }
 0x1e4   : > { %v2330_v30 = vpop.eup %2329 }
 0x1e5   : > { %v362_v33 = vmul.f32 %v2361_v8, %v2330_v30 }
 0x248   : > { %v365_v31 = vpop.permute.xlu0 %364 }
 0x249   : > { %v367_v32 = vmul.f32 %v2330_v30, %v365_v31  ;;  %v643_v31 = vrot.slane (%p99_p0), %v581_v26, %v2638_v57 }
 0x24b   : > { %369 = vrot.lane.b32.xlu1 %v367_v32, %s2376_s8 }
 0x2bd   : > { %v370_v34 = vpop.permute.xlu1 %369 }
 0x2be   : > { %v372_v8 = vadd.f32 %v370_v34, %v362_v33   ;;  %v392_v34 = vld [vmem:[%s3174_s11 + $0x10] sm:$0xff] (%p99_p0) }
 0x2c0   : > { %2331 = vtanh.f32 %v372_v8  ;;  %v520_v8 = vcombine.high (%p99_p0), %v519_v7, %v519_v7 }
 0x2c2   :  { %v534_v12 = vrot.slane (%p99_p0), %v520_v8, %v2638_v57  ;;  %v433_v8 = vld [vmem:[%s3134_s15 + $0x100] sm:$0xff] (%p99_p0) }
 0x2ca   : > { %v2332_v35 = vpop.eup %2331 }
 0x2cb   : > { %375 = vrot.lane.b32.xlu1 %v2332_v35, %s2377_s5  ;;  %v396_v35 = vld [vmem:[%s3174_s11 + $0x30] sm:$0xff] (%p99_p0) }
 0x2cc   :  { %v2194_v39 = vpack.c.bf16 (%p99_p0), %v396_v35, %v392_v34  ;;  %v423_v35 = vld [vmem:[%s3134_s15 + $0xb0] sm:$0xff] (%p99_p0) }
 0x33a   :  { %101 = sbr.rel (!%p99_p0) target bundleno = 19 (0x13), region = 140 }
 0x33d   : > { %v376_v36 = vpop.permute.xlu1 %375 }
 0x33e   : > { %v378_v37 = vmul.f32 %v2330_v30, %v376_v36   ;;  %v619_v30 = vrot.slane (%p99_p0), %v591_v27, %v2638_v57  ;;  %v454_v27 = vld [vmem:[%s3134_s15 + $0x1a8] sm:$0xff] (%p99_p0) }
 0x340   : > { %v3172_v9 = vmov %v378_v37  ;;  %736 = vrot.lane.b32.xlu0 (%p99_p0), %v378_v37, %s2379_s12  ;;  %v621_v32 = vcombine.low (%p99_p0), %v612_v28, %v619_v30  ;;  %v650_v37 = vrot.slane (%p99_p0), %v643_v31, %v2638_v57  ;;  %v405_v28 = vld [vmem:[%s3134_s15 + $0x20] sm:$0xff] (%p99_p0)  ;;  %s3178_s12 = sld [smem:[#allocation14_spill]] (%p99_p0) }
 0x341   :  { %v527_v9 = vrot.slane %v519_v7, %v2638_v57  ;;  %v2206_v7 = vpack.c.bf16 %v402_v5, %v401_v4  ;;  %v427_v4 = vld [vmem:[%s3134_s15 + $0xd0] sm:$0xff]  ;;  %v428_v5 = vld [vmem:[%s3134_s15 + $0xd8] sm:$0xff] }
 0x342   :  { %v635_v36 = vrot.slane %v621_v32, %v2638_v57  ;;  %v437_v32 = vld [vmem:[%s3134_s15 + $0x120] sm:$0xff] }
 0x343   :  { %v535_v13 = vcombine.high %v527_v9, %v527_v9  ;;  %v588_v20 = vcombine.low %v527_v9, %v534_v12  ;;  %v434_v9 = vld [vmem:[%s3134_s15 + $0x108] sm:$0xff]  ;;  %v420_v12 = vld [vmem:[%s3134_s15 + $0x98] sm:$0xff] }
 0x344   :  { %v2238_v10 = vpack.c.bf16 %v434_v9, %v433_v8  ;;  %v2208_v14 = vpack.c.bf16 %v420_v12, %v419_v11  ;;  %v460_v8 = vld [vmem:[%s3134_s15 + $0x1d8] sm:$0xff]  ;;  %v411_v9 = vld [vmem:[%s3134_s15 + $0x50] sm:$0xff] }
 0x345   :  { %v589_v21 = vcombine.low %v535_v13, %v550_v15  ;;  %v598_v24 = vrot.slane %v588_v20, %v2638_v57  ;;  %v451_v13 = vld [vmem:[%s3134_s15 + $0x190] sm:$0xff]  ;;  %v452_v15 = vld [vmem:[%s3134_s15 + $0x198] sm:$0xff] }
 0x346   :  { %v2240_v18 = vpack.c.bf16 %v452_v15, %v451_v13  ;;  %v435_v20 = vld [vmem:[%s3134_s15 + $0x110] sm:$0xff] }
 0x347   :  { %v605_v25 = vrot.slane %v589_v21, %v2638_v57  ;;  %v436_v21 = vld [vmem:[%s3134_s15 + $0x118] sm:$0xff]  ;;  %v443_v13 = vld [vmem:[%s3134_s15 + $0x150] sm:$0xff] }
 0x348   :  { %v2242_v22 = vpack.c.bf16 %v436_v21, %v435_v20  ;;  %v462_v20 = vld [vmem:[%s3134_s15 + $0x1e8] sm:$0xff]  ;;  %v413_v21 = vld [vmem:[%s3134_s15 + $0x60] sm:$0xff] }
 0x349   :  { %v620_v29 = vcombine.low %v598_v24, %v605_v25  ;;  %v422_v24 = vld [vmem:[%s3134_s15 + $0xa8] sm:$0xff]  ;;  %v453_v25 = vld [vmem:[%s3134_s15 + $0x1a0] sm:$0xff] }
 0x34a   :  { %v2212_v26 = vpack.c.bf16 %v422_v24, %v421_v23  ;;  %v2244_v30 = vpack.c.bf16 %v454_v27, %v453_v25  ;;  %v445_v25 = vld [vmem:[%s3134_s15 + $0x160] sm:$0xff]  ;;  %v431_v27 = vld [vmem:[%s3134_s15 + $0xf0] sm:$0xff] }
 0x34b   :  { %v628_v33 = vrot.slane %v620_v29, %v2638_v57  ;;  %v406_v29 = vld [vmem:[%s3134_s15 + $0x28] sm:$0xff] }
 0x34c   :  { %v2214_v31 = vpack.c.bf16 %v406_v29, %v405_v28  ;;  %v432_v29 = vld [vmem:[%s3134_s15 + $0xf8] sm:$0xff] }
 0x34d   :  { %v636_v38 = vcombine.low %v628_v33, %v635_v36  ;;  %v438_v33 = vld [vmem:[%s3134_s15 + $0x128] sm:$0xff]  ;;  %v424_v36 = vld [vmem:[%s3134_s15 + $0xb8] sm:$0xff] }
 0x34e   :  { %v2246_v34 = vpack.c.bf16 %v438_v33, %v437_v32  ;;  %v2232_v32 = vpack.c.bf16 %v432_v29, %v431_v27 }
 0x34f   :  { %2142 = vmatprep.mubr.msk.f32.mxu0 %vm114_vm2, %v636_v38  ;;  %v2216_v38 = vpack.c.bf16 %v424_v36, %v423_v35  ;;  %v416_v35 = vld [vmem:[%s3134_s15 + $0x78] sm:$0xff]  ;;  %v447_v36 = vld [vmem:[%s3134_s15 + $0x170] sm:$0xff] }
 0x350   :  { %2143 = vmatmul.mubr.msk.f32.vlgmr.msra.gmra.mrb[0].mxu0 %vm114_vm2, %v650_v37  ;;  %v455_v37 = vld [vmem:[%s3134_s15 + $0x1b0] sm:$0xff] }
 0x351   :  { %2195 = vmatpush1.bf16.msra.mxu0 %v2194_v39  ;;  %876 = vmatprep.mubr.f32.mxu0 %v2380_v53  ;;  %v456_v39 = vld [vmem:[%s3134_s15 + $0x1b8] sm:$0xff] }
 0x352   :  { %2201 = vmatprep.subr.bf16.mxu0 %v2200_v46  ;;  %v2248_v43 = vpack.c.bf16 %v456_v39, %v455_v37  ;;  %v439_v46 = vld [vmem:[%s3134_s15 + $0x130] sm:$0xff] }
 0x3b2   :  { %v2681_v42 = vpop.permute.xlu0 %736 }
 0x3b3   :  { %1998 = vmatmul.mubr.msk.f32.vlgmr.msra.gmra.mrb[0].mxu1 %vm198_vm3, %v2681_v42  ;;  %1999 = vmatmul.mubr.msk.f32.vlgmr.msra.gmra.mrb[2].mxu0 %vm198_vm3, %v2681_v42 }
 0x3b4   :  { %983 = vmatprep.mubr.f32.mxu1 %v2380_v53  ;;  %2199 = vmatpush1.bf16.msra.mxu1 %v2198_v48  ;;  %v2250_v48 = vpack.c.bf16 %v440_v47, %v439_v46 }
 0x3b5   :  { %1060 = vmatprep.mubr.f32.mxu0 %v2380_v53  ;;  %2203 = vmatpush1.bf16.msra.mxu0 %v2202_v50  ;;  %v426_v50 = vld [vmem:[%s3134_s15 + $0xc8] sm:$0xff] }
 0x3b6   :  { %2205 = vmatprep.subr.bf16.mxu1 %v2204_v2  ;;  %2237 = vmatprep.subr.bf16.mxu0 %v2236_v6  ;;  %v442_v2 = vld [vmem:[%s3134_s15 + $0x148] sm:$0xff]  ;;  %v459_v6 = vld [vmem:[%s3134_s15 + $0x1d0] sm:$0xff] }
 0x3b7   :  { %v2254_v3 = vpack.c.bf16 %v442_v2, %v441_v1  ;;  %v2256_v11 = vpack.c.bf16 %v460_v8, %v459_v6  ;;  %v2929_v2 = vsub.s32 1, %v2616_v45  ;;  %v2936_v6 = vsub.s32 3, %v2616_v45 }
 0x423   :  { %v2144_v52 = vpop.f32.mrb[0].mxu0 }
 0x424   :  { %v726_v54 = vpop.f32.mrb[1].mxu0  ;;  %v732_v56 = vadd.f32 %v2144_v52, %v1994_v51  ;;  %v2220_v52 = vpack.c.bf16 %v426_v50, %v425_v49 }
 0x425   :  { %v727_v55 = vadd.f32 %v1994_v51, %v726_v54  ;;  %v457_v51 = vld [vmem:[%s3134_s15 + $0x1c0] sm:$0xff]  ;;  %v458_v54 = vld [vmem:[%s3134_s15 + $0x1c8] sm:$0xff] }
 0x426   :  { %v2252_v63 = vpack.c.bf16 %v458_v54, %v457_v51 }
 0x427   :  { %2000 = vmatmul.mubr.msk.f32.vlgmr.msra.gmra.mrb[2].mxu1 %vm198_vm3, %v727_v55  ;;  %2002 = vmatmul.mubr.msk.f32.vlgmr.msra.gmra.mrb[4].mxu0 %vm198_vm3, %v727_v55  ;;  %v409_v55 = vld [vmem:[%s3134_s15 + $0x40] sm:$0xff] }
 0x428   :  { %989 = vmatprep.mubr.f32.mxu1 %v2380_v53  ;;  %1066 = vmatprep.mubr.f32.mxu0 %v2380_v53 }
 0x429   :  { %2207 = vmatpush3.bf16.msra.mxu1 %v2206_v7  ;;  %2239 = vmatpush3.bf16.msra.mxu0 %v2238_v10  ;;  %v2224_v7 = vpack.c.bf16 %v428_v5, %v427_v4  ;;  %v412_v10 = vld [vmem:[%s3134_s15 + $0x58] sm:$0xff] }
 0x42a   :  { %2209 = vmatprep.subr.bf16.mxu1 %v2208_v14  ;;  %2241 = vmatprep.subr.bf16.mxu0 %v2240_v18  ;;  %v2226_v12 = vpack.c.bf16 %v412_v10, %v411_v9  ;;  %v444_v14 = vld [vmem:[%s3134_s15 + $0x158] sm:$0xff]  ;;  %v461_v18 = vld [vmem:[%s3134_s15 + $0x1e0] sm:$0xff] }
 0x42b   :  { %2001 = vmatmul.mubr.msk.f32.gmra.mrb[4].mxu1 %vm198_vm3, %v732_v56  ;;  %2003 = vmatmul.mubr.msk.f32.gmra.mrb[6].mxu0 %vm198_vm3, %v732_v56  ;;  %v410_v56 = vld [vmem:[%s3134_s15 + $0x48] sm:$0xff]  ;;  %v2258_v15 = vpack.c.bf16 %v444_v14, %v443_v13  ;;  %v2260_v23 = vpack.c.bf16 %v462_v20, %v461_v18 }
 0x42c   :  { %v2222_v0 = vpack.c.bf16 %v410_v56, %v409_v55 }
 0x42d   :  { %2211 = vmatpush3.bf16.msra.mxu1 %v2210_v19  ;;  %2243 = vmatpush3.bf16.msra.mxu0 %v2242_v22  ;;  %v2228_v19 = vpack.c.bf16 %v430_v17, %v429_v16  ;;  %v414_v22 = vld [vmem:[%s3134_s15 + $0x68] sm:$0xff] }
 0x42e   :  { %2213 = vmatprep.subr.bf16.mxu1 %v2212_v26  ;;  %2245 = vmatprep.subr.bf16.mxu0 %v2244_v30  ;;  %v2230_v24 = vpack.c.bf16 %v414_v22, %v413_v21  ;;  %v446_v26 = vld [vmem:[%s3134_s15 + $0x168] sm:$0xff]  ;;  %v463_v30 = vld [vmem:[%s3134_s15 + $0x1f0] sm:$0xff] }
 0x42f   :  { %v2262_v28 = vpack.c.bf16 %v446_v26, %v445_v25 }
 0x431   :  { %2215 = vmatpush3.bf16.msra.mxu1 %v2214_v31  ;;  %2247 = vmatpush3.bf16.msra.mxu0 %v2246_v34  ;;  %v464_v31 = vld [vmem:[%s3134_s15 + $0x1f8] sm:$0xff]  ;;  %v415_v34 = vld [vmem:[%s3134_s15 + $0x70] sm:$0xff] }
 0x432   :  { %2217 = vmatprep.subr.bf16.mxu1 %v2216_v38  ;;  %2249 = vmatprep.subr.bf16.mxu0 %v2248_v43  ;;  %v2264_v33 = vpack.c.bf16 %v464_v31, %v463_v30  ;;  %v2234_v37 = vpack.c.bf16 %v416_v35, %v415_v34  ;;  %v448_v38 = vld [vmem:[%s3134_s15 + $0x178] sm:$0xff] }
 0x433   :  { %v2266_v39 = vpack.c.bf16 %v448_v38, %v447_v36 }
 0x435   :  { %2219 = vmatpush3.bf16.msra.mxu1 %v2218_v44  ;;  %2251 = vmatpush3.bf16.msra.mxu0 %v2250_v48 }
 0x436   :  { %2221 = vmatprep.subr.bf16.mxu1 %v2220_v52  ;;  %2253 = vmatprep.subr.bf16.mxu0 %v2252_v63 }
 0x439   :  { %2223 = vmatpush3.bf16.msra.mxu1 %v2222_v0  ;;  %2255 = vmatpush3.bf16.msra.mxu0 %v2254_v3 }
 0x43a   :  { %2225 = vmatprep.subr.bf16.mxu1 %v2224_v7  ;;  %2257 = vmatprep.subr.bf16.mxu0 %v2256_v11 }
 0x43d   :  { %2227 = vmatpush3.bf16.msra.mxu1 %v2226_v12  ;;  %2259 = vmatpush3.bf16.msra.mxu0 %v2258_v15 }
 0x43e   :  { %2229 = vmatprep.subr.bf16.mxu1 %v2228_v19  ;;  %2261 = vmatprep.subr.bf16.mxu0 %v2260_v23 }
 0x441   :  { %2231 = vmatpush3.bf16.msra.mxu1 %v2230_v24  ;;  %2263 = vmatpush3.bf16.msra.mxu0 %v2262_v28 }
 0x442   :  { %2233 = vmatprep.subr.bf16.mxu1 %v2232_v32  ;;  %2265 = vmatprep.subr.bf16.mxu0 %v2264_v33 }
 0x445   :  { %2235 = vmatpush3.bf16.msra.mxu1 %v2234_v37  ;;  %2267 = vmatpush3.bf16.msra.mxu0 %v2266_v39 }
 0x486   :  { %v2710_v58 = vpop.f32.mrb[0].mxu1  ;;  %v2712_v59 = vpop.f32.mrb[2].mxu0 }
 0x487   :  { %v2714_v61 = vpop.f32.mrb[1].mxu1  ;;  %v2716_v62 = vpop.f32.mrb[3].mxu0  ;;  %v887_v40 = vrot.slane %v2710_v58, 5  ;;  %v889_v41 = vrot.slane %v2712_v59, 5  ;;  %v895_v46 = vrot.slane %v2710_v58, 2  ;;  %v897_v48 = vrot.slane %v2712_v59, 2 }
 0x488   :  { %v888_v43 = vrot.slane %v2714_v61, 5  ;;  %v890_v44 = vrot.slane %v2716_v62, 5  ;;  %v896_v49 = vrot.slane %v2714_v61, 2  ;;  %v898_v52 = vrot.slane %v2716_v62, 2 }
 0x489   :  { %v904_v47 = vsel %vm903_vm4, %v2710_v58, %v887_v40  ;;  %v906_v50 = vsel %vm903_vm4, %v2712_v59, %v889_v41  ;;  %v2925_v58 = vsub.s32 2, %v2616_v45  ;;  %v398_v59 = vld [vmem:[%s3178_s12] sm:$0xf] }
 0x48a   :  { %v905_v51 = vsel %vm903_vm4, %v2714_v61, %v888_v43  ;;  %v907_v54 = vsel %vm903_vm4, %v2716_v62, %v890_v44  ;;  %v909_v55 = vsel %vm908_vm5, %v904_v47, %v895_v46  ;;  %v911_v63 = vsel %vm908_vm5, %v906_v50, %v897_v48 }
 0x48b   :  { %v910_v1 = vsel %vm908_vm5, %v905_v51, %v896_v49  ;;  %v912_v4 = vsel %vm908_vm5, %v907_v54, %v898_v52  ;;  %v1077_v9 = vrot.slane %v398_v59, %v2642_v60  ;;  %v1085_v10 = vrot.slane %v398_v59, %v2925_v58 }
 0x48c   :  { %v1081_v13 = vrot.slane %v398_v59, %v2929_v2  ;;  %v1089_v14 = vrot.slane %v398_v59, %v2936_v6 }
 0x4fa   :  { %v985_v56 = vpop.f32.mrb[2].mxu1  ;;  %v1062_v0 = vpop.f32.mrb[4].mxu0 }
 0x4fb   :  { %v986_v61 = vadd.f32 %v985_v56, %v909_v55  ;;  %v1063_v62 = vadd.f32 %v1062_v0, %v911_v63  ;;  %v987_v3 = vpop.f32.mrb[3].mxu1  ;;  %v1064_v5 = vpop.f32.mrb[5].mxu0 }
 0x4fc   :  { %v988_v7 = vadd.f32 %v987_v3, %v910_v1  ;;  %v1065_v8 = vadd.f32 %v1064_v5, %v912_v4 }
 0x4fd   :  { %v1094_v22 = vadd.f32 %v1077_v9, %v986_v61  ;;  %v1096_v23 = vadd.f32 %v1085_v10, %v1063_v62 }
 0x4fe   :  { %v991_v11 = vpop.f32.mrb[4].mxu1  ;;  %v1068_v12 = vpop.f32.mrb[6].mxu0  ;;  %v1095_v26 = vadd.f32 %v1081_v13, %v988_v7  ;;  %v1097_v27 = vadd.f32 %v1089_v14, %v1065_v8 }
 0x4ff   :  { %v992_v15 = vadd.f32 %v991_v11, %v895_v46  ;;  %v1069_v16 = vadd.f32 %v1068_v12, %v897_v48  ;;  %v993_v17 = vpop.f32.mrb[5].mxu1  ;;  %v1070_v18 = vpop.f32.mrb[7].mxu0 }
 0x500   :  { %v994_v19 = vadd.f32 %v993_v17, %v896_v49  ;;  %v1071_v45 = vadd.f32 %v1070_v18, %v898_v52 }
 0x501   :  { %v1098_v20 = vadd.f32 %v1077_v9, %v992_v15  ;;  %v1100_v21 = vadd.f32 %v1085_v10, %v1069_v16 }
 0x502   :  { %v1099_v24 = vadd.f32 %v1081_v13, %v994_v19  ;;  %v1101_v25 = vadd.f32 %v1089_v14, %v1071_v45 }
 0x503   :  { %v1103_v28 = vsel %vm1102_vm6, %v1098_v20, 0.0  ;;  %v1119_v29 = vsel %vm1102_vm6, %v1100_v21, 0.0 }
 0x504   :  { %v1104_v30 = vadd.f32 %v1103_v28, %v1094_v22  ;;  %v1120_v31 = vadd.f32 %v1119_v29, %v1096_v23  ;;  %v1111_v32 = vsel %vm1102_vm6, %v1099_v24, 0.0  ;;  %v1127_v33 = vsel %vm1102_vm6, %v1101_v25, 0.0 }
 0x505   :  { %v1112_v34 = vadd.f32 %v1111_v32, %v1095_v26  ;;  %v1128_v35 = vadd.f32 %v1127_v33, %v1097_v27 }
 0x506   :  { %v1105_v36 = vrot.slane %v1104_v30, 4  ;;  %v1121_v37 = vrot.slane %v1120_v31, 4 }
 0x507   :  { %v1113_v38 = vrot.slane %v1112_v34, 4  ;;  %v1129_v39 = vrot.slane %v1128_v35, 4 }
 0x508   :  { %v1106_v40 = vadd.f32 %v1105_v36, %v1104_v30  ;;  %v1122_v41 = vadd.f32 %v1121_v37, %v1120_v31 }
 0x509   :  { %v1114_v43 = vadd.f32 %v1113_v38, %v1112_v34  ;;  %v1130_v44 = vadd.f32 %v1129_v39, %v1128_v35 }
 0x50a   :  { %v1107_v46 = vrot.slane %v1106_v40, 2  ;;  %v1123_v47 = vrot.slane %v1122_v41, 2 }
 0x50b   :  { %v1115_v48 = vrot.slane %v1114_v43, 2  ;;  %v1131_v49 = vrot.slane %v1130_v44, 2 }
 0x50c   :  { %v1108_v50 = vadd.f32 %v1107_v46, %v1106_v40  ;;  %v1124_v51 = vadd.f32 %v1123_v47, %v1122_v41 }
 0x50d   :  { %v1116_v52 = vadd.f32 %v1115_v48, %v1114_v43  ;;  %v1132_v54 = vadd.f32 %v1131_v49, %v1130_v44 }
 0x50e   :  { %v1109_v55 = vrot.slane %v1108_v50, 1  ;;  %v1125_v56 = vrot.slane %v1124_v51, 1 }
 0x50f   :  { %v1117_v63 = vrot.slane %v1116_v52, 1  ;;  %v1133_v0 = vrot.slane %v1132_v54, 1 }
 0x510   :  { %v1110_v1 = vadd.f32 %v1109_v55, %v1108_v50  ;;  %v1126_v59 = vadd.f32 %v1125_v56, %v1124_v51 }
 0x511   :  { %v1118_v61 = vadd.f32 %v1117_v63, %v1116_v52  ;;  %v1134_v62 = vadd.f32 %v1133_v0, %v1132_v54 }
 0x512   :  { %v1136_v3 = vmul.f32 0.11111111, %v1110_v1  ;;  %v1138_v4 = vmul.f32 0.11111111, %v1126_v59 }
 0x513   :  { %v1137_v5 = vmul.f32 0.11111111, %v1118_v61  ;;  %v1139_v7 = vmul.f32 0.11111111, %v1134_v62 }
 0x514   :  { %v2946_v8 = vsub.f32 %v1094_v22, %v1136_v3  ;;  %v2948_v9 = vsub.f32 %v1098_v20, %v1136_v3  ;;  %v2950_v10 = vsub.f32 %v1096_v23, %v1138_v4  ;;  %v2952_v11 = vsub.f32 %v1100_v21, %v1138_v4 }
 0x515   :  { %v2954_v12 = vsub.f32 %v1095_v26, %v1137_v5  ;;  %v2956_v13 = vsub.f32 %v1099_v24, %v1137_v5  ;;  %v2958_v14 = vsub.f32 %v1097_v27, %v1139_v7  ;;  %v2960_v15 = vsub.f32 %v1101_v25, %v1139_v7  ;;  %v399_v7 = vld [vmem:[%s3132_s13] sm:$0xf] }
 0x516   :  { %v1148_v16 = vmul.f32 %v2946_v8, %v2946_v8  ;;  %v1152_v17 = vmul.f32 %v2948_v9, %v2948_v9  ;;  %v1150_v18 = vmul.f32 %v2950_v10, %v2950_v10  ;;  %v1154_v19 = vmul.f32 %v2952_v11, %v2952_v11 }
 0x517   :  { %v1149_v45 = vmul.f32 %v2954_v12, %v2954_v12  ;;  %v1153_v20 = vmul.f32 %v2956_v13, %v2956_v13  ;;  %v1151_v21 = vmul.f32 %v2958_v14, %v2958_v14  ;;  %v1155_v22 = vmul.f32 %v2960_v15, %v2960_v15 }
 0x518   :  { %v1156_v23 = vsel %vm1102_vm6, %v1152_v17, 0.0  ;;  %v1172_v24 = vsel %vm1102_vm6, %v1154_v19, 0.0  ;;  %v400_v17 = vld [vmem:[%s3133_s14] sm:$0xf]  ;;  %v1220_v19 = vrot.slane %v399_v7, %v2925_v58 }
 0x519   :  { %v1157_v25 = vadd.f32 %v1156_v23, %v1148_v16  ;;  %v1173_v26 = vadd.f32 %v1172_v24, %v1150_v18  ;;  %v1164_v27 = vsel %vm1102_vm6, %v1153_v20, 0.0  ;;  %v1180_v28 = vsel %vm1102_vm6, %v1155_v22, 0.0 }
 0x51a   :  { %v1165_v29 = vadd.f32 %v1164_v27, %v1149_v45  ;;  %v1181_v30 = vadd.f32 %v1180_v28, %v1151_v21  ;;  %v1212_v16 = vrot.slane %v399_v7, %v2642_v60  ;;  %v1216_v22 = vrot.slane %v399_v7, %v2929_v2 }
 0x51b   :  { %v1158_v31 = vrot.slane %v1157_v25, 4  ;;  %v1174_v32 = vrot.slane %v1173_v26, 4  ;;  %v1224_v23 = vrot.slane %v399_v7, %v2936_v6  ;;  %v1245_v27 = vrot.slane %v400_v17, %v2929_v2 }
 0x51c   :  { %v1166_v33 = vrot.slane %v1165_v29, 4  ;;  %v1182_v34 = vrot.slane %v1181_v30, 4  ;;  %v1241_v28 = vrot.slane %v400_v17, %v2642_v60 }
 0x51d   :  { %v1159_v35 = vadd.f32 %v1158_v31, %v1157_v25  ;;  %v1175_v36 = vadd.f32 %v1174_v32, %v1173_v26 }
 0x51e   :  { %v1167_v37 = vadd.f32 %v1166_v33, %v1165_v29  ;;  %v1183_v38 = vadd.f32 %v1182_v34, %v1181_v30 }
 0x51f   :  { %v1160_v39 = vrot.slane %v1159_v35, 2  ;;  %v1176_v40 = vrot.slane %v1175_v36, 2 }
 0x520   :  { %v1168_v41 = vrot.slane %v1167_v37, 2  ;;  %v1184_v43 = vrot.slane %v1183_v38, 2 }
 0x521   :  { %v1161_v44 = vadd.f32 %v1160_v39, %v1159_v35  ;;  %v1177_v46 = vadd.f32 %v1176_v40, %v1175_v36 }
 0x522   :  { %v1169_v47 = vadd.f32 %v1168_v41, %v1167_v37  ;;  %v1185_v48 = vadd.f32 %v1184_v43, %v1183_v38 }
 0x523   :  { %v1162_v49 = vrot.slane %v1161_v44, 1  ;;  %v1178_v50 = vrot.slane %v1177_v46, 1 }
 0x524   :  { %v1170_v51 = vrot.slane %v1169_v47, 1  ;;  %v1186_v52 = vrot.slane %v1185_v48, 1 }
 0x525   :  { %v1163_v54 = vadd.f32 %v1162_v49, %v1161_v44  ;;  %v1179_v55 = vadd.f32 %v1178_v50, %v1177_v46  ;;  %v1639_v50 = vld [vmem:[%s3139_s20] sm:$0xff] }
 0x526   :  { %v1171_v56 = vadd.f32 %v1170_v51, %v1169_v47  ;;  %v1187_v63 = vadd.f32 %v1186_v52, %v1185_v48  ;;  %v1640_v51 = vld [vmem:[%s3139_s20 + $0x8] sm:$0xff]  ;;  %v1641_v52 = vld [vmem:[%s3139_s20 + $0x10] sm:$0xff] }
 0x527   :  { %v1188_v0 = vmul.f32 0.11111111, %v1163_v54  ;;  %v1190_v1 = vmul.f32 0.11111111, %v1179_v55  ;;  %v2381_v54 = vmov 0.0|0.0   ;;  %v2269_v55 = vpack.c.bf16 %v1640_v51, %v1639_v50 }
 0x528   :  { %v1189_v59 = vmul.f32 0.11111111, %v1171_v56  ;;  %v1191_v61 = vmul.f32 0.11111111, %v1187_v63  ;;  %2268 = vmatprep.subr.bf16.mxu0 %v2381_v54  ;;  %v1642_v56 = vld [vmem:[%s3139_s20 + $0x18] sm:$0xff]  ;;  %2277 = vmatprep.subr.bf16.mxu1 %v2381_v54 }
 0x529   :  { %v1192_v62 = vadd.f32 1e-05, %v1188_v0  ;;  %v1194_v3 = vadd.f32 1e-05, %v1190_v1  ;;  %v2272_v63 = vpack.c.bf16 %v1642_v56, %v1641_v52 }
 0x52a   :  { %v1193_v4 = vadd.f32 1e-05, %v1189_v59  ;;  %v1195_v5 = vadd.f32 1e-05, %v1191_v61  ;;  %v2004_v59 = vld [vmem:[%s3135_s16] ss:$0 sm:$0xff] }
 0x52b   :  { %2333 = vrsqrt.f32 %v1192_v62 }
 0x52c   :  { %2335 = vrsqrt.f32 %v1194_v3 }
 0x52d   :  { %2337 = vrsqrt.f32 %v1193_v4 }
 0x52e   :  { %2339 = vrsqrt.f32 %v1195_v5 }
 0x535   :  { %v2334_v18 = vpop.eup %2333 }
 0x536   :  { %v2336_v45 = vpop.eup %2335  ;;  %v1200_v20 = vmul.f32 %v2334_v18, %v2946_v8  ;;  %v1204_v21 = vmul.f32 %v2334_v18, %v2948_v9  ;;  %v1249_v9 = vrot.slane %v400_v17, %v2925_v58 }
 0x537   :  { %v2338_v24 = vpop.eup %2337  ;;  %v1202_v25 = vmul.f32 %v2336_v45, %v2950_v10  ;;  %v1206_v26 = vmul.f32 %v2336_v45, %v2952_v11  ;;  %v1253_v10 = vrot.slane %v400_v17, %v2936_v6 }
 0x538   :  { %v2340_v29 = vpop.eup %2339  ;;  %v1229_v30 = vmul.f32 %v1212_v16, %v1200_v20  ;;  %v1205_v31 = vmul.f32 %v2338_v24, %v2956_v13  ;;  %v1201_v8 = vmul.f32 %v2338_v24, %v2954_v12  ;;  %v1233_v37 = vmul.f32 %v1212_v16, %v1204_v21 }
 0x539   :  { %v1231_v32 = vmul.f32 %v1220_v19, %v1202_v25  ;;  %v1207_v33 = vmul.f32 %v2340_v29, %v2960_v15  ;;  %v1203_v34 = vmul.f32 %v2340_v29, %v2958_v14  ;;  %v1235_v40 = vmul.f32 %v1220_v19, %v1206_v26 }
 0x53a   :  { %v1230_v11 = vmul.f32 %v1216_v22, %v1201_v8  ;;  %v1234_v35 = vmul.f32 %v1216_v22, %v1205_v31  ;;  %v1258_v36 = vadd.f32 %v1241_v28, %v1229_v30  ;;  %v1262_v15 = vadd.f32 %v1241_v28, %v1233_v37 }
 0x53b   :  { %v1232_v2 = vmul.f32 %v1224_v23, %v1203_v34  ;;  %v1236_v60 = vmul.f32 %v1224_v23, %v1207_v33  ;;  %v1260_v39 = vadd.f32 %v1249_v9, %v1231_v32  ;;  %v1264_v6 = vadd.f32 %v1249_v9, %v1235_v40 }
 0x53c   :  { %v1259_v38 = vadd.f32 %v1245_v27, %v1230_v11  ;;  %v1263_v13 = vadd.f32 %v1245_v27, %v1234_v35  ;;  %v1266_v44 = vmax.f32 %v1258_v36, 0.0  ;;  %v1270_v48 = vmax.f32 %v1262_v15, 0.0 }
 0x53d   :  { %v1261_v12 = vadd.f32 %v1253_v10, %v1232_v2  ;;  %v1265_v41 = vadd.f32 %v1253_v10, %v1236_v60  ;;  %v1268_v14 = vmax.f32 %v1260_v39, 0.0  ;;  %v1272_v49 = vmax.f32 %v1264_v6, 0.0 }
 0x53e   :  { %v1267_v58 = vmax.f32 %v1259_v38, 0.0  ;;  %v1271_v46 = vmax.f32 %v1263_v13, 0.0 }
 0x53f   :  { %v1269_v43 = vmax.f32 %v1261_v12, 0.0  ;;  %v1273_v47 = vmax.f32 %v1265_v41, 0.0  ;;  %v2005_v41 = vld [vmem:[%s3136_s17] ss:$0 sm:$0xff] }
 0x540   :  { %1344 = vmatprep.mubr.f32.mxu1 %v1267_v58 }
 0x541   :  { %1419 = vmatprep.mubr.f32.mxu0 %v1269_v43  ;;  %1345 = vmatmul.mubr.f32.vlgmr.msra.gmra.mrb[6].mxu1 %v1266_v44  ;;  %v2006_v44 = vld [vmem:[%s3137_s18] ss:$0 sm:$0xff] }
 0x542   :  { %1420 = vmatmul.mubr.f32.vlgmr.msra.gmra.mrb[8].mxu0 %v1268_v14  ;;  %1349 = vmatprep.mubr.f32.mxu1 %v1271_v46 }
 0x543   :  { %1424 = vmatprep.mubr.f32.mxu0 %v1273_v47  ;;  %2270 = vmatpush3.bf16.msra.mxu0 %v2269_v55 }
 0x544   :  { %2271 = vmatprep.subr.bf16.mxu0 %v2381_v54 }
 0x545   :  { %1350 = vmatmul.mubr.f32.gmra.mrb[8].mxu1 %v1270_v48 }
 0x546   :  { %1425 = vmatmul.mubr.f32.gmra.mrb[10].mxu0 %v1272_v49  ;;  %2179 = vmatprep.mubr.msk.f32.mxu1 %vm2382_vm7, %v2380_v53 }
 0x547   :  { %2153 = vmatprep.mubr.msk.f32.mxu0 %vm2382_vm7, %v2380_v53  ;;  %2273 = vmatpush3.bf16.msra.mxu0 %v2272_v63 }
 0x548   :  { %2274 = vmatprep.subr.bf16.mxu0 %v2381_v54 }
 0x614   :  { %v2060_v0 = vpop.f32.mrb[6].mxu1 }
 0x615   :  { %v2098_v1 = vpop.f32.mrb[8].mxu0  ;;  %v2061_v61 = vpop.f32.mrb[7].mxu1 }
 0x616   :  { %v2062_v62 = vadd.f32 %v2061_v61, %v2060_v0  ;;  %v2099_v3 = vpop.f32.mrb[9].mxu0 }
 0x617   :  { %v2100_v4 = vadd.f32 %v2099_v3, %v2098_v1 }
 0x618   :  { %v1347_v5 = vadd.f32 %v2062_v62, %v2004_v59  ;;  %v2063_v7 = vpop.f32.mrb[8].mxu1 }
 0x619   :  { %v2101_v16 = vpop.f32.mrb[10].mxu0  ;;  %v2064_v17 = vpop.f32.mrb[9].mxu1 }
 0x61a   :  { %v1422_v18 = vadd.f32 %v2100_v4, %v1347_v5  ;;  %v2065_v19 = vadd.f32 %v2064_v17, %v2063_v7  ;;  %v2102_v45 = vpop.f32.mrb[11].mxu0 }
 0x61b   :  { %v2103_v20 = vadd.f32 %v2102_v45, %v2101_v16 }
 0x61c   :  { %v1352_v21 = vadd.f32 %v2065_v19, %v2004_v59  ;;  %v1431_v23 = vsel %vm1430_vm8, %v1422_v18, 0.0 }
 0x61e   :  { %v1427_v22 = vadd.f32 %v2103_v20, %v1352_v21 }
 0x620   :  { %v1433_v24 = vsel %vm1432_vm9, %v1427_v22, 0.0 }
 0x621   :  { %v1434_v25 = vadd.f32 %v1433_v24, %v1431_v23 }
 0x623   :  { %v1435_v26 = vrot.slane %v1434_v25, 4 }
 0x625   :  { %v1436_v27 = vadd.f32 %v1435_v26, %v1434_v25 }
 0x627   :  { %v1437_v28 = vrot.slane %v1436_v27, 2 }
 0x629   :  { %v1438_v29 = vadd.f32 %v1437_v28, %v1436_v27 }
 0x62b   :  { %v1439_v30 = vrot.slane %v1438_v29, 1 }
 0x62d   :  { %v1440_v31 = vadd.f32 %v1439_v30, %v1438_v29 }
 0x62f   :  { %v1441_v8 = vmul.f32 0.11111111, %v1440_v31 }
 0x631   :  { %v1442_v9 = vsub.f32 %v1422_v18, %v1441_v8  ;;  %v1443_v32 = vsub.f32 %v1427_v22, %v1441_v8 }
 0x633   :  { %v1444_v33 = vmul.f32 %v1442_v9, %v1442_v9  ;;  %v1445_v34 = vmul.f32 %v1443_v32, %v1443_v32 }
 0x635   :  { %v1446_v10 = vsel %vm1430_vm8, %v1444_v33, 0.0  ;;  %v1447_v11 = vsel %vm1432_vm9, %v1445_v34, 0.0 }
 0x636   :  { %v1448_v35 = vadd.f32 %v1447_v11, %v1446_v10 }
 0x638   :  { %v1449_v2 = vrot.slane %v1448_v35, 4 }
 0x63a   :  { %v1450_v36 = vadd.f32 %v1449_v2, %v1448_v35 }
 0x63c   :  { %v1451_v60 = vrot.slane %v1450_v36, 2 }
 0x63e   :  { %v1452_v37 = vadd.f32 %v1451_v60, %v1450_v36 }
 0x640   :  { %v1453_v38 = vrot.slane %v1452_v37, 1 }
 0x642   :  { %v1454_v39 = vadd.f32 %v1453_v38, %v1452_v37  ;;  %v1637_v38 = vld [vmem:[%s3138_s19] sm:$0xff] }
 0x644   :  { %v1455_v13 = vmul.f32 0.11111111, %v1454_v39  ;;  %v1638_v39 = vld [vmem:[%s3138_s19 + $0x8] sm:$0xff] }
 0x646   :  { %v1456_v40 = vadd.f32 1e-05, %v1455_v13 }
 0x648   :  { %2341 = vrsqrt.f32 %v1456_v40 }
 0x652   :  { %v2342_v12 = vpop.eup %2341 }
 0x653   :  { %v1458_v58 = vmul.f32 %v2342_v12, %v1442_v9  ;;  %v1459_v43 = vmul.f32 %v2342_v12, %v1443_v32 }
 0x655   :  { %v1466_v15 = vmul.f32 %v2005_v41, %v1458_v58  ;;  %v1467_v14 = vmul.f32 %v2005_v41, %v1459_v43  ;;  %v2275_v41 = vpack.c.bf16 %v1638_v39, %v1637_v38 }
 0x657   :  { %v1474_v46 = vadd.f32 %v2006_v44, %v1466_v15  ;;  %v1475_v6 = vadd.f32 %v2006_v44, %v1467_v14  ;;  %v1646_v44 = vld [vmem:[%s3143_s24] sm:$0xff]  ;;  %v1647_v15 = vld [vmem:[%s3143_s24 + $0x8] sm:$0xff] }
 0x658   :  { %v2278_v14 = vpack.c.bf16 %v1647_v15, %v1646_v44 }
 0x659   :  { %v1476_v47 = vmax.f32 %v1474_v46, 0.0  ;;  %v1477_v48 = vmax.f32 %v1475_v6, 0.0  ;;  %v1648_v46 = vld [vmem:[%s3143_s24 + $0x10] sm:$0xff]  ;;  %v1650_v6 = vld [vmem:[%s3143_s24 + $0x20] sm:$0xff] }
 0x65a   :  { %2279 = vmatpush3.bf16.msra.mxu1 %v2278_v14 }
 0x65b   :  { %v1480_v49 = vcombine.high %v1476_v47, %v1476_v47  ;;  %v1487_v50 = vrot.slane %v1476_v47, %v2638_v57  ;;  %v1535_v51 = vrot.slane %v1477_v48, %v2638_v57  ;;  %2280 = vmatprep.subr.bf16.mxu1 %v2381_v54  ;;  %v1651_v47 = vld [vmem:[%s3143_s24 + $0x28] sm:$0xff] }
 0x65c   :  { %v2284_v48 = vpack.c.bf16 %v1651_v47, %v1650_v6  ;;  %v2016_v47 = vld [vmem:[%s3146_s27] ss:$0 sm:$0xff] }
 0x65d   :  { %v1494_v52 = vrot.slane %v1480_v49, %v2638_v57  ;;  %v1495_v55 = vcombine.high %v1487_v50, %v1487_v50  ;;  %v1503_v56 = vrot.slane %v1487_v50, %v2638_v57  ;;  %v1542_v59 = vrot.slane %v1535_v51, %v2638_v57  ;;  %v1652_v49 = vld [vmem:[%s3143_s24 + $0x30] sm:$0xff]  ;;  %v1653_v50 = vld [vmem:[%s3143_s24 + $0x38] sm:$0xff] }
 0x65e   :  { %v2287_v51 = vpack.c.bf16 %v1653_v50, %v1652_v49 }
 0x65f   :  { %v1496_v63 = vcombine.high %v1494_v52, %v1494_v52  ;;  %v1517_v0 = vrot.slane %v1495_v55, %v2638_v57  ;;  %v1525_v1 = vcombine.high %v1503_v56, %v1503_v56  ;;  %v1510_v61 = vrot.slane %v1494_v52, %v2638_v57 }
 0x660   :  { %v1603_v18 = vrot.slane %v1542_v59, %v2638_v57 }
 0x661   :  { %v1524_v62 = vrot.slane %v1496_v63, %v2638_v57  ;;  %v1527_v3 = vcombine.high %v1517_v0, %v1517_v0  ;;  %v1543_v4 = vcombine.low %v1503_v56, %v1517_v0  ;;  %v1557_v7 = vrot.slane %v1525_v1, %v2638_v57  ;;  %v2010_v56 = vld [vmem:[%s3140_s21] ss:$0 sm:$0xff] }
 0x663   :  { %v1550_v5 = vrot.slane %v1543_v4, %v2638_v57  ;;  %v1566_v16 = vcombine.low %v1527_v3, %v1510_v61  ;;  %v2007_v17 = vcombine.high %v1510_v61, %v1524_v62  ;;  %v1580_v20 = vrot.slane %v1524_v62, %v2638_v57 }
 0x665   :  { %v1558_v19 = vcombine.low %v1550_v5, %v1557_v7  ;;  %v1573_v45 = vrot.slane %v1566_v16, %v2638_v57  ;;  %v1596_v21 = vrot.slane %v2007_v17, %v2638_v57 }
 0x667   :  { %v1604_v22 = vcombine.low %v1596_v21, %v1603_v18  ;;  %v1565_v23 = vrot.slane %v1558_v19, %v2638_v57  ;;  %v1581_v24 = vcombine.low %v1573_v45, %v1580_v20 }
 0x669   :  { %v1588_v25 = vrot.slane %v1581_v24, %v2638_v57  ;;  %v1611_v26 = vrot.slane %v1604_v22, %v2638_v57  ;;  %v1616_v27 = vsel %vm1615_vm10, %v1565_v23, -inf }
 0x66a   :  { %v1617_v28 = vrot.slane %v1616_v27, 4 }
 0x66b   :  { %v1623_v29 = vsel %vm1615_vm10, %v1588_v25, -inf  ;;  %v1630_v30 = vsel %vm1615_vm10, %v1611_v26, -inf }
 0x66c   :  { %v1618_v31 = vmax.f32 %v1616_v27, %v1617_v28  ;;  %v1624_v8 = vrot.slane %v1623_v29, 4  ;;  %v1631_v9 = vrot.slane %v1630_v30, 4  ;;  %v2011_v28 = vld [vmem:[%s3141_s22] ss:$0 sm:$0xff] }
 0x66e   :  { %v1619_v32 = vrot.slane %v1618_v31, 2  ;;  %v1625_v33 = vmax.f32 %v1623_v29, %v1624_v8  ;;  %v1632_v34 = vmax.f32 %v1630_v30, %v1631_v9  ;;  %v2012_v30 = vld [vmem:[%s3142_s23] ss:$0 sm:$0xff] }
 0x670   :  { %v1620_v10 = vmax.f32 %v1618_v31, %v1619_v32  ;;  %v1626_v11 = vrot.slane %v1625_v33, 2  ;;  %v1633_v35 = vrot.slane %v1632_v34, 2  ;;  %v2013_v32 = vld [vmem:[%s3144_s25] ss:$0 sm:$0xff] }
 0x672   :  { %v1621_v2 = vrot.slane %v1620_v10, 1  ;;  %v1627_v36 = vmax.f32 %v1625_v33, %v1626_v11  ;;  %v1634_v60 = vmax.f32 %v1632_v34, %v1633_v35 }
 0x674   :  { %v1628_v57 = vrot.slane %v1627_v36, 1  ;;  %v1635_v37 = vrot.slane %v1634_v60, 1  ;;  %v1622_v13 = vmax.f32 %v1620_v10, %v1621_v2 }
 0x676   :  { %v1629_v40 = vmax.f32 %v1627_v36, %v1628_v57  ;;  %v1636_v12 = vmax.f32 %v1634_v60, %v1635_v37 }
 0x678   :  { %v1661_v58 = vsel %vm1660_vm11, %v1629_v40, %v1622_v13 }
 0x679   :  { %v1663_v43 = vsel %vm1662_vm12, %v1636_v12, %v1661_v58 }
 0x67a   :  { %2154 = vmatmul.mubr.msk.f32.vlgmr.msra.gmra.mrb[12].mxu0 %vm1430_vm8, %v1663_v43 }
 0x67b   :  { %2276 = vmatpush3.bf16.msra.mxu0 %v2275_v41  ;;  %2160 = vmatprep.mubr.msk.f32.mxu0 %vm2382_vm7, %v2380_v53  ;;  %v1649_v53 = vld [vmem:[%s3143_s24 + $0x18] sm:$0xff] }
 0x67e   :  { %2161 = vmatmul.mubr.msk.f32.vlgmr.msra.gmra.mrb[14].mxu0 %vm198_vm3, %v2681_v42  ;;  %v2281_v42 = vpack.c.bf16 %v1649_v53, %v1648_v46 }
 0x680   :  { %2282 = vmatpush3.bf16.msra.mxu1 %v2281_v42  ;;  %v2015_v42 = vld [vmem:[%s3145_s26] ss:$0 sm:$0xff] }
 0x681   :  { %2283 = vmatprep.subr.bf16.mxu1 %v2381_v54 }
 0x684   :  { %2285 = vmatpush3.bf16.msra.mxu1 %v2284_v48 }
 0x685   :  { %2286 = vmatprep.subr.bf16.mxu1 %v2381_v54 }
 0x688   :  { %2288 = vmatpush3.bf16.msra.mxu1 %v2287_v51 }
 0x74d   :  { %v1732_v52 = vpop.f32.mrb[12].mxu0 }
 0x74e   :  { %v2155_v55 = vpop.f32.mrb[13].mxu0 }
 0x751   :  { %v1802_v63 = vpop.f32.mrb[14].mxu0 }
 0x752   :  { %v1803_v0 = vadd.f32 %v1802_v63, %v1732_v52  ;;  %v2162_v1 = vpop.f32.mrb[15].mxu0 }
 0x754   :  { %v1812_v54 = vadd.f32 %v2010_v56, %v1803_v0 }
 0x756   :  { %v1814_v59 = vsel %vm1813_vm13, %v1812_v54, 0.0 }
 0x757   :  { %v1815_v61 = vrot.slane %v1814_v59, 4 }
 0x759   :  { %v1816_v62 = vadd.f32 %v1815_v61, %v1814_v59 }
 0x75b   :  { %v1817_v3 = vrot.slane %v1816_v62, 2 }
 0x75d   :  { %v1818_v4 = vadd.f32 %v1817_v3, %v1816_v62 }
 0x75f   :  { %v1819_v5 = vrot.slane %v1818_v4, 1 }
 0x761   :  { %v1820_v7 = vadd.f32 %v1819_v5, %v1818_v4 }
 0x763   :  { %v1822_v16 = vmul.f32 0.33333334, %v1820_v7 }
 0x765   :  { %v1823_v17 = vsub.f32 %v1812_v54, %v1822_v16 }
 0x767   :  { %v1824_v18 = vmul.f32 %v1823_v17, %v1823_v17 }
 0x769   :  { %v1825_v19 = vsel %vm1813_vm13, %v1824_v18, 0.0 }
 0x76a   :  { %v1826_v45 = vrot.slane %v1825_v19, 4 }
 0x76c   :  { %v1827_v20 = vadd.f32 %v1826_v45, %v1825_v19 }
 0x76e   :  { %v1828_v21 = vrot.slane %v1827_v20, 2 }
 0x770   :  { %v1829_v22 = vadd.f32 %v1828_v21, %v1827_v20 }
 0x772   :  { %v1830_v23 = vrot.slane %v1829_v22, 1 }
 0x774   :  { %v1831_v24 = vadd.f32 %v1830_v23, %v1829_v22 }
 0x776   :  { %v1832_v25 = vmul.f32 0.33333334, %v1831_v24 }
 0x778   :  { %v1833_v26 = vadd.f32 1e-05, %v1832_v25 }
 0x77a   :  { %2343 = vrsqrt.f32 %v1833_v26 }
 0x784   :  { %v2344_v27 = vpop.eup %2343 }
 0x785   :  { %v1835_v29 = vmul.f32 %v2344_v27, %v1823_v17 }
 0x787   :  { %v1842_v31 = vmul.f32 %v2011_v28, %v1835_v29 }
 0x789   :  { %v1849_v8 = vadd.f32 %v2012_v30, %v1842_v31 }
 0x78b   :  { %v1850_v9 = vmax.f32 %v1849_v8, 0.0 }
 0x78d   :  { %2180 = vmatmul.mubr.msk.f32.vlgmr.msra.gmra.mrb[10].mxu1 %vm1857_vm14, %v1850_v9 }
 0x860   :  { %v1927_v33 = vpop.f32.mrb[10].mxu1 }
 0x861   :  { %v1928_v34 = vadd.f32 %v2013_v32, %v1927_v33  ;;  %v2181_v10 = vpop.f32.mrb[11].mxu1 }
 0x863   :  { %v1931_v11 = vsel %vm1615_vm10, %v1928_v34, 0.0 }
 0x864   :  { %v1932_v35 = vrot.slane %v1931_v11, 4 }
 0x866   :  { %v1933_v2 = vadd.f32 %v1932_v35, %v1931_v11 }
 0x868   :  { %v1934_v36 = vrot.slane %v1933_v2, 2 }
 0x86a   :  { %v1935_v60 = vadd.f32 %v1934_v36, %v1933_v2 }
 0x86c   :  { %v1936_v57 = vrot.slane %v1935_v60, 1 }
 0x86e   :  { %v1937_v37 = vadd.f32 %v1936_v57, %v1935_v60 }
 0x870   :  { %v1938_v38 = vmul.f32 0.33333334, %v1937_v37 }
 0x872   :  { %v1939_v39 = vsub.f32 %v1928_v34, %v1938_v38 }
 0x874   :  { %v1940_v13 = vmul.f32 %v1939_v39, %v1939_v39 }
 0x876   :  { %v1941_v40 = vsel %vm1615_vm10, %v1940_v13, 0.0 }
 0x877   :  { %v1942_v12 = vrot.slane %v1941_v40, 4 }
 0x879   :  { %v1943_v41 = vadd.f32 %v1942_v12, %v1941_v40 }
 0x87b   :  { %v1944_v58 = vrot.slane %v1943_v41, 2 }
 0x87d   :  { %v1945_v43 = vadd.f32 %v1944_v58, %v1943_v41 }
 0x87f   :  { %v1946_v44 = vrot.slane %v1945_v43, 1 }
 0x881   :  { %v1947_v15 = vadd.f32 %v1946_v44, %v1945_v43 }
 0x883   :  { %v1948_v14 = vmul.f32 0.33333334, %v1947_v15 }
 0x885   :  { %v1949_v46 = vadd.f32 1e-05, %v1948_v14 }
 0x887   :  { %2345 = vrsqrt.f32 %v1949_v46 }
 0x891   :  { %v2346_v53 = vpop.eup %2345 }
 0x892   :  { %v1951_v6 = vmul.f32 %v2346_v53, %v1939_v39 }
 0x894   :  { %v1958_v48 = vmul.f32 %v2015_v42, %v1951_v6 }
 0x896   :  { %v1965_v49 = vadd.f32 %v2016_v47, %v1958_v48 }
 0x898   :  { %v1966_v50 = vmax.f32 %v1965_v49, 0.0 }
 0x89a   :  { %1967 = vst.msk [vmem:[%s3147_s28] sm:$0x7] %vm1615_vm10, %v1966_v50 }

// kernel: _lambda_.3
= control target key start
LH: loop header
LB: loop body
LE: loop exit
PB: predicated region body
PF: predicated region fallthrough
CT: control target
= control target key end

     0   :  { %s3027_s6 = smov 1   ;;  %s3028_s10 = smov 2   ;;  %s3690_s0 = inlined_call_operand.smem [shape: u32[32], index: -1, kind: input, shape index: {}] }
   0x1   :  { %s3086_s5 = sld [smem:[%s3690_s0]]   ;;  %s3029_s14 = smov 3  }
   0x2   :  { %s3091_s9 = sld [smem:[%s3690_s0 + %s3027_s6]]   ;;  %s3030_s18 = smov 4  }
   0x3   :  { %s3096_s13 = sld [smem:[%s3690_s0 + %s3028_s10]]   ;;  %s3031_s22 = smov 5  }
   0x4   :  { %s3101_s17 = sld [smem:[%s3690_s0 + %s3029_s14]]   ;;  %s3032_s26 = smov 6  }
   0x5   :  { %s3106_s21 = sld [smem:[%s3690_s0 + %s3030_s18]]   ;;  %s3033_s30 = smov 7  }
   0x6   :  { %s3111_s25 = sld [smem:[%s3690_s0 + %s3031_s22]]   ;;  %s3034_s4 = smov 8  }
   0x7   :  { %3698 = sst [smem:[#allocation32_spill]] %s3086_s5  ;;  %s3035_s10 = smov 9  }
   0x8   :  { %3699 = sst [smem:[#allocation33_spill]] %s3091_s9  ;;  %s3036_s15 = smov 10  }
   0x9   :  { %3700 = sst [smem:[#allocation34_spill]] %s3096_s13  ;;  %s3037_s20 = smov 11  }
   0xa   :  { %s3116_s29 = sld [smem:[%s3690_s0 + %s3032_s26]]   ;;  %s3038_s26 = smov 12  }
   0xb   :  { %s3121_s3 = sld [smem:[%s3690_s0 + %s3033_s30]]   ;;  %s3039_s1 = smov 13  }
   0xc   :  { %s3126_s8 = sld [smem:[%s3690_s0 + %s3034_s4]]   ;;  %s3040_s7 = smov 14  }
   0xd   :  { %s3131_s14 = sld [smem:[%s3690_s0 + %s3035_s10]]   ;;  %s3042_s22 = smov 16  }
   0xe   :  { %s3136_s19 = sld [smem:[%s3690_s0 + %s3036_s15]]   ;;  %s3041_s15 = smov 15  }
   0xf   :  { %s3141_s24 = sld [smem:[%s3690_s0 + %s3037_s20]]   ;;  %s3043_s28 = smov 17  }
  0x10   :  { %s3146_s30 = sld [smem:[%s3690_s0 + %s3038_s26]]  }
  0x11   :  { %s3151_s6 = sld [smem:[%s3690_s0 + %s3039_s1]]  }
  0x12   :  { %s3156_s12 = sld [smem:[%s3690_s0 + %s3040_s7]]   ;;  %s3044_s7 = smov 18  }
  0x13   :  { %3701 = sst [smem:[#allocation35_spill]] %s3131_s14 }
  0x14   :  { %s3161_s20 = sld [smem:[%s3690_s0 + %s3041_s15]]   ;;  %s3045_s15 = smov 19  }
  0x15   :  { %3702 = sst [smem:[#allocation36_spill]] %s3141_s24 }
  0x16   :  { %s3166_s27 = sld [smem:[%s3690_s0 + %s3042_s22]]   ;;  %s3046_s22 = smov 20  }
  0x17   :  { %3703 = sst [smem:[#allocation37_spill]] %s3151_s6 }
  0x18   :  { %3704 = sst [smem:[#allocation38_spill]] %s3156_s12 }
  0x19   :  { %s3171_s4 = sld [smem:[%s3690_s0 + %s3043_s28]]   ;;  %s3047_s28 = smov 21  }
  0x1a   :  { %3705 = sst [smem:[#allocation39_spill]] %s3161_s20 }
  0x1b   :  { %s3176_s6 = sld [smem:[%s3690_s0 + %s3044_s7]]   ;;  %s3048_s7 = smov 22  }
  0x1c   :  { %3706 = sst [smem:[#allocation40_spill]] %s3166_s27 }
  0x1d   :  { %s3181_s20 = sld [smem:[%s3690_s0 + %s3045_s15]]   ;;  %s3049_s15 = smov 23  }
  0x1e   :  { %s3186_s27 = sld [smem:[%s3690_s0 + %s3046_s22]]   ;;  %s3050_s22 = smov 24  }
  0x1f   :  { %3707 = sst [smem:[#allocation41_spill]] %s3171_s4 }
  0x20   :  { %s3191_s4 = sld [smem:[%s3690_s0 + %s3047_s28]]   ;;  %s3051_s28 = smov 25  }
  0x21   :  { %3708 = sst [smem:[#allocation42_spill]] %s3176_s6 }
  0x22   :  { %s3196_s6 = sld [smem:[%s3690_s0 + %s3048_s7]]   ;;  %s3052_s7 = smov 26  }
  0x23   :  { %s3201_s24 = sld [smem:[%s3690_s0 + %s3049_s15]]   ;;  %s3053_s15 = smov 27  }
  0x24   :  { %s3206_s12 = sld [smem:[%s3690_s0 + %s3050_s22]]   ;;  %s3054_s22 = smov 28  }
  0x25   :  { %s3211_s9 = sld [smem:[%s3690_s0 + %s3051_s28]]   ;;  %s3055_s28 = smov 29  }
  0x26   :  { %s3226_s5 = sld [smem:[%s3690_s0 + %s3054_s22]]  }
  0x27   :  { %s3231_s13 = sld [smem:[%s3690_s0 + %s3055_s28]]  }
  0x28   :  { %3709 = sst [smem:[#allocation43_spill]] %s3196_s6 }
  0x29   :  { %3710 = sst [smem:[#allocation44_spill]] %s3201_s24 }
  0x2a   :  { %s3216_s6 = sld [smem:[%s3690_s0 + %s3052_s7]]   ;;  %s3056_s7 = smov 30  }
  0x2b   :  { %s3221_s24 = sld [smem:[%s3690_s0 + %s3053_s15]]   ;;  %s3057_s15 = smov 31  }
  0x2c   :  { %s3236_s14 = sld [smem:[%s3690_s0 + %s3056_s7]]  }
  0x31   :  { %3711 = sst [smem:[#allocation45_spill]] %s3221_s24 }
  0x32   :  { %s3241_s24 = sld [smem:[%s3690_s0 + %s3057_s15]]  }
  0x33   :  { %68 = vsyncpa [#allocation7], 0 }
  0x34   :  { %69 = vsyncpa [#allocation9], 0 }
  0x35   :  { %70 = vsyncpa [#allocation12], 0 }
  0x36   :  { %71 = vsyncpa [#allocation15], 0 }
  0x37   :  { %72 = vsyncpa [#allocation18], 0 }
  0x38   :  { %73 = vsyncpa [#allocation21], 0 }
  0x39   :  { %74 = vsyncpa [#allocation24], 0  ;;  %s3058_s22 = smov [#allocation8]   ;;  %s3059_s26 = smov [#allocation11]  }
  0x3a   :  { %s109_s23 = sshll.u32 %s3058_s22, 4  ;;  %s143_s28 = sshll.u32 %s3059_s26, 4  ;;  %s110_s23 = int_to_ptr.vmem [resolvable:$true] %s109_s23  ;;  %s144_s28 = int_to_ptr.vmem [resolvable:$true] %s143_s28 }
  0x3b   :  { %s2741_s1 = scalar_lea.hbm %s3136_s19, 16 }
  0x3c   :  { %p2742_p0 = scmp.ne.s32.totalorder %s3136_s19, %s2741_s1  ;;  %p2745_p1 = scmp.lt.u32.totalorder %s2741_s1, %s3136_s19 }
  0x3e   :  { %p2747_p2 = pnand %p2745_p1, %p2742_p0 }
  0x40   :  { %2750 = shalt.err (!%p2747_p2)
}
  0x41   :  { %s2751_s0 = scalar_lea.vmem %s110_s23, 16  ;;  %s2755_s2 = scalar_lea.vmem %s110_s23, 32 }
  0x42   :  { %p2752_p3 = scmp.ne.s32.totalorder %s110_s23, %s2751_s0  ;;  %p2756_p4 = scmp.lt.s32.totalorder %s110_s23, %s110_s23 }
  0x43   :  { %p2757_p5 = scmp.lt.s32.totalorder %s2755_s2, %s2751_s0 }
  0x45   :  { %p2758_p6 = por %p2757_p5, %p2756_p4 }
  0x47   :  { %p2759_p7 = pnand %p2758_p6, %p2752_p3 }
  0x49   :  { %2762 = shalt.err (!%p2759_p7)
}
  0x4a   :  { %112 = dma.hbm_to_vmem [thread:$0]  %s3136_s19, 16, %s110_s23, [#allocation9]  }
  0x4b   :  { %s2763_s7 = scalar_lea.hbm %s3181_s20, 16 }
  0x4c   :  { %p2764_p8 = scmp.ne.s32.totalorder %s3181_s20, %s2763_s7  ;;  %p2767_p9 = scmp.lt.u32.totalorder %s2763_s7, %s3181_s20 }
  0x4e   :  { %p2769_p10 = pnand %p2767_p9, %p2764_p8 }
  0x50   :  { %2772 = shalt.err (!%p2769_p10)
}
  0x51   :  { %s2773_s10 = scalar_lea.vmem %s144_s28, 16  ;;  %s2777_s11 = scalar_lea.vmem %s144_s28, 32 }
  0x52   :  { %p2774_p11 = scmp.ne.s32.totalorder %s144_s28, %s2773_s10  ;;  %p2778_p12 = scmp.lt.s32.totalorder %s144_s28, %s144_s28 }
  0x53   :  { %p2779_p13 = scmp.lt.s32.totalorder %s2777_s11, %s2773_s10 }
  0x55   :  { %p2780_p0 = por %p2779_p13, %p2778_p12 }
  0x57   :  { %p2781_p1 = pnand %p2780_p0, %p2774_p11 }
  0x59   :  { %2784 = shalt.err (!%p2781_p1)
}
  0x5a   :  { %146 = dma.hbm_to_vmem [thread:$0]  %s3181_s20, 16, %s144_s28, [#allocation12]  }
  0x5b   :  { %s3060_s15 = smov [#allocation14]   ;;  %s3061_s16 = smov [#allocation17]  }
  0x5c   :  { %s163_s19 = sshll.u32 %s3060_s15, 4  ;;  %s187_s18 = sshll.u32 %s3061_s16, 4  ;;  %s164_s19 = int_to_ptr.vmem [resolvable:$true] %s163_s19  ;;  %s188_s18 = int_to_ptr.vmem [resolvable:$true] %s187_s18 }
  0x5d   :  { %s2785_s22 = scalar_lea.hbm %s3191_s4, 16 }
  0x5e   :  { %p2786_p2 = scmp.ne.s32.totalorder %s3191_s4, %s2785_s22  ;;  %p2789_p3 = scmp.lt.u32.totalorder %s2785_s22, %s3191_s4 }
  0x60   :  { %p2791_p4 = pnand %p2789_p3, %p2786_p2 }
  0x62   :  { %2794 = shalt.err (!%p2791_p4)
}
  0x63   :  { %s2795_s23 = scalar_lea.vmem %s164_s19, 16  ;;  %s2799_s26 = scalar_lea.vmem %s164_s19, 32 }
  0x64   :  { %p2796_p5 = scmp.ne.s32.totalorder %s164_s19, %s2795_s23  ;;  %p2800_p6 = scmp.lt.s32.totalorder %s164_s19, %s164_s19 }
  0x65   :  { %p2801_p7 = scmp.lt.s32.totalorder %s2799_s26, %s2795_s23 }
  0x67   :  { %p2802_p8 = por %p2801_p7, %p2800_p6 }
  0x69   :  { %p2803_p9 = pnand %p2802_p8, %p2796_p5 }
  0x6b   :  { %2806 = shalt.err (!%p2803_p9)
}
  0x6c   :  { %166 = dma.hbm_to_vmem [thread:$0]  %s3191_s4, 16, %s164_s19, [#allocation15]  }
  0x6d   :  { %s2807_s20 = scalar_lea.hbm %s3211_s9, 16 }
  0x6e   :  { %p2808_p10 = scmp.ne.s32.totalorder %s3211_s9, %s2807_s20  ;;  %p2811_p11 = scmp.lt.u32.totalorder %s2807_s20, %s3211_s9 }
  0x70   :  { %p2813_p12 = pnand %p2811_p11, %p2808_p10 }
  0x72   :  { %2816 = shalt.err (!%p2813_p12)
}
  0x73   :  { %s2817_s28 = scalar_lea.vmem %s188_s18, 16  ;;  %s2821_s1 = scalar_lea.vmem %s188_s18, 32 }
  0x74   :  { %p2818_p13 = scmp.ne.s32.totalorder %s188_s18, %s2817_s28  ;;  %p2822_p0 = scmp.lt.s32.totalorder %s188_s18, %s188_s18 }
  0x75   :  { %p2823_p1 = scmp.lt.s32.totalorder %s2821_s1, %s2817_s28 }
  0x77   :  { %p2824_p2 = por %p2823_p1, %p2822_p0 }
  0x79   :  { %p2825_p3 = pnand %p2824_p2, %p2818_p13 }
  0x7b   :  { %2828 = shalt.err (!%p2825_p3)
}
  0x7c   :  { %190 = dma.hbm_to_vmem [thread:$0]  %s3211_s9, 16, %s188_s18, [#allocation18]  }
  0x7d   :  { %s3062_s0 = smov [#allocation20]   ;;  %s3063_s2 = smov [#allocation6]  }
  0x7e   :  { %s209_s4 = sshll.u32 %s3062_s0, 4  ;;  %s97_s7 = sshll.u32 %s3063_s2, 4  ;;  %s210_s4 = int_to_ptr.vmem [resolvable:$true] %s209_s4  ;;  %s98_s7 = int_to_ptr.vmem [resolvable:$true] %s97_s7 }
  0x7f   :  { %s2829_s10 = scalar_lea.hbm %s3226_s5, 16 }
  0x80   :  { %p2830_p4 = scmp.ne.s32.totalorder %s3226_s5, %s2829_s10  ;;  %p2833_p5 = scmp.lt.u32.totalorder %s2829_s10, %s3226_s5 }
  0x82   :  { %p2835_p6 = pnand %p2833_p5, %p2830_p4 }
  0x84   :  { %2838 = shalt.err (!%p2835_p6)
}
  0x85   :  { %s2839_s11 = scalar_lea.vmem %s210_s4, 16  ;;  %s2843_s15 = scalar_lea.vmem %s210_s4, 32 }
  0x86   :  { %p2840_p7 = scmp.ne.s32.totalorder %s210_s4, %s2839_s11  ;;  %p2844_p8 = scmp.lt.s32.totalorder %s210_s4, %s210_s4 }
  0x87   :  { %p2845_p9 = scmp.lt.s32.totalorder %s2843_s15, %s2839_s11 }
  0x89   :  { %p2846_p10 = por %p2845_p9, %p2844_p8 }
  0x8b   :  { %p2847_p11 = pnand %p2846_p10, %p2840_p7 }
  0x8d   :  { %2850 = shalt.err (!%p2847_p11)
}
  0x8e   :  { %212 = dma.hbm_to_vmem [thread:$0]  %s3226_s5, 16, %s210_s4, [#allocation21]  }
  0x8f   :  { %s2851_s9 = scalar_lea.hbm %s3126_s8, 16 }
  0x90   :  { %p2852_p12 = scmp.ne.s32.totalorder %s3126_s8, %s2851_s9  ;;  %p2855_p13 = scmp.lt.u32.totalorder %s2851_s9, %s3126_s8 }
  0x92   :  { %p2857_p0 = pnand %p2855_p13, %p2852_p12 }
  0x94   :  { %2860 = shalt.err (!%p2857_p0)
}
  0x95   :  { %s2861_s19 = scalar_lea.vmem %s98_s7, 16  ;;  %s2865_s16 = scalar_lea.vmem %s98_s7, 32 }
  0x96   :  { %p2862_p1 = scmp.ne.s32.totalorder %s98_s7, %s2861_s19  ;;  %p2866_p2 = scmp.lt.s32.totalorder %s98_s7, %s98_s7 }
  0x97   :  { %p2867_p3 = scmp.lt.s32.totalorder %s2865_s16, %s2861_s19 }
  0x99   :  { %p2868_p4 = por %p2867_p3, %p2866_p2 }
  0x9b   :  { %p2869_p5 = pnand %p2868_p4, %p2862_p1 }
  0x9d   :  { %2872 = shalt.err (!%p2869_p5)
}
  0x9e   :  { %100 = dma.hbm_to_vmem [thread:$0]  %s3126_s8, 16, %s98_s7, [#allocation7]  }
  0x9f   :  { %s3064_s18 = smov [#allocation10]   ;;  %s3065_s22 = smov [#allocation13]  }
  0xa0   :  { %s121_s5 = sshll.u32 %s3064_s18, 4  ;;  %s153_s23 = sshll.u32 %s3065_s22, 4  ;;  %s122_s5 = int_to_ptr.vmem [resolvable:$true] %s121_s5  ;;  %s154_s23 = int_to_ptr.vmem [resolvable:$true] %s153_s23 }
  0xa1   :  { %s2873_s26 = scalar_lea.hbm %s3146_s30, 16 }
  0xa2   :  { %p2874_p6 = scmp.ne.s32.totalorder %s3146_s30, %s2873_s26  ;;  %p2877_p7 = scmp.lt.u32.totalorder %s2873_s26, %s3146_s30 }
  0xa4   :  { %p2879_p8 = pnand %p2877_p7, %p2874_p6 }
  0xa6   :  { %2882 = shalt.err (!%p2879_p8)
}
  0xa7   :  { %s2883_s20 = scalar_lea.vmem %s122_s5, 16  ;;  %s2887_s28 = scalar_lea.vmem %s122_s5, 32 }
  0xa8   :  { %p2884_p9 = scmp.ne.s32.totalorder %s122_s5, %s2883_s20  ;;  %p2888_p10 = scmp.lt.s32.totalorder %s122_s5, %s122_s5 }
  0xa9   :  { %p2889_p11 = scmp.lt.s32.totalorder %s2887_s28, %s2883_s20 }
  0xab   :  { %p2890_p12 = por %p2889_p11, %p2888_p10 }
  0xad   :  { %p2891_p13 = pnand %p2890_p12, %p2884_p9 }
  0xaf   :  { %2894 = shalt.err (!%p2891_p13)
}
  0xb0   :  { %124 = dma.hbm_to_vmem [thread:$0]  %s3146_s30, 16, %s122_s5, [#allocation9]  }
  0xb1   :  { %s2895_s8 = scalar_lea.hbm %s3186_s27, 16 }
  0xb2   :  { %p2896_p0 = scmp.ne.s32.totalorder %s3186_s27, %s2895_s8  ;;  %p2899_p1 = scmp.lt.u32.totalorder %s2895_s8, %s3186_s27 }
  0xb4   :  { %p2901_p2 = pnand %p2899_p1, %p2896_p0 }
  0xb6   :  { %2904 = shalt.err (!%p2901_p2)
}
  0xb7   :  { %s2905_s1 = scalar_lea.vmem %s154_s23, 16  ;;  %s2909_s0 = scalar_lea.vmem %s154_s23, 32 }
  0xb8   :  { %p2906_p3 = scmp.ne.s32.totalorder %s154_s23, %s2905_s1  ;;  %p2910_p4 = scmp.lt.s32.totalorder %s154_s23, %s154_s23 }
  0xb9   :  { %p2911_p5 = scmp.lt.s32.totalorder %s2909_s0, %s2905_s1 }
  0xbb   :  { %p2912_p6 = por %p2911_p5, %p2910_p4 }
  0xbd   :  { %p2913_p7 = pnand %p2912_p6, %p2906_p3 }
  0xbf   :  { %2916 = shalt.err (!%p2913_p7)
}
  0xc0   :  { %156 = dma.hbm_to_vmem [thread:$0]  %s3186_s27, 16, %s154_s23, [#allocation12]  }
  0xc1   :  { %s3066_s4 = smov [#allocation16]   ;;  %s3067_s2 = smov [#allocation19]  }
  0xc2   :  { %s177_s30 = sshll.u32 %s3066_s4, 4  ;;  %s197_s7 = sshll.u32 %s3067_s2, 4  ;;  %s178_s30 = int_to_ptr.vmem [resolvable:$true] %s177_s30  ;;  %s198_s7 = int_to_ptr.vmem [resolvable:$true] %s197_s7 }
  0xc3   :  { %s2917_s10 = scalar_lea.hbm %s3206_s12, 16 }
  0xc4   :  { %p2918_p8 = scmp.ne.s32.totalorder %s3206_s12, %s2917_s10  ;;  %p2921_p9 = scmp.lt.u32.totalorder %s2917_s10, %s3206_s12 }
  0xc6   :  { %p2923_p10 = pnand %p2921_p9, %p2918_p8 }
  0xc8   :  { %2926 = shalt.err (!%p2923_p10)
}
  0xc9   :  { %s2927_s11 = scalar_lea.vmem %s178_s30, 16  ;;  %s2931_s15 = scalar_lea.vmem %s178_s30, 32 }
  0xca   :  { %p2928_p11 = scmp.ne.s32.totalorder %s178_s30, %s2927_s11  ;;  %p2932_p12 = scmp.lt.s32.totalorder %s178_s30, %s178_s30 }
  0xcb   :  { %p2933_p13 = scmp.lt.s32.totalorder %s2931_s15, %s2927_s11 }
  0xcd   :  { %p2934_p0 = por %p2933_p13, %p2932_p12 }
  0xcf   :  { %p2935_p1 = pnand %p2934_p0, %p2928_p11 }
  0xd1   :  { %2938 = shalt.err (!%p2935_p1)
}
  0xd2   :  { %180 = dma.hbm_to_vmem [thread:$0]  %s3206_s12, 16, %s178_s30, [#allocation15]  }
  0xd3   :  { %s2939_s27 = scalar_lea.hbm %s3216_s6, 16 }
  0xd4   :  { %p2940_p2 = scmp.ne.s32.totalorder %s3216_s6, %s2939_s27  ;;  %p2943_p3 = scmp.lt.u32.totalorder %s2939_s27, %s3216_s6 }
  0xd6   :  { %p2945_p4 = pnand %p2943_p3, %p2940_p2 }
  0xd8   :  { %2948 = shalt.err (!%p2945_p4)
}
  0xd9   :  { %s2949_s9 = scalar_lea.vmem %s198_s7, 16  ;;  %s2953_s19 = scalar_lea.vmem %s198_s7, 32 }
  0xda   :  { %p2950_p5 = scmp.ne.s32.totalorder %s198_s7, %s2949_s9  ;;  %p2954_p6 = scmp.lt.s32.totalorder %s198_s7, %s198_s7 }
  0xdb   :  { %p2955_p7 = scmp.lt.s32.totalorder %s2953_s19, %s2949_s9 }
  0xdd   :  { %p2956_p8 = por %p2955_p7, %p2954_p6 }
  0xdf   :  { %p2957_p9 = pnand %p2956_p8, %p2950_p5 }
  0xe1   :  { %2960 = shalt.err (!%p2957_p9)
}
  0xe2   :  { %200 = dma.hbm_to_vmem [thread:$0]  %s3216_s6, 16, %s198_s7, [#allocation18]  }
  0xe3   :  { %s3068_s16 = smov [#allocation22]   ;;  %s3069_s18 = smov [#allocation23]  }
  0xe4   :  { %s219_s12 = sshll.u32 %s3068_s16, 4  ;;  %s229_s5 = sshll.u32 %s3069_s18, 4  ;;  %s220_s12 = int_to_ptr.vmem [resolvable:$true] %s219_s12  ;;  %s230_s5 = int_to_ptr.vmem [resolvable:$true] %s229_s5 }
  0xe5   :  { %s2961_s22 = scalar_lea.hbm %s3231_s13, 16 }
  0xe6   :  { %p2962_p10 = scmp.ne.s32.totalorder %s3231_s13, %s2961_s22  ;;  %p2965_p11 = scmp.lt.u32.totalorder %s2961_s22, %s3231_s13 }
  0xe8   :  { %p2967_p12 = pnand %p2965_p11, %p2962_p10 }
  0xea   :  { %2970 = shalt.err (!%p2967_p12)
}
  0xeb   :  { %s2971_s23 = scalar_lea.vmem %s220_s12, 16  ;;  %s2975_s26 = scalar_lea.vmem %s220_s12, 32 }
  0xec   :  { %p2972_p13 = scmp.ne.s32.totalorder %s220_s12, %s2971_s23  ;;  %p2976_p0 = scmp.lt.s32.totalorder %s220_s12, %s220_s12 }
  0xed   :  { %p2977_p1 = scmp.lt.s32.totalorder %s2975_s26, %s2971_s23 }
  0xef   :  { %p2978_p2 = por %p2977_p1, %p2976_p0 }
  0xf1   :  { %p2979_p3 = pnand %p2978_p2, %p2972_p13 }
  0xf3   :  { %2982 = shalt.err (!%p2979_p3)
}
  0xf4   :  { %222 = dma.hbm_to_vmem [thread:$0]  %s3231_s13, 16, %s220_s12, [#allocation21]  }
  0xf5   :  { %s2983_s6 = scalar_lea.hbm %s3236_s14, 16 }
  0xf6   :  { %p2984_p4 = scmp.ne.s32.totalorder %s3236_s14, %s2983_s6  ;;  %p2987_p5 = scmp.lt.u32.totalorder %s2983_s6, %s3236_s14 }
  0xf8   :  { %p2989_p6 = pnand %p2987_p5, %p2984_p4 }
  0xfa   :  { %2992 = shalt.err (!%p2989_p6)
}
  0xfb   :  { %s2993_s20 = scalar_lea.vmem %s230_s5, 16  ;;  %s2997_s28 = scalar_lea.vmem %s230_s5, 32 }
  0xfc   :  { %p2994_p7 = scmp.ne.s32.totalorder %s230_s5, %s2993_s20  ;;  %p2998_p8 = scmp.lt.s32.totalorder %s230_s5, %s230_s5 }
  0xfd   :  { %p2999_p9 = scmp.lt.s32.totalorder %s2997_s28, %s2993_s20 }
  0xff   :  { %p3000_p10 = por %p2999_p9, %p2998_p8 }
 0x101   :  { %p3001_p11 = pnand %p3000_p10, %p2994_p7 }
 0x103   :  { %3004 = shalt.err (!%p3001_p11)
}
 0x104   :  { %232 = dma.hbm_to_vmem [thread:$0]  %s3236_s14, 16, %s230_s5, [#allocation24]  }
 0x105   :  { %3009 = dma.done.wait [#allocation7], 16  }
 0x106   :  { %3010 = vsyncadd [#allocation7], 4294967280 }
 0x107   :  { %3011 = dma.done.wait [#allocation9], 32  }
 0x108   :  { %3012 = vsyncadd [#allocation9], 4294967264 }
 0x109   :  { %3013 = dma.done.wait [#allocation12], 32  }
 0x10a   :  { %3014 = vsyncadd [#allocation12], 4294967264 }
 0x10b   :  { %3015 = dma.done.wait [#allocation15], 32  }
 0x10c   :  { %3016 = vsyncadd [#allocation15], 4294967264 }
 0x10d   :  { %3017 = dma.done.wait [#allocation18], 32  }
 0x10e   :  { %3018 = vsyncadd [#allocation18], 4294967264 }
 0x10f   :  { %3019 = dma.done.wait [#allocation21], 32  }
 0x110   :  { %3020 = vsyncadd [#allocation21], 4294967264 }
 0x111   :  { %3021 = dma.done.wait [#allocation24], 16  }
 0x112   :  { %3022 = vsyncadd [#allocation24], 4294967280  ;;  %s3712_s13 = sld [smem:[#allocation35_spill]]  ;;  %vm285_vm0 = vcmask 256000   ;;  %v3070_v0 = vmov 0.0   ;;  %s3713_s14 = sld [smem:[#allocation34_spill]] }
 0x113   :  { %287 = vst.msk [vmem:[#allocation3] sm:$0x7] %vm285_vm0, %v3070_v0  ;;  %v3293_v1 = vld [vmem:[%s3101_s17] sm:$0x3]  ;;  %s3714_s8 = sld [smem:[#allocation32_spill]]  ;;  %s3715_s1 = sld [smem:[#allocation33_spill]] }
 0x114   :  { %v3296_v2 = vld [vmem:[%s3106_s21] ss:$0 sm:$0xff]  ;;  %v3302_v4 = vld [vmem:[%s3111_s25 + $0x8] sm:$0xff]  ;;  %v3311_v7 = vld [vmem:[%s3116_s29 + $0x10] sm:$0xff]  ;;  %vm289_vm1 = vcmask 10240   ;;  %s3341_s17 = smov 0  }
 0x115   :  { %v3299_v3 = vld [vmem:[%s3111_s25] sm:$0xff]  ;;  %v3308_v6 = vld [vmem:[%s3116_s29 + $0x8] sm:$0xff]  ;;  %v3314_v8 = vld [vmem:[%s3116_s29 + $0x18] sm:$0xff] }
 0x116   :  { %v3305_v5 = vld [vmem:[%s3116_s29] sm:$0xff]  ;;  %v3319_v10 = vld [vmem:[#allocation6] ss:$0 sm:$0xff]  ;;  %v3333_v15 = vld [vmem:[#allocation8] ss:$0 sm:$0xff] }
 0x117   :  { %v3317_v9 = vld [vmem:[%s3121_s3] ss:$0 sm:$0xff] }
 0x118   :  { %v3322_v11 = vld [vmem:[%s3712_s13] sm:$0xff]  ;;  %v3325_v12 = vld [vmem:[%s3712_s13 + $0x8] sm:$0xff]  ;;  %v3328_v13 = vld [vmem:[%s3712_s13 + $0x10] sm:$0xff] }
 0x119   :  { %v3331_v14 = vld [vmem:[%s3712_s13 + $0x18] sm:$0xff]  ;;  %v284_v16 = vld [vmem:[%s3713_s14] sm:$0x7] }
 0x11a   :  { %v288_v17 = vld [vmem:[%s3714_s8] sm:$0x7]  ;;  %286 = vst.msk [vmem:[#allocation2] sm:$0x7] %vm285_vm0, %v284_v16 }
 0x11b   :  { %v291_v18 = vld [vmem:[%s3715_s1] sm:$0x7]  ;;  %290 = vst.msk [vmem:[#allocation4] sm:$0x7] %vm289_vm1, %v288_v17 }
 0x11c   :  { %292 = vst.msk [vmem:[#allocation5] sm:$0x7] %vm289_vm1, %v291_v18 }
 0x11d LB: > { %vm310_vm2 = vcmask 1041408   ;;  %vm306_vm3 = vcmask 15360   ;;  %v3071_v20 = vmov 0.0   ;;  %vm3072_vm4 = vmmov 0   ;;  %s3074_s21 = smov 64   ;;  %s3075_s25 = smov 32   ;;  %s3025_s17 = sphi %s3341_s17, %s298_s17  }
 0x11e   : > { %2453 = vmatprep.subr.mxu0 %v3071_v20  ;;  %2455 = vmatprep.mubr.msk.f32.mxu0 %vm3072_vm4, %v3071_v20  ;;  %v2537_v21 = vpack.c.bf16 %v3308_v6, %v3305_v5  ;;  %v3073_v22 = vmov 0.0|0.0   ;;  %v2534_v23 = vpack.c.bf16 %v3302_v4, %v3299_v3  ;;  %v2540_v24 = vpack.c.bf16 %v3314_v8, %v3311_v7  ;;  %v385_v37 = vld [vmem:[#allocation3] sm:$0x7]  ;;  %s3716_s29 = sld [smem:[#allocation38_spill]]  ;;  %s3717_s3 = sld [smem:[#allocation36_spill]] }
 0x11f   : > { %2454 = vmatpush3.msk.msra.mxu0 %vm310_vm2, %v3293_v1  ;;  %2533 = vmatprep.subr.bf16.mxu1 %v3073_v22  ;;  %vm466_vm5 = vcmask 261120   ;;  %vm392_vm6 = vcmask 130048   ;;  %v2543_v50 = vpack.c.bf16 %v3325_v12, %v3322_v11  ;;  %v2546_v58 = vpack.c.bf16 %v3331_v14, %v3328_v13  ;;  %s3076_s0 = smov 96   ;;  %s3718_s4 = sld [smem:[#allocation37_spill]] }
 0x120   : > { %2536 = vmatprep.subr.bf16.mxu0 %v3073_v22  ;;  %2462 = vmatprep.mubr.msk.f32.mxu1 %vm3072_vm4, %v3071_v20  ;;  %s2339_s30 = sshll.u32 %s3025_s17, 2  ;;  %s3719_s7 = sld [smem:[#allocation42_spill]]  ;;  %vm1182_vm7 = vcmask 1042432   ;;  %vm1187_vm8 = vcmask 1045504   ;;  %vm1381_vm9 = vcmask 1040384   ;;  %vm1710_vm10 = vcmask 253952  }
 0x121   : > { %2535 = vmatpush3.bf16.msra.mxu1 %v2534_v23  ;;  %v384_v25 = vld [vmem:[#allocation2] sm:$0x7]  ;;  %s2247_s2 = scalar_lea.vmem %s3241_s24, %s2339_s30  ;;  %s3720_s10 = sld [smem:[#allocation39_spill]]  ;;  %vm1939_vm11 = vcmask 1041409   ;;  %vm1941_vm12 = vcmask 1042434   ;;  %vm2092_vm13 = vcmask 518144  }
 0x122   : > { %s3721_s11 = sld [smem:[#allocation40_spill]]  ;;  %s3722_s15 = sld [smem:[#allocation41_spill]]  ;;  %vm2136_vm14 = vcmask 523264  }
 0x123   : > { %v299_v19 = vld [vmem:[#allocation5] sm:$0x7]  ;;  %s3723_s27 = sld [smem:[#allocation43_spill]]  ;;  %s3724_s9 = sld [smem:[#allocation44_spill]] }
 0x124   : > { %2456 = vmatmul.mubr.msk.f32.vlgmr.msra.gmra.mrb[0].mxu0 %vm306_vm3, %v299_v19  ;;  %v670_v48 = vld [vmem:[%s3716_s29 + $0x8] sm:$0xff]  ;;  %v669_v51 = vld [vmem:[%s3716_s29] sm:$0xff]  ;;  %v672_v19 = vld [vmem:[%s3716_s29 + $0x18] sm:$0xff]  ;;  %s3725_s19 = sld [smem:[#allocation45_spill]]  ;;  %s298_s17 = sadd.s32 1, %s3025_s17  }
 0x125   : > { %2538 = vmatpush3.bf16.msra.mxu0 %v2537_v21  ;;  %2473 = vmatprep.mubr.msk.f32.mxu0 %vm3072_vm4, %v3071_v20  ;;  %v674_v49 = vld [vmem:[%s3716_s29 + $0x28] sm:$0xff]  ;;  %v673_v53 = vld [vmem:[%s3716_s29 + $0x20] sm:$0xff]  ;;  %v676_v21 = vld [vmem:[%s3716_s29 + $0x38] sm:$0xff]  ;;  %p295_p12 = scmp.ge.s32.totalorder %s298_s17, 4  }
 0x126   : > { %2539 = vmatprep.subr.bf16.mxu0 %v3073_v22  ;;  %v2548_v52 = vpack.c.bf16 %v674_v49, %v670_v48  ;;  %v678_v54 = vld [vmem:[%s3716_s29 + $0x48] sm:$0xff]  ;;  %v2550_v56 = vpack.c.bf16 %v673_v53, %v669_v51  ;;  %v677_v59 = vld [vmem:[%s3716_s29 + $0x40] sm:$0xff]  ;;  %v2556_v23 = vpack.c.bf16 %v676_v21, %v672_v19 }
 0x127   : > { %v682_v55 = vld [vmem:[%s3716_s29 + $0x68] sm:$0xff]  ;;  %v681_v60 = vld [vmem:[%s3716_s29 + $0x60] sm:$0xff] }
 0x128   : > { %v2552_v57 = vpack.c.bf16 %v682_v55, %v678_v54  ;;  %2549 = vmatprep.subr.bf16.mxu1 %v2548_v52  ;;  %v2554_v61 = vpack.c.bf16 %v681_v60, %v677_v59  ;;  %v659_v18 = vld [vmem:[%s3717_s3] sm:$0x3] }
 0x129   : > { %2541 = vmatpush3.bf16.msra.mxu0 %v2540_v24  ;;  %v662_v24 = vld [vmem:[%s3718_s4 + $0x8] sm:$0xff] }
 0x12a   : > { %2542 = vmatprep.subr.bf16.mxu0 %v3073_v22 }
 0x12c   : > { %2474 = vmatmul.mubr.msk.f32.vlgmr.msra.gmra.mrb[2].mxu0 %vm466_vm5, %v384_v25  ;;  %v666_v25 = vld [vmem:[%s3718_s4 + $0x28] sm:$0xff] }
 0x12d   : > { %2484 = vmatprep.mubr.msk.f32.mxu0 %vm3072_vm4, %v3071_v20  ;;  %2544 = vmatpush3.bf16.msra.mxu0 %v2543_v50 }
 0x12e   : > { %2545 = vmatprep.subr.bf16.mxu0 %v3073_v22 }
 0x131   : > { %2547 = vmatpush3.bf16.msra.mxu0 %v2546_v58 }
 0x132   : > { %2487 = vmatprep.subr.msk.mxu0 %vm310_vm2, %v659_v18 }
 0x1f7   : > { %v380_v26 = vpop.f32.mrb[0].mxu0 }
 0x1f8   : > { %v381_v27 = vadd.f32 %v3296_v2, %v380_v26  ;;  %v2457_v28 = vpop.f32.mrb[1].mxu0  ;;  %v2564_v26 = vpack.c.bf16 %v666_v25, %v662_v24 }
 0x1fa   : > { %2463 = vmatmul.mubr.msk.f32.vlgmr.msra.gmra.mrb[0].mxu1 %vm392_vm6, %v381_v27  ;;  %v3077_v27 = vmov 1966171168  }
 0x1fb   : > { %1084 = vmatprep.mubr.f32.mxu1 %v3071_v20  ;;  %2551 = vmatpush1.bf16.msra.mxu1 %v2550_v56  ;;  %v757_v28 = vunpack.c.l.s4 %v3077_v27 }
 0x1fc   : > { %2553 = vmatprep.subr.bf16.mxu1 %v2552_v57 }
 0x1ff   : > { %v536_v29 = vpop.f32.mrb[2].mxu0  ;;  %2555 = vmatpush1.bf16.msra.mxu1 %v2554_v61 }
 0x200   : > { %v2475_v30 = vpop.f32.mrb[3].mxu0  ;;  %2565 = vmatprep.subr.bf16.mxu1 %v2564_v26 }
 0x201   : > { %v758_v30 = vunpack.c.0.s8 %v757_v28 }
 0x2cd   : > { %v462_v31 = vpop.f32.mrb[0].mxu1 }
 0x2ce   : > { %v463_v32 = vadd.f32 %v3317_v9, %v462_v31  ;;  %v2464_v33 = vpop.f32.mrb[1].mxu1 }
 0x2cf   : > { %v657_v33 = vld [vmem:[#allocation4] sm:$0x7] }
 0x2d0   : > { %v540_v34 = vadd.f32 %v536_v29, %v463_v32  ;;  %v759_v29 = vlaneseq }
 0x2d2   : > { %v547_v35 = vadd.f32 %v3319_v10, %v540_v34  ;;  %v3407_v31 = vshrl.u32 %v759_v29, 7 }
 0x2d4   : > { %2719 = vtanh.f32 %v547_v35  ;;  %v2313_v38 = vmul.f32 -1.442695, %v547_v35 }
 0x2d6   : > { %2721 = vpow2.f32 %v2313_v38 }
 0x2de   : > { %v2720_v36 = vpop.eup %2719 }
 0x2df   : > { %561 = vrot.lane.b32.xlu0 %v2720_v36, %s3074_s21  ;;  %v3415_v36 = vsub.s32 %v758_v30, %v3407_v31 }
 0x2e0   : > { %v2722_v39 = vpop.eup %2721 }
 0x2e1   : > { %v551_v40 = vadd.f32 1.0, %v2722_v39 }
 0x2e3   : > { %556 = vrot.lane.b32.xlu0 %v385_v37, %s3075_s25  ;;  %2723 = vrcp.f32 %v551_v40 }
 0x2ed   : > { %v2724_v41 = vpop.eup %2723 }
 0x351   : > { %v562_v42 = vpop.permute.xlu0 %561 }
 0x352   : > { %v564_v43 = vmul.f32 %v2724_v41, %v562_v42 }
 0x354   : > { %566 = vrot.lane.b32.xlu1 %v564_v43, %s3075_s25 }
 0x355   : > { %v557_v44 = vpop.permute.xlu0 %556 }
 0x356   : > { %v559_v45 = vmul.f32 %v2724_v41, %v557_v44 }
 0x3c6   : > { %v567_v46 = vpop.permute.xlu1 %566 }
 0x3c7   : > { %v569_v47 = vadd.f32 %v567_v46, %v559_v45 }
 0x3c9   : > { %2725 = vtanh.f32 %v569_v47 }
 0x3d3   : > { %v2726_v62 = vpop.eup %2725 }
 0x3d4   : > { %572 = vrot.lane.b32.xlu1 %v2726_v62, %s3074_s21 }
 0x3d8   : > { %2251 = vrot.lane.b32.xlu1 %v569_v47, %s3076_s0 }
 0x446   : > { %v573_v63 = vpop.permute.xlu1 %572 }
 0x447   : > { %v575_v0 = vmul.f32 %v2724_v41, %v573_v63  ;;  %v3423_v41 = vsub.s32 0, %v3407_v31 }
 0x449   : > { %583 = vrot.lane.b32.xlu0 %v575_v0, %s3075_s25 }
 0x44a   : > { %v2252_v16 = vpop.permute.xlu1 %2251 }
 0x44b   : > { %2254 = vst.msk [vmem:[#allocation3] sm:$0x7] %vm285_vm0, %v2252_v16 }
 0x4bb   : > { %v3393_v17 = vpop.permute.xlu0 %583 }
 0x4bc   : > { %2485 = vmatmul.mubr.msk.f32.vlgmr.msra.gmra.mrb[4].mxu0 %vm466_vm5, %v3393_v17  ;;  %2320 = vmatmul.mubr.msk.f32.vlgmr.msra.gmra.mrb[2].mxu1 %vm466_vm5, %v3393_v17 }
 0x4bd   : > { %1262 = vmatprep.mubr.f32.mxu1 %v3071_v20  ;;  %2488 = vmatpush3.msk.msra.mxu0 %vm310_vm2, %v659_v18 }
 0x4be   : > { %2557 = vmatprep.subr.bf16.mxu0 %v2556_v23 }
 0x58f   : > { %v653_v32 = vpop.f32.mrb[4].mxu0  ;;  %v3411_v34 = vpop.f32.mrb[2].mxu1 }
 0x590   : > { %v654_v35 = vadd.f32 %v3333_v15, %v653_v32  ;;  %v2486_v37 = vpop.f32.mrb[5].mxu0  ;;  %v3417_v38 = vpop.f32.mrb[3].mxu1 }
 0x592   : > { %v658_v39 = vadd.f32 %v657_v33, %v654_v35  ;;  %2248 = vst.msk [vmem:[%s2247_s2] sm:$0x7] %vm289_vm1, %v654_v35  ;;  %2256 = vst.msk [vmem:[#allocation5] sm:$0x7] %vm289_vm1, %v654_v35  ;;  %v671_v33 = vld [vmem:[%s3716_s29 + $0x10] sm:$0xff] }
 0x593   : > { %v675_v35 = vld [vmem:[%s3716_s29 + $0x30] sm:$0xff] }
 0x594   : > { %v762_v40 = vrot.slane %v658_v39, %v3415_v36  ;;  %2255 = vst.msk [vmem:[#allocation4] sm:$0x7] %vm289_vm1, %v658_v39 }
 0x596   : > { %v763_v42 = vcombine.high %v762_v40, %v762_v40  ;;  %v770_v43 = vrot.slane %v762_v40, %v3415_v36  ;;  %v680_v40 = vld [vmem:[%s3716_s29 + $0x58] sm:$0xff] }
 0x598   : > { %v777_v44 = vrot.slane %v763_v42, %v3415_v36  ;;  %v778_v45 = vcombine.high %v770_v43, %v770_v43  ;;  %v782_v46 = vrot.slane %v770_v43, %v3423_v41  ;;  %v684_v42 = vld [vmem:[%s3716_s29 + $0x78] sm:$0xff] }
 0x59a   : > { %v786_v47 = vrot.slane %v777_v44, %v3423_v41  ;;  %v790_v48 = vrot.slane %v778_v45, %v3423_v41  ;;  %v794_v49 = vsub.f32 %v658_v39, %v782_v46  ;;  %v2558_v44 = vpack.c.bf16 %v675_v35, %v671_v33  ;;  %v706_v33 = vld [vmem:[%s3719_s7 + $0x90] sm:$0xff]  ;;  %v707_v35 = vld [vmem:[%s3719_s7 + $0x98] sm:$0xff] }
 0x59b   : > { %v2560_v46 = vpack.c.bf16 %v684_v42, %v680_v40  ;;  %v739_v40 = vld [vmem:[%s3719_s7 + $0x198] sm:$0xff]  ;;  %v690_v42 = vld [vmem:[%s3719_s7 + $0x10] sm:$0xff] }
 0x59c   : > { %v795_v50 = vsub.f32 %v658_v39, %v786_v47  ;;  %v796_v51 = vsub.f32 %v658_v39, %v790_v48  ;;  %v806_v52 = vrot.slane %v794_v49, %v3415_v36  ;;  %v679_v47 = vld [vmem:[%s3716_s29 + $0x50] sm:$0xff] }
 0x59d   : > { %v683_v48 = vld [vmem:[%s3716_s29 + $0x70] sm:$0xff] }
 0x59e   : > { %v807_v53 = vcombine.high %v806_v52, %v806_v52  ;;  %v814_v54 = vrot.slane %v806_v52, %v3415_v36  ;;  %v829_v55 = vrot.slane %v795_v50, %v3415_v36  ;;  %v852_v56 = vrot.slane %v796_v51, %v3415_v36  ;;  %v664_v50 = vld [vmem:[%s3718_s4 + $0x18] sm:$0xff]  ;;  %v661_v52 = vld [vmem:[%s3718_s4] sm:$0xff] }
 0x59f   : > { %v2562_v49 = vpack.c.bf16 %v683_v48, %v679_v47  ;;  %v668_v51 = vld [vmem:[%s3718_s4 + $0x38] sm:$0xff] }
 0x5a0   : > { %v821_v57 = vrot.slane %v807_v53, %v3415_v36  ;;  %v822_v58 = vcombine.high %v814_v54, %v814_v54  ;;  %v830_v59 = vcombine.high %v829_v55, %v829_v55  ;;  %v837_v60 = vrot.slane %v829_v55, %v3415_v36  ;;  %v665_v53 = vld [vmem:[%s3718_s4 + $0x20] sm:$0xff]  ;;  %v663_v55 = vld [vmem:[%s3718_s4 + $0x10] sm:$0xff]  ;;  %v723_v47 = vld [vmem:[%s3719_s7 + $0x118] sm:$0xff] }
 0x5a1   : > { %v853_v61 = vcombine.high %v852_v56, %v852_v56  ;;  %v860_v62 = vrot.slane %v852_v56, %v3415_v36  ;;  %v2566_v56 = vpack.c.bf16 %v665_v53, %v661_v52  ;;  %v741_v53 = vld [vmem:[%s3719_s7 + $0x1a8] sm:$0xff] }
 0x5a2   : > { %v844_v63 = vrot.slane %v830_v59, %v3415_v36  ;;  %v845_v0 = vcombine.high %v837_v60, %v837_v60  ;;  %v875_v16 = vcombine.low %v814_v54, %v821_v57  ;;  %v876_v18 = vcombine.low %v822_v58, %v837_v60  ;;  %v667_v57 = vld [vmem:[%s3718_s4 + $0x30] sm:$0xff] }
 0x5a3   : > { %v867_v19 = vrot.slane %v853_v61, %v3415_v36  ;;  %v868_v27 = vcombine.high %v860_v62, %v860_v62  ;;  %v2568_v54 = vpack.c.bf16 %v668_v51, %v664_v50  ;;  %v2570_v58 = vpack.c.bf16 %v667_v57, %v663_v55  ;;  %2567 = vmatpush1.bf16.msra.mxu1 %v2566_v56  ;;  %v2316_v59 = vld [vmem:[#allocation10] ss:$0 sm:$0xff]  ;;  %v709_v50 = vld [vmem:[%s3719_s7 + $0xa8] sm:$0xff]  ;;  %v740_v51 = vld [vmem:[%s3719_s7 + $0x1a0] sm:$0xff] }
 0x5a4   : > { %v877_v21 = vcombine.low %v844_v63, %v845_v0  ;;  %v885_v23 = vrot.slane %v875_v16, %v3415_v36  ;;  %v892_v24 = vrot.slane %v876_v18, %v3415_v36  ;;  %v704_v18 = vld [vmem:[%s3719_s7 + $0x80] sm:$0xff]  ;;  %v693_v55 = vld [vmem:[%s3719_s7 + $0x28] sm:$0xff]  ;;  %v2612_v56 = vpack.c.bf16 %v741_v53, %v740_v51  ;;  %v698_v51 = vld [vmem:[%s3719_s7 + $0x50] sm:$0xff] }
 0x5a5   : > { %v878_v25 = vcombine.low %v860_v62, %v867_v19  ;;  %v930_v32 = vrot.slane %v868_v27, %v3415_v36  ;;  %v705_v19 = vld [vmem:[%s3719_s7 + $0x88] sm:$0xff] }
 0x5a6   : > { %v899_v26 = vrot.slane %v877_v21, %v3415_v36  ;;  %v907_v29 = vcombine.low %v885_v23, %v892_v24  ;;  %v736_v21 = vld [vmem:[%s3719_s7 + $0x180] sm:$0xff]  ;;  %v2572_v23 = vpack.c.bf16 %v705_v19, %v704_v18  ;;  %v737_v24 = vld [vmem:[%s3719_s7 + $0x188] sm:$0xff]  ;;  %v743_v19 = vld [vmem:[%s3719_s7 + $0x1b8] sm:$0xff] }
 0x5a7   : > { %v906_v28 = vrot.slane %v878_v25, %v3415_v36  ;;  %v937_v45 = vrot.slane %v930_v32, %v3415_v36  ;;  %v688_v25 = vld [vmem:[%s3719_s7] sm:$0xff]  ;;  %v2604_v27 = vpack.c.bf16 %v737_v24, %v736_v21  ;;  %v694_v21 = vld [vmem:[%s3719_s7 + $0x30] sm:$0xff] }
 0x5a8   : > { %v915_v37 = vrot.slane %v907_v29, %v3415_v36  ;;  %v720_v29 = vld [vmem:[%s3719_s7 + $0x100] sm:$0xff]  ;;  %2573 = vmatprep.subr.bf16.mxu1 %v2572_v23  ;;  %v695_v23 = vld [vmem:[%s3719_s7 + $0x38] sm:$0xff] }
 0x5a9   : > { %v908_v30 = vcombine.low %v899_v26, %v906_v28  ;;  %v689_v26 = vld [vmem:[%s3719_s7 + $0x8] sm:$0xff] }
 0x5aa   : > { %v2574_v28 = vpack.c.bf16 %v689_v26, %v688_v25  ;;  %v2586_v25 = vpack.c.bf16 %v695_v23, %v694_v21  ;;  %v726_v26 = vld [vmem:[%s3719_s7 + $0x130] sm:$0xff]  ;;  %v732_v23 = vld [vmem:[%s3719_s7 + $0x160] sm:$0xff] }
 0x5ab   : > { %v922_v39 = vrot.slane %v908_v30, %v3415_v36  ;;  %v721_v30 = vld [vmem:[%s3719_s7 + $0x108] sm:$0xff] }
 0x5ac   : > { %v2606_v32 = vpack.c.bf16 %v721_v30, %v720_v29  ;;  %v712_v29 = vld [vmem:[%s3719_s7 + $0xc0] sm:$0xff]  ;;  %v713_v30 = vld [vmem:[%s3719_s7 + $0xc8] sm:$0xff] }
 0x5ad   : > { %v923_v43 = vcombine.low %v915_v37, %v922_v39  ;;  %v738_v37 = vld [vmem:[%s3719_s7 + $0x190] sm:$0xff]  ;;  %v2576_v39 = vpack.c.bf16 %v707_v35, %v706_v33  ;;  %v2588_v33 = vpack.c.bf16 %v713_v30, %v712_v29  ;;  %v745_v35 = vld [vmem:[%s3719_s7 + $0x1c8] sm:$0xff]  ;;  %v751_v29 = vld [vmem:[%s3719_s7 + $0x1f8] sm:$0xff] }
 0x5af   : > { %2489 = vmatprep.mubr.msk.f32.mxu0 %vm306_vm3, %v923_v43  ;;  %v691_v43 = vld [vmem:[%s3719_s7 + $0x18] sm:$0xff] }
 0x5b0   : > { %2490 = vmatmul.mubr.msk.f32.vlgmr.msra.gmra.mrb[6].mxu0 %vm306_vm3, %v937_v45  ;;  %v2578_v45 = vpack.c.bf16 %v691_v43, %v690_v42  ;;  %v728_v43 = vld [vmem:[%s3719_s7 + $0x140] sm:$0xff] }
 0x5b1   : > { %2559 = vmatpush1.bf16.msra.mxu0 %v2558_v44  ;;  %1155 = vmatprep.mubr.f32.mxu0 %v3071_v20  ;;  %v2608_v44 = vpack.c.bf16 %v739_v40, %v738_v37  ;;  %v696_v37 = vld [vmem:[%s3719_s7 + $0x40] sm:$0xff] }
 0x5b2   : > { %2561 = vmatprep.subr.bf16.mxu0 %v2560_v46  ;;  %v722_v46 = vld [vmem:[%s3719_s7 + $0x110] sm:$0xff] }
 0x5b3   : > { %v2610_v48 = vpack.c.bf16 %v723_v47, %v722_v46  ;;  %v714_v46 = vld [vmem:[%s3719_s7 + $0xd0] sm:$0xff]  ;;  %v715_v47 = vld [vmem:[%s3719_s7 + $0xd8] sm:$0xff] }
 0x5b5   : > { %2563 = vmatpush1.bf16.msra.mxu0 %v2562_v49  ;;  %v708_v49 = vld [vmem:[%s3719_s7 + $0xa0] sm:$0xff] }
 0x5b6   : > { %2569 = vmatprep.subr.bf16.mxu0 %v2568_v54  ;;  %v2580_v52 = vpack.c.bf16 %v709_v50, %v708_v49  ;;  %v692_v54 = vld [vmem:[%s3719_s7 + $0x20] sm:$0xff]  ;;  %v2592_v49 = vpack.c.bf16 %v715_v47, %v714_v46  ;;  %v747_v50 = vld [vmem:[%s3719_s7 + $0x1d8] sm:$0xff]  ;;  %v1174_v47 = vrot.slane %v3411_v34, 2 }
 0x5b7   : > { %v2582_v57 = vpack.c.bf16 %v693_v55, %v692_v54  ;;  %v730_v55 = vld [vmem:[%s3719_s7 + $0x150] sm:$0xff] }
 0x5b8   : > { %2321 = vmatmul.mubr.msk.f32.vlgmr.msra.gmra.mrb[8].mxu0 %vm466_vm5, %v3393_v17 }
 0x5b9   : > { %1339 = vmatprep.mubr.f32.mxu0 %v3071_v20  ;;  %2571 = vmatpush1.bf16.msra.mxu0 %v2570_v58  ;;  %v724_v58 = vld [vmem:[%s3719_s7 + $0x120] sm:$0xff] }
 0x5ba   : > { %2605 = vmatprep.subr.bf16.mxu0 %v2604_v27  ;;  %v727_v27 = vld [vmem:[%s3719_s7 + $0x138] sm:$0xff] }
 0x683   : > { %v2491_v60 = vpop.f32.mrb[6].mxu0 }
 0x684   : > { %v1011_v61 = vpop.f32.mrb[7].mxu0  ;;  %v1017_v63 = vadd.f32 %v2491_v60, %v2316_v59 }
 0x685   : > { %v1012_v62 = vadd.f32 %v2316_v59, %v1011_v61  ;;  %v725_v59 = vld [vmem:[%s3719_s7 + $0x128] sm:$0xff]  ;;  %v710_v61 = vld [vmem:[%s3719_s7 + $0xb0] sm:$0xff] }
 0x686   : > { %v2614_v60 = vpack.c.bf16 %v725_v59, %v724_v58  ;;  %v716_v58 = vld [vmem:[%s3719_s7 + $0xe0] sm:$0xff]  ;;  %v717_v59 = vld [vmem:[%s3719_s7 + $0xe8] sm:$0xff] }
 0x687   : > { %2322 = vmatmul.mubr.msk.f32.vlgmr.msra.gmra.mrb[4].mxu1 %vm392_vm6, %v1012_v62  ;;  %2324 = vmatmul.mubr.msk.f32.vlgmr.msra.gmra.mrb[10].mxu0 %vm392_vm6, %v1012_v62  ;;  %v711_v62 = vld [vmem:[%s3719_s7 + $0xb8] sm:$0xff] }
 0x688   : > { %1268 = vmatprep.mubr.f32.mxu1 %v3071_v20  ;;  %1345 = vmatprep.mubr.f32.mxu0 %v3071_v20  ;;  %v2584_v18 = vpack.c.bf16 %v711_v62, %v710_v61  ;;  %v2596_v61 = vpack.c.bf16 %v717_v59, %v716_v58  ;;  %v749_v62 = vld [vmem:[%s3719_s7 + $0x1e8] sm:$0xff]  ;;  %v3555_v59 = vsub.s32 2, %v3407_v31 }
 0x689   : > { %2575 = vmatpush3.bf16.msra.mxu1 %v2574_v28  ;;  %2607 = vmatpush3.bf16.msra.mxu0 %v2606_v32  ;;  %v2618_v28 = vpack.c.bf16 %v727_v27, %v726_v26  ;;  %v744_v32 = vld [vmem:[%s3719_s7 + $0x1c0] sm:$0xff]  ;;  %v719_v27 = vld [vmem:[%s3719_s7 + $0xf8] sm:$0xff] }
 0x68a   : > { %2577 = vmatprep.subr.bf16.mxu1 %v2576_v39  ;;  %2609 = vmatprep.subr.bf16.mxu0 %v2608_v44  ;;  %v697_v39 = vld [vmem:[%s3719_s7 + $0x48] sm:$0xff]  ;;  %v2620_v40 = vpack.c.bf16 %v745_v35, %v744_v32  ;;  %v703_v35 = vld [vmem:[%s3719_s7 + $0x78] sm:$0xff] }
 0x68b   : > { %v3470_v0 = vpop.f32.mrb[8].mxu0  ;;  %2323 = vmatmul.mubr.msk.f32.gmra.mrb[6].mxu1 %vm392_vm6, %v1017_v63  ;;  %2325 = vmatmul.mubr.msk.f32.gmra.mrb[12].mxu0 %vm392_vm6, %v1017_v63  ;;  %v742_v63 = vld [vmem:[%s3719_s7 + $0x1b0] sm:$0xff]  ;;  %v2590_v42 = vpack.c.bf16 %v697_v39, %v696_v37  ;;  %v729_v44 = vld [vmem:[%s3719_s7 + $0x148] sm:$0xff] }
 0x68c   : > { %v3474_v16 = vpop.f32.mrb[9].mxu0  ;;  %v2616_v24 = vpack.c.bf16 %v743_v19, %v742_v63  ;;  %v700_v63 = vld [vmem:[%s3719_s7 + $0x60] sm:$0xff]  ;;  %v734_v37 = vld [vmem:[%s3719_s7 + $0x170] sm:$0xff] }
 0x68d   : > { %2579 = vmatpush3.bf16.msra.mxu1 %v2578_v45  ;;  %2611 = vmatpush3.bf16.msra.mxu0 %v2610_v48  ;;  %v2622_v45 = vpack.c.bf16 %v729_v44, %v728_v43  ;;  %v746_v48 = vld [vmem:[%s3719_s7 + $0x1d0] sm:$0xff]  ;;  %v1166_v43 = vrot.slane %v3411_v34, 5  ;;  %v1167_v44 = vrot.slane %v3417_v38, 5  ;;  %v1169_v46 = vrot.slane %v3474_v16, 5 }
 0x68e   : > { %2581 = vmatprep.subr.bf16.mxu1 %v2580_v52  ;;  %2613 = vmatprep.subr.bf16.mxu0 %v2612_v56  ;;  %v699_v52 = vld [vmem:[%s3719_s7 + $0x58] sm:$0xff]  ;;  %v2624_v53 = vpack.c.bf16 %v747_v50, %v746_v48  ;;  %v1176_v50 = vrot.slane %v3470_v0, 2 }
 0x68f   : > { %v2594_v54 = vpack.c.bf16 %v699_v52, %v698_v51  ;;  %v731_v56 = vld [vmem:[%s3719_s7 + $0x158] sm:$0xff]  ;;  %v1183_v48 = vsel %vm1182_vm7, %v3411_v34, %v1166_v43  ;;  %v1177_v51 = vrot.slane %v3474_v16, 2  ;;  %v1184_v52 = vsel %vm1182_vm7, %v3417_v38, %v1167_v44 }
 0x691   : > { %2583 = vmatpush3.bf16.msra.mxu1 %v2582_v57  ;;  %2615 = vmatpush3.bf16.msra.mxu0 %v2614_v60  ;;  %v2626_v57 = vpack.c.bf16 %v731_v56, %v730_v55  ;;  %v748_v60 = vld [vmem:[%s3719_s7 + $0x1e0] sm:$0xff]  ;;  %v1188_v55 = vsel %vm1187_vm8, %v1183_v48, %v1174_v47 }
 0x692   : > { %2585 = vmatprep.subr.bf16.mxu1 %v2584_v18  ;;  %2617 = vmatprep.subr.bf16.mxu0 %v2616_v24  ;;  %v701_v18 = vld [vmem:[%s3719_s7 + $0x68] sm:$0xff]  ;;  %v2628_v19 = vpack.c.bf16 %v749_v62, %v748_v60 }
 0x693   : > { %v2598_v21 = vpack.c.bf16 %v701_v18, %v700_v63  ;;  %v733_v24 = vld [vmem:[%s3719_s7 + $0x168] sm:$0xff] }
 0x694   : > { %v2630_v26 = vpack.c.bf16 %v733_v24, %v732_v23 }
 0x695   : > { %2587 = vmatpush3.bf16.msra.mxu1 %v2586_v25  ;;  %2619 = vmatpush3.bf16.msra.mxu0 %v2618_v28  ;;  %v718_v25 = vld [vmem:[%s3719_s7 + $0xf0] sm:$0xff] }
 0x696   : > { %2589 = vmatprep.subr.bf16.mxu1 %v2588_v33  ;;  %2621 = vmatprep.subr.bf16.mxu0 %v2620_v40  ;;  %v750_v28 = vld [vmem:[%s3719_s7 + $0x1f0] sm:$0xff]  ;;  %v2600_v30 = vpack.c.bf16 %v719_v27, %v718_v25  ;;  %v735_v40 = vld [vmem:[%s3719_s7 + $0x178] sm:$0xff] }
 0x697   : > { %v2632_v32 = vpack.c.bf16 %v751_v29, %v750_v28  ;;  %v702_v33 = vld [vmem:[%s3719_s7 + $0x70] sm:$0xff] }
 0x698   : > { %v2602_v39 = vpack.c.bf16 %v703_v35, %v702_v33 }
 0x699   : > { %2591 = vmatpush3.bf16.msra.mxu1 %v2590_v42  ;;  %2623 = vmatpush3.bf16.msra.mxu0 %v2622_v45  ;;  %v2634_v42 = vpack.c.bf16 %v735_v40, %v734_v37  ;;  %v1168_v45 = vrot.slane %v3470_v0, 5 }
 0x69a   : > { %2593 = vmatprep.subr.bf16.mxu1 %v2592_v49  ;;  %2625 = vmatprep.subr.bf16.mxu0 %v2624_v53  ;;  %v1175_v49 = vrot.slane %v3417_v38, 2 }
 0x69b   : > { %v1185_v53 = vsel %vm1182_vm7, %v3470_v0, %v1168_v45  ;;  %v3562_v0 = vsub.s32 3, %v3407_v31 }
 0x69c   : > { %v1189_v34 = vsel %vm1187_vm8, %v1184_v52, %v1175_v49 }
 0x69d   : > { %2595 = vmatpush3.bf16.msra.mxu1 %v2594_v54  ;;  %2627 = vmatpush3.bf16.msra.mxu0 %v2626_v57  ;;  %v1186_v54 = vsel %vm1182_vm7, %v3474_v16, %v1169_v46  ;;  %v1190_v57 = vsel %vm1187_vm8, %v1185_v53, %v1176_v50 }
 0x69e   : > { %2597 = vmatprep.subr.bf16.mxu1 %v2596_v61  ;;  %2629 = vmatprep.subr.bf16.mxu0 %v2628_v19  ;;  %v1191_v60 = vsel %vm1187_vm8, %v1186_v54, %v1177_v51  ;;  %v685_v61 = vld [vmem:[%s3720_s10] sm:$0xf]  ;;  %v3559_v19 = vsub.s32 1, %v3407_v31 }
 0x69f   : > { %v1356_v23 = vrot.slane %v685_v61, %v3423_v41  ;;  %v1364_v24 = vrot.slane %v685_v61, %v3555_v59  ;;  %v1368_v28 = vrot.slane %v685_v61, %v3562_v0 }
 0x6a0   : > { %v1360_v27 = vrot.slane %v685_v61, %v3559_v19 }
 0x6a1   : > { %2599 = vmatpush3.bf16.msra.mxu1 %v2598_v21  ;;  %2631 = vmatpush3.bf16.msra.mxu0 %v2630_v26 }
 0x6a2   : > { %2601 = vmatprep.subr.bf16.mxu1 %v2600_v30  ;;  %2633 = vmatprep.subr.bf16.mxu0 %v2632_v32 }
 0x6a5   : > { %2603 = vmatpush3.bf16.msra.mxu1 %v2602_v39  ;;  %2635 = vmatpush3.bf16.msra.mxu0 %v2634_v42 }
 0x6a6   : > { %2636 = vmatprep.subr.bf16.mxu1 %v3073_v22  ;;  %2642 = vmatprep.subr.bf16.mxu0 %v3073_v22 }
 0x75a   : > { %v1264_v56 = vpop.f32.mrb[4].mxu1  ;;  %v1341_v58 = vpop.f32.mrb[10].mxu0 }
 0x75b   : > { %v1265_v62 = vadd.f32 %v1264_v56, %v1188_v55  ;;  %v1342_v63 = vadd.f32 %v1341_v58, %v1190_v57  ;;  %v1266_v18 = vpop.f32.mrb[5].mxu1  ;;  %v1343_v38 = vpop.f32.mrb[11].mxu0 }
 0x75c   : > { %v1267_v16 = vadd.f32 %v1266_v18, %v1189_v34  ;;  %v1344_v21 = vadd.f32 %v1343_v38, %v1191_v60 }
 0x75d   : > { %v1373_v40 = vadd.f32 %v1356_v23, %v1265_v62  ;;  %v1375_v42 = vadd.f32 %v1364_v24, %v1342_v63 }
 0x75e   : > { %v1270_v25 = vpop.f32.mrb[6].mxu1  ;;  %v1347_v26 = vpop.f32.mrb[12].mxu0  ;;  %v1374_v45 = vadd.f32 %v1360_v27, %v1267_v16  ;;  %v1376_v46 = vadd.f32 %v1368_v28, %v1344_v21 }
 0x75f   : > { %v1271_v29 = vadd.f32 %v1270_v25, %v1174_v47  ;;  %v1348_v30 = vadd.f32 %v1347_v26, %v1176_v50  ;;  %v1272_v32 = vpop.f32.mrb[7].mxu1  ;;  %v1349_v33 = vpop.f32.mrb[13].mxu0 }
 0x760   : > { %v1273_v35 = vadd.f32 %v1272_v32, %v1175_v49  ;;  %v1350_v31 = vadd.f32 %v1349_v33, %v1177_v51 }
 0x761   : > { %v1377_v37 = vadd.f32 %v1356_v23, %v1271_v29  ;;  %v1379_v39 = vadd.f32 %v1364_v24, %v1348_v30 }
 0x762   : > { %v1378_v43 = vadd.f32 %v1360_v27, %v1273_v35  ;;  %v1380_v44 = vadd.f32 %v1368_v28, %v1350_v31 }
 0x763   : > { %v1382_v48 = vsel %vm1381_vm9, %v1377_v37, 0.0  ;;  %v1398_v52 = vsel %vm1381_vm9, %v1379_v39, 0.0 }
 0x764   : > { %v1383_v53 = vadd.f32 %v1382_v48, %v1373_v40  ;;  %v1399_v47 = vadd.f32 %v1398_v52, %v1375_v42  ;;  %v1390_v50 = vsel %vm1381_vm9, %v1378_v43, 0.0  ;;  %v1406_v54 = vsel %vm1381_vm9, %v1380_v44, 0.0 }
 0x765   : > { %v1391_v49 = vadd.f32 %v1390_v50, %v1374_v45  ;;  %v1407_v51 = vadd.f32 %v1406_v54, %v1376_v46 }
 0x766   : > { %v1384_v55 = vrot.slane %v1383_v53, 4  ;;  %v1400_v56 = vrot.slane %v1399_v47, 4 }
 0x767   : > { %v1392_v57 = vrot.slane %v1391_v49, 4  ;;  %v1408_v58 = vrot.slane %v1407_v51, 4 }
 0x768   : > { %v1385_v34 = vadd.f32 %v1384_v55, %v1383_v53  ;;  %v1401_v60 = vadd.f32 %v1400_v56, %v1399_v47 }
 0x769   : > { %v1393_v61 = vadd.f32 %v1392_v57, %v1391_v49  ;;  %v1409_v62 = vadd.f32 %v1408_v58, %v1407_v51 }
 0x76a   : > { %v1386_v63 = vrot.slane %v1385_v34, 2  ;;  %v1402_v18 = vrot.slane %v1401_v60, 2 }
 0x76b   : > { %v1394_v38 = vrot.slane %v1393_v61, 2  ;;  %v1410_v16 = vrot.slane %v1409_v62, 2 }
 0x76c   : > { %v1387_v21 = vadd.f32 %v1386_v63, %v1385_v34  ;;  %v1403_v23 = vadd.f32 %v1402_v18, %v1401_v60 }
 0x76d   : > { %v1395_v24 = vadd.f32 %v1394_v38, %v1393_v61  ;;  %v1411_v25 = vadd.f32 %v1410_v16, %v1409_v62 }
 0x76e   : > { %v1388_v26 = vrot.slane %v1387_v21, 1  ;;  %v1404_v27 = vrot.slane %v1403_v23, 1 }
 0x76f   : > { %v1396_v28 = vrot.slane %v1395_v24, 1  ;;  %v1412_v29 = vrot.slane %v1411_v25, 1 }
 0x770   : > { %v1389_v30 = vadd.f32 %v1388_v26, %v1387_v21  ;;  %v1405_v32 = vadd.f32 %v1404_v27, %v1403_v23 }
 0x771   : > { %v1397_v33 = vadd.f32 %v1396_v28, %v1395_v24  ;;  %v1413_v35 = vadd.f32 %v1412_v29, %v1411_v25 }
 0x772   : > { %v1415_v31 = vmul.f32 0.11111111, %v1389_v30  ;;  %v1417_v48 = vmul.f32 0.11111111, %v1405_v32 }
 0x773   : > { %v1416_v52 = vmul.f32 0.11111111, %v1397_v33  ;;  %v1418_v53 = vmul.f32 0.11111111, %v1413_v35 }
 0x774   : > { %v3572_v47 = vsub.f32 %v1373_v40, %v1415_v31  ;;  %v3574_v50 = vsub.f32 %v1377_v37, %v1415_v31  ;;  %v3576_v54 = vsub.f32 %v1375_v42, %v1417_v48  ;;  %v3578_v49 = vsub.f32 %v1379_v39, %v1417_v48 }
 0x775   : > { %v3580_v51 = vsub.f32 %v1374_v45, %v1416_v52  ;;  %v3582_v55 = vsub.f32 %v1378_v43, %v1416_v52  ;;  %v3584_v56 = vsub.f32 %v1376_v46, %v1418_v53  ;;  %v3586_v57 = vsub.f32 %v1380_v44, %v1418_v53 }
 0x776   : > { %v1427_v58 = vmul.f32 %v3572_v47, %v3572_v47  ;;  %v1431_v40 = vmul.f32 %v3574_v50, %v3574_v50  ;;  %v1429_v37 = vmul.f32 %v3576_v54, %v3576_v54  ;;  %v1433_v39 = vmul.f32 %v3578_v49, %v3578_v49 }
 0x777   : > { %v1428_v42 = vmul.f32 %v3580_v51, %v3580_v51  ;;  %v1432_v43 = vmul.f32 %v3582_v55, %v3582_v55  ;;  %v1430_v44 = vmul.f32 %v3584_v56, %v3584_v56  ;;  %v1434_v45 = vmul.f32 %v3586_v57, %v3586_v57 }
 0x778   : > { %v1435_v46 = vsel %vm1381_vm9, %v1431_v40, 0.0  ;;  %v1451_v34 = vsel %vm1381_vm9, %v1433_v39, 0.0 }
 0x779   : > { %v1436_v60 = vadd.f32 %v1435_v46, %v1427_v58  ;;  %v1452_v61 = vadd.f32 %v1451_v34, %v1429_v37  ;;  %v1443_v62 = vsel %vm1381_vm9, %v1432_v43, 0.0  ;;  %v1459_v63 = vsel %vm1381_vm9, %v1434_v45, 0.0 }
 0x77a   : > { %v1444_v18 = vadd.f32 %v1443_v62, %v1428_v42  ;;  %v1460_v38 = vadd.f32 %v1459_v63, %v1430_v44 }
 0x77b   : > { %v1437_v16 = vrot.slane %v1436_v60, 4  ;;  %v1453_v21 = vrot.slane %v1452_v61, 4 }
 0x77c   : > { %v1445_v23 = vrot.slane %v1444_v18, 4  ;;  %v1461_v24 = vrot.slane %v1460_v38, 4 }
 0x77d   : > { %v1438_v25 = vadd.f32 %v1437_v16, %v1436_v60  ;;  %v1454_v26 = vadd.f32 %v1453_v21, %v1452_v61  ;;  %v687_v21 = vld [vmem:[%s3722_s15] sm:$0xf] }
 0x77e   : > { %v1446_v27 = vadd.f32 %v1445_v23, %v1444_v18  ;;  %v1462_v28 = vadd.f32 %v1461_v24, %v1460_v38  ;;  %v686_v38 = vld [vmem:[%s3721_s11] sm:$0xf] }
 0x77f   : > { %v1439_v29 = vrot.slane %v1438_v25, 2  ;;  %v1455_v30 = vrot.slane %v1454_v26, 2  ;;  %v1491_v16 = vrot.slane %v686_v38, %v3423_v41  ;;  %v1499_v24 = vrot.slane %v686_v38, %v3555_v59 }
 0x780   : > { %v1447_v32 = vrot.slane %v1446_v27, 2  ;;  %v1463_v33 = vrot.slane %v1462_v28, 2 }
 0x781   : > { %v1440_v35 = vadd.f32 %v1439_v29, %v1438_v25  ;;  %v1456_v31 = vadd.f32 %v1455_v30, %v1454_v26  ;;  %v1503_v29 = vrot.slane %v686_v38, %v3562_v0 }
 0x782   : > { %v1448_v48 = vadd.f32 %v1447_v32, %v1446_v27  ;;  %v1464_v52 = vadd.f32 %v1463_v33, %v1462_v28  ;;  %v1495_v28 = vrot.slane %v686_v38, %v3559_v19 }
 0x783   : > { %v1441_v53 = vrot.slane %v1440_v35, 1  ;;  %v1457_v58 = vrot.slane %v1456_v31, 1 }
 0x784   : > { %v1449_v40 = vrot.slane %v1448_v48, 1  ;;  %v1465_v37 = vrot.slane %v1464_v52, 1 }
 0x785   : > { %v1442_v39 = vadd.f32 %v1441_v53, %v1440_v35  ;;  %v1458_v42 = vadd.f32 %v1457_v58, %v1456_v31  ;;  %v1524_v35 = vrot.slane %v687_v21, %v3559_v19  ;;  %v1520_v31 = vrot.slane %v687_v21, %v3423_v41 }
 0x786   : > { %v1450_v43 = vadd.f32 %v1449_v40, %v1448_v48  ;;  %v1466_v44 = vadd.f32 %v1465_v37, %v1464_v52 }
 0x787   : > { %v1467_v45 = vmul.f32 0.11111111, %v1442_v39  ;;  %v1469_v46 = vmul.f32 0.11111111, %v1458_v42 }
 0x788   : > { %v1468_v34 = vmul.f32 0.11111111, %v1450_v43  ;;  %v1470_v60 = vmul.f32 0.11111111, %v1466_v44 }
 0x789   : > { %v1471_v61 = vadd.f32 1e-05, %v1467_v45  ;;  %v1473_v62 = vadd.f32 1e-05, %v1469_v46  ;;  %v1914_v45 = vld [vmem:[%s3723_s27] sm:$0xff] }
 0x78a   : > { %v1472_v63 = vadd.f32 1e-05, %v1468_v34  ;;  %v1474_v18 = vadd.f32 1e-05, %v1470_v60 }
 0x78b   : > { %2727 = vrsqrt.f32 %v1471_v61 }
 0x78c   : > { %2729 = vrsqrt.f32 %v1473_v62 }
 0x78d   : > { %2731 = vrsqrt.f32 %v1472_v63 }
 0x78e   : > { %2733 = vrsqrt.f32 %v1474_v18 }
 0x795   : > { %v2728_v23 = vpop.eup %2727 }
 0x796   : > { %v2730_v25 = vpop.eup %2729  ;;  %v1479_v26 = vmul.f32 %v2728_v23, %v3572_v47  ;;  %v1483_v27 = vmul.f32 %v2728_v23, %v3574_v50  ;;  %v1528_v50 = vrot.slane %v687_v21, %v3555_v59  ;;  %v1915_v59 = vld [vmem:[%s3723_s27 + $0x8] sm:$0xff] }
 0x797   : > { %v2732_v30 = vpop.eup %2731  ;;  %v1481_v32 = vmul.f32 %v2730_v25, %v3576_v54  ;;  %v1485_v33 = vmul.f32 %v2730_v25, %v3578_v49  ;;  %v1532_v49 = vrot.slane %v687_v21, %v3562_v0  ;;  %v2643_v0 = vpack.c.bf16 %v1915_v59, %v1914_v45  ;;  %v1917_v21 = vld [vmem:[%s3723_s27 + $0x18] sm:$0xff] }
 0x798   : > { %v2734_v48 = vpop.eup %2733  ;;  %v1508_v52 = vmul.f32 %v1491_v16, %v1479_v26  ;;  %v1484_v53 = vmul.f32 %v2732_v30, %v3582_v55  ;;  %v1480_v47 = vmul.f32 %v2732_v30, %v3580_v51  ;;  %v1512_v43 = vmul.f32 %v1491_v16, %v1483_v27  ;;  %v1916_v16 = vld [vmem:[%s3723_s27 + $0x10] sm:$0xff]  ;;  %v1918_v27 = vld [vmem:[%s3724_s9] sm:$0xff] }
 0x799   : > { %v1510_v58 = vmul.f32 %v1499_v24, %v1481_v32  ;;  %v1486_v40 = vmul.f32 %v2734_v48, %v3586_v57  ;;  %v1482_v54 = vmul.f32 %v2734_v48, %v3584_v56  ;;  %v1514_v46 = vmul.f32 %v1499_v24, %v1485_v33  ;;  %v1921_v32 = vld [vmem:[%s3724_s9 + $0x18] sm:$0xff]  ;;  %v2326_v48 = vld [vmem:[#allocation11] ss:$0 sm:$0xff] }
 0x79a   : > { %v1509_v19 = vmul.f32 %v1495_v28, %v1480_v47  ;;  %v1513_v37 = vmul.f32 %v1495_v28, %v1484_v53  ;;  %v1537_v39 = vadd.f32 %v1520_v31, %v1508_v52  ;;  %v1541_v62 = vadd.f32 %v1520_v31, %v1512_v43  ;;  %v1919_v28 = vld [vmem:[%s3724_s9 + $0x8] sm:$0xff] }
 0x79b   : > { %v1511_v41 = vmul.f32 %v1503_v29, %v1482_v54  ;;  %v1515_v42 = vmul.f32 %v1503_v29, %v1486_v40  ;;  %v1539_v44 = vadd.f32 %v1528_v50, %v1510_v58  ;;  %v1543_v38 = vadd.f32 %v1528_v50, %v1514_v46  ;;  %v1920_v29 = vld [vmem:[%s3724_s9 + $0x10] sm:$0xff] }
 0x79c   : > { %v1538_v55 = vadd.f32 %v1524_v35, %v1509_v19  ;;  %v1542_v51 = vadd.f32 %v1524_v35, %v1513_v37  ;;  %v1545_v61 = vmax.f32 %v1537_v39, 0.0  ;;  %v1549_v24 = vmax.f32 %v1541_v62, 0.0 }
 0x79d   : > { %v1540_v34 = vadd.f32 %v1532_v49, %v1511_v41  ;;  %v1544_v57 = vadd.f32 %v1532_v49, %v1515_v42  ;;  %v1547_v63 = vmax.f32 %v1539_v44, 0.0  ;;  %v2646_v25 = vpack.c.bf16 %v1917_v21, %v1916_v16 }
 0x79e   : > { %v1546_v60 = vmax.f32 %v1538_v55, 0.0  ;;  %v1550_v18 = vmax.f32 %v1542_v51, 0.0  ;;  %v1551_v26 = vmax.f32 %v1543_v38, 0.0  ;;  %v2637_v30 = vpack.c.bf16 %v1919_v28, %v1918_v27 }
 0x79f   : > { %v1548_v56 = vmax.f32 %v1540_v34, 0.0  ;;  %v1552_v23 = vmax.f32 %v1544_v57, 0.0  ;;  %v2640_v33 = vpack.c.bf16 %v1921_v32, %v1920_v29 }
 0x7a0   : > { %1623 = vmatprep.mubr.f32.mxu1 %v1546_v60 }
 0x7a1   : > { %1698 = vmatprep.mubr.f32.mxu0 %v1548_v56  ;;  %1624 = vmatmul.mubr.f32.vlgmr.msra.gmra.mrb[8].mxu1 %v1545_v61 }
 0x7a2   : > { %1699 = vmatmul.mubr.f32.vlgmr.msra.gmra.mrb[14].mxu0 %v1547_v63  ;;  %1628 = vmatprep.mubr.f32.mxu1 %v1550_v18 }
 0x7a3   : > { %1703 = vmatprep.mubr.f32.mxu0 %v1552_v23  ;;  %2644 = vmatpush3.bf16.msra.mxu0 %v2643_v0 }
 0x7a4   : > { %2645 = vmatprep.subr.bf16.mxu0 %v3073_v22  ;;  %2638 = vmatpush3.bf16.msra.mxu1 %v2637_v30 }
 0x7a5   : > { %1629 = vmatmul.mubr.f32.gmra.mrb[10].mxu1 %v1549_v24  ;;  %2639 = vmatprep.subr.bf16.mxu1 %v3073_v22 }
 0x7a6   : > { %1704 = vmatmul.mubr.f32.gmra.mrb[16].mxu0 %v1551_v26  ;;  %2500 = vmatprep.mubr.msk.f32.mxu1 %vm3072_vm4, %v3071_v20 }
 0x7a7   : > { %2647 = vmatpush3.bf16.msra.mxu0 %v2646_v25  ;;  %2511 = vmatprep.mubr.msk.f32.mxu0 %vm3072_vm4, %v3071_v20 }
 0x7a8   : > { %2641 = vmatpush3.bf16.msra.mxu1 %v2640_v33  ;;  %v2327_v33 = vld [vmem:[#allocation13] ss:$0 sm:$0xff] }
 0x7a9   : > { %2648 = vmatprep.subr.bf16.mxu1 %v3073_v22 }
 0x7aa   : > { %2512 = vmatmul.mubr.msk.f32.vlgmr.msra.gmra.mrb[18].mxu0 %vm466_vm5, %v3393_v17 }
 0x874   : > { %v2390_v35 = vpop.f32.mrb[8].mxu1 }
 0x875   : > { %v2428_v31 = vpop.f32.mrb[14].mxu0  ;;  %v2391_v52 = vpop.f32.mrb[9].mxu1 }
 0x876   : > { %v2392_v53 = vadd.f32 %v2391_v52, %v2390_v35  ;;  %v2429_v47 = vpop.f32.mrb[15].mxu0 }
 0x877   : > { %v2430_v50 = vadd.f32 %v2429_v47, %v2428_v31 }
 0x878   : > { %v1626_v17 = vadd.f32 %v2392_v53, %v2326_v48  ;;  %v2393_v58 = vpop.f32.mrb[10].mxu1 }
 0x879   : > { %v2431_v40 = vpop.f32.mrb[16].mxu0  ;;  %v2394_v54 = vpop.f32.mrb[11].mxu1 }
 0x87a   : > { %v1701_v49 = vadd.f32 %v2430_v50, %v1626_v17  ;;  %v2395_v19 = vadd.f32 %v2394_v54, %v2393_v58  ;;  %v2432_v37 = vpop.f32.mrb[17].mxu0 }
 0x87b   : > { %v2433_v41 = vadd.f32 %v2432_v37, %v2431_v40 }
 0x87c   : > { %v1631_v39 = vadd.f32 %v2395_v19, %v2326_v48  ;;  %v1709_v44 = vsel %vm466_vm5, %v1701_v49, 0.0  ;;  %v2328_v48 = vld [vmem:[#allocation14] ss:$0 sm:$0xff] }
 0x87d   : > { %v3643_v42 = vpop.f32.mrb[18].mxu0 }
 0x87e   : > { %v1706_v43 = vadd.f32 %v2433_v41, %v1631_v39  ;;  %v2513_v55 = vpop.f32.mrb[19].mxu0 }
 0x880   : > { %v1711_v51 = vsel %vm1710_vm10, %v1706_v43, 0.0 }
 0x881   : > { %v1712_v45 = vadd.f32 %v1711_v51, %v1709_v44 }
 0x883   : > { %v1713_v59 = vrot.slane %v1712_v45, 4 }
 0x885   : > { %v1714_v46 = vadd.f32 %v1713_v59, %v1712_v45 }
 0x887   : > { %v1715_v34 = vrot.slane %v1714_v46, 2 }
 0x889   : > { %v1716_v57 = vadd.f32 %v1715_v34, %v1714_v46 }
 0x88b   : > { %v1717_v60 = vrot.slane %v1716_v57, 1 }
 0x88d   : > { %v1718_v56 = vadd.f32 %v1717_v60, %v1716_v57 }
 0x88f   : > { %v1719_v61 = vmul.f32 0.11111111, %v1718_v56 }
 0x891   : > { %v1720_v0 = vsub.f32 %v1701_v49, %v1719_v61  ;;  %v1721_v62 = vsub.f32 %v1706_v43, %v1719_v61 }
 0x893   : > { %v1722_v63 = vmul.f32 %v1720_v0, %v1720_v0  ;;  %v1723_v18 = vmul.f32 %v1721_v62, %v1721_v62 }
 0x895   : > { %v1724_v38 = vsel %vm466_vm5, %v1722_v63, 0.0  ;;  %v1725_v16 = vsel %vm1710_vm10, %v1723_v18, 0.0 }
 0x896   : > { %v1726_v21 = vadd.f32 %v1725_v16, %v1724_v38 }
 0x898   : > { %v1727_v23 = vrot.slane %v1726_v21, 4 }
 0x89a   : > { %v1728_v24 = vadd.f32 %v1727_v23, %v1726_v21 }
 0x89c   : > { %v1729_v25 = vrot.slane %v1728_v24, 2 }
 0x89e   : > { %v1730_v26 = vadd.f32 %v1729_v25, %v1728_v24 }
 0x8a0   : > { %v1731_v27 = vrot.slane %v1730_v26, 1 }
 0x8a2   : > { %v1732_v28 = vadd.f32 %v1731_v27, %v1730_v26 }
 0x8a4   : > { %v1733_v29 = vmul.f32 0.11111111, %v1732_v28 }
 0x8a6   : > { %v1734_v30 = vadd.f32 1e-05, %v1733_v29 }
 0x8a8   : > { %2735 = vrsqrt.f32 %v1734_v30 }
 0x8b2   : > { %v2736_v32 = vpop.eup %2735 }
 0x8b3   : > { %v1736_v35 = vmul.f32 %v2736_v32, %v1720_v0  ;;  %v1737_v31 = vmul.f32 %v2736_v32, %v1721_v62 }
 0x8b5   : > { %v1744_v52 = vmul.f32 %v2327_v33, %v1736_v35  ;;  %v1745_v53 = vmul.f32 %v2327_v33, %v1737_v31 }
 0x8b7   : > { %v1752_v47 = vadd.f32 %v2328_v48, %v1744_v52  ;;  %v1753_v50 = vadd.f32 %v2328_v48, %v1745_v53 }
 0x8b9   : > { %v1754_v17 = vmax.f32 %v1752_v47, 0.0  ;;  %v1755_v58 = vmax.f32 %v1753_v50, 0.0 }
 0x8bb   : > { %v1758_v40 = vcombine.high %v1754_v17, %v1754_v17  ;;  %v1765_v54 = vrot.slane %v1754_v17, %v3415_v36  ;;  %v1813_v49 = vrot.slane %v1755_v58, %v3415_v36 }
 0x8bd   : > { %v1772_v19 = vrot.slane %v1758_v40, %v3415_v36  ;;  %v1773_v37 = vcombine.high %v1765_v54, %v1765_v54  ;;  %v1781_v41 = vrot.slane %v1765_v54, %v3415_v36  ;;  %v1820_v44 = vrot.slane %v1813_v49, %v3415_v36 }
 0x8bf   : > { %v1774_v39 = vcombine.high %v1772_v19, %v1772_v19  ;;  %v1795_v43 = vrot.slane %v1773_v37, %v3415_v36  ;;  %v1803_v55 = vcombine.high %v1781_v41, %v1781_v41  ;;  %v1788_v51 = vrot.slane %v1772_v19, %v3415_v36 }
 0x8c0   : > { %v1881_v61 = vrot.slane %v1820_v44, %v3415_v36  ;;  %v1928_v44 = vld [vmem:[%s3725_s19 + $0x18] sm:$0xff] }
 0x8c1   : > { %v1802_v45 = vrot.slane %v1774_v39, %v3415_v36  ;;  %v1805_v59 = vcombine.high %v1795_v43, %v1795_v43  ;;  %v1821_v46 = vcombine.low %v1781_v41, %v1795_v43  ;;  %v1835_v57 = vrot.slane %v1803_v55, %v3415_v36  ;;  %v1925_v41 = vld [vmem:[%s3725_s19] sm:$0xff]  ;;  %v1926_v39 = vld [vmem:[%s3725_s19 + $0x8] sm:$0xff]  ;;  %v1927_v55 = vld [vmem:[%s3725_s19 + $0x10] sm:$0xff] }
 0x8c2   : > { %v2649_v43 = vpack.c.bf16 %v1926_v39, %v1925_v41 }
 0x8c3   : > { %v1828_v34 = vrot.slane %v1821_v46, %v3415_v36  ;;  %v1844_v60 = vcombine.low %v1805_v59, %v1788_v51  ;;  %v2329_v56 = vcombine.high %v1788_v51, %v1802_v45  ;;  %v1858_v62 = vrot.slane %v1802_v45, %v3415_v36  ;;  %v1929_v45 = vld [vmem:[%s3725_s19 + $0x20] sm:$0xff]  ;;  %v1930_v59 = vld [vmem:[%s3725_s19 + $0x28] sm:$0xff] }
 0x8c4   : > { %v2652_v51 = vpack.c.bf16 %v1928_v44, %v1927_v55  ;;  %v2655_v46 = vpack.c.bf16 %v1930_v59, %v1929_v45 }
 0x8c5   : > { %v1851_v0 = vrot.slane %v1844_v60, %v3415_v36  ;;  %v1874_v63 = vrot.slane %v2329_v56, %v3415_v36  ;;  %v1836_v18 = vcombine.low %v1828_v34, %v1835_v57  ;;  %v1932_v34 = vld [vmem:[%s3725_s19 + $0x38] sm:$0xff] }
 0x8c6   : > { %v2332_v60 = vld [vmem:[#allocation16] ss:$0 sm:$0xff] }
 0x8c7   : > { %v1882_v38 = vcombine.low %v1874_v63, %v1881_v61  ;;  %v1843_v16 = vrot.slane %v1836_v18, %v3415_v36  ;;  %v1859_v21 = vcombine.low %v1851_v0, %v1858_v62 }
 0x8c9   : > { %v1866_v23 = vrot.slane %v1859_v21, %v3415_v36  ;;  %v1889_v24 = vrot.slane %v1882_v38, %v3415_v36  ;;  %v1893_v25 = vsel %vm285_vm0, %v1843_v16, -inf }
 0x8ca   : > { %v1894_v26 = vrot.slane %v1893_v25, 4 }
 0x8cb   : > { %v1900_v27 = vsel %vm285_vm0, %v1866_v23, -inf  ;;  %v1907_v28 = vsel %vm285_vm0, %v1889_v24, -inf }
 0x8cc   : > { %v1895_v29 = vmax.f32 %v1893_v25, %v1894_v26  ;;  %v1901_v30 = vrot.slane %v1900_v27, 4  ;;  %v1908_v32 = vrot.slane %v1907_v28, 4 }
 0x8ce   : > { %v1896_v33 = vrot.slane %v1895_v29, 2  ;;  %v1902_v35 = vmax.f32 %v1900_v27, %v1901_v30  ;;  %v1909_v31 = vmax.f32 %v1907_v28, %v1908_v32 }
 0x8d0   : > { %v1897_v48 = vmax.f32 %v1895_v29, %v1896_v33  ;;  %v1903_v52 = vrot.slane %v1902_v35, 2  ;;  %v1910_v53 = vrot.slane %v1909_v31, 2 }
 0x8d2   : > { %v1898_v47 = vrot.slane %v1897_v48, 1  ;;  %v1904_v36 = vmax.f32 %v1902_v35, %v1903_v52  ;;  %v1911_v50 = vmax.f32 %v1909_v31, %v1910_v53  ;;  %v2333_v52 = vld [vmem:[#allocation17] ss:$0 sm:$0xff] }
 0x8d4   : > { %v1905_v17 = vrot.slane %v1904_v36, 1  ;;  %v1912_v58 = vrot.slane %v1911_v50, 1  ;;  %v1899_v40 = vmax.f32 %v1897_v48, %v1898_v47  ;;  %v2334_v47 = vld [vmem:[#allocation19] ss:$0 sm:$0xff] }
 0x8d6   : > { %v1906_v54 = vmax.f32 %v1904_v36, %v1905_v17  ;;  %v1913_v49 = vmax.f32 %v1911_v50, %v1912_v58  ;;  %v2335_v58 = vld [vmem:[#allocation20] ss:$0 sm:$0xff] }
 0x8d8   : > { %v1940_v19 = vsel %vm1939_vm11, %v1906_v54, %v1899_v40 }
 0x8d9   : > { %v1942_v37 = vsel %vm1941_vm12, %v1913_v49, %v1940_v19 }
 0x8da   : > { %2501 = vmatmul.mubr.msk.f32.vlgmr.msra.gmra.mrb[12].mxu1 %vm466_vm5, %v1942_v37 }
 0x8db   : > { %2530 = vmatprep.mubr.msk.f32.mxu1 %vm3072_vm4, %v3071_v20  ;;  %2650 = vmatpush3.bf16.msra.mxu1 %v2649_v43  ;;  %v1931_v20 = vld [vmem:[%s3725_s19 + $0x30] sm:$0xff] }
 0x8dc   : > { %2651 = vmatprep.subr.bf16.mxu1 %v3073_v22  ;;  %v2658_v57 = vpack.c.bf16 %v1932_v34, %v1931_v20 }
 0x8df   : > { %2653 = vmatpush3.bf16.msra.mxu1 %v2652_v51 }
 0x8e0   : > { %2654 = vmatprep.subr.bf16.mxu1 %v3073_v22 }
 0x8e3   : > { %2656 = vmatpush3.bf16.msra.mxu1 %v2655_v46 }
 0x8e4   : > { %2657 = vmatprep.subr.bf16.mxu1 %v3073_v22 }
 0x8e7   : > { %2659 = vmatpush3.bf16.msra.mxu1 %v2658_v57 }
 0x9ad   : > { %v2011_v56 = vpop.f32.mrb[12].mxu1 }
 0x9ae   : > { %v2082_v61 = vadd.f32 %v3643_v42, %v2011_v56  ;;  %v2502_v0 = vpop.f32.mrb[13].mxu1 }
 0x9b0   : > { %v2091_v62 = vadd.f32 %v2332_v60, %v2082_v61 }
 0x9b2   : > { %v2093_v63 = vsel %vm2092_vm13, %v2091_v62, 0.0 }
 0x9b3   : > { %v2094_v18 = vrot.slane %v2093_v63, 4 }
 0x9b5   : > { %v2095_v38 = vadd.f32 %v2094_v18, %v2093_v63  ;;  %v2337_v18 = vld [vmem:[#allocation22] ss:$0 sm:$0xff] }
 0x9b7   : > { %v2096_v16 = vrot.slane %v2095_v38, 2 }
 0x9b9   : > { %v2097_v21 = vadd.f32 %v2096_v16, %v2095_v38  ;;  %v2338_v16 = vld [vmem:[#allocation23] ss:$0 sm:$0xff] }
 0x9bb   : > { %v2098_v23 = vrot.slane %v2097_v21, 1 }
 0x9bd   : > { %v2099_v24 = vadd.f32 %v2098_v23, %v2097_v21 }
 0x9bf   : > { %v2101_v25 = vmul.f32 0.33333334, %v2099_v24 }
 0x9c1   : > { %v2102_v22 = vsub.f32 %v2091_v62, %v2101_v25 }
 0x9c3   : > { %v2103_v26 = vmul.f32 %v2102_v22, %v2102_v22 }
 0x9c5   : > { %v2104_v27 = vsel %vm2092_vm13, %v2103_v26, 0.0 }
 0x9c6   : > { %v2105_v28 = vrot.slane %v2104_v27, 4 }
 0x9c8   : > { %v2106_v29 = vadd.f32 %v2105_v28, %v2104_v27 }
 0x9ca   : > { %v2107_v30 = vrot.slane %v2106_v29, 2 }
 0x9cc   : > { %v2108_v32 = vadd.f32 %v2107_v30, %v2106_v29 }
 0x9ce   : > { %v2109_v33 = vrot.slane %v2108_v32, 1 }
 0x9d0   : > { %v2110_v42 = vadd.f32 %v2109_v33, %v2108_v32 }
 0x9d2   : > { %v2111_v35 = vmul.f32 0.33333334, %v2110_v42 }
 0x9d4   : > { %v2112_v31 = vadd.f32 1e-05, %v2111_v35 }
 0x9d6   : > { %2737 = vrsqrt.f32 %v2112_v31 }
 0x9e0   : > { %v2738_v48 = vpop.eup %2737 }
 0x9e1   : > { %v2114_v53 = vmul.f32 %v2738_v48, %v2102_v22 }
 0x9e3   : > { %v2121_v36 = vmul.f32 %v2333_v52, %v2114_v53 }
 0x9e5   : > { %v2128_v50 = vadd.f32 %v2334_v47, %v2121_v36 }
 0x9e7   : > { %v2129_v17 = vmax.f32 %v2128_v50, 0.0 }
 0x9e9   : > { %2531 = vmatmul.mubr.msk.f32.vlgmr.msra.gmra.mrb[14].mxu1 %vm2136_vm14, %v2129_v17 }
 0xabc   : > { %v2206_v40 = vpop.f32.mrb[14].mxu1 }
 0xabd   : > { %v2207_v54 = vadd.f32 %v2335_v58, %v2206_v40  ;;  %v2532_v49 = vpop.f32.mrb[15].mxu1 }
 0xabf   : > { %v2210_v19 = vsel %vm285_vm0, %v2207_v54, 0.0 }
 0xac0   : > { %v2211_v37 = vrot.slane %v2210_v19, 4 }
 0xac2   : > { %v2212_v41 = vadd.f32 %v2211_v37, %v2210_v19 }
 0xac4   : > { %v2213_v39 = vrot.slane %v2212_v41, 2 }
 0xac6   : > { %v2214_v43 = vadd.f32 %v2213_v39, %v2212_v41 }
 0xac8   : > { %v2215_v55 = vrot.slane %v2214_v43, 1 }
 0xaca   : > { %v2216_v44 = vadd.f32 %v2215_v55, %v2214_v43 }
 0xacc   : > { %v2217_v51 = vmul.f32 0.33333334, %v2216_v44 }
 0xace   : > { %v2218_v45 = vsub.f32 %v2207_v54, %v2217_v51 }
 0xad0   : > { %v2219_v59 = vmul.f32 %v2218_v45, %v2218_v45 }
 0xad2   : > { %v2220_v46 = vsel %vm285_vm0, %v2219_v59, 0.0 }
 0xad3   : > { %v2221_v20 = vrot.slane %v2220_v46, 4 }
 0xad5   : > { %v2222_v34 = vadd.f32 %v2221_v20, %v2220_v46 }
 0xad7   : > { %v2223_v57 = vrot.slane %v2222_v34, 2 }
 0xad9   : > { %v2224_v60 = vadd.f32 %v2223_v57, %v2222_v34 }
 0xadb   : > { %v2225_v56 = vrot.slane %v2224_v60, 1 }
 0xadd   : > { %v2226_v61 = vadd.f32 %v2225_v56, %v2224_v60 }
 0xadf   : > { %v2227_v0 = vmul.f32 0.33333334, %v2226_v61 }
 0xae1   : > { %v2228_v62 = vadd.f32 1e-05, %v2227_v0 }
 0xae3   : > { %2739 = vrsqrt.f32 %v2228_v62 }
 0xaed   : > { %v2740_v63 = vpop.eup %2739 }
 0xaee   : > { %v2230_v38 = vmul.f32 %v2740_v63, %v2218_v45 }
 0xaf0   : > { %v2237_v21 = vmul.f32 %v2337_v18, %v2230_v38  ;;  %297 = sbr.rel (!%p295_p12) target bundleno = 285 (0x11d), region = 231 }
 0xaf2   : > { %v2244_v23 = vadd.f32 %v2338_v16, %v2237_v21 }
 0xaf4   : > { %v2245_v24 = vmax.f32 %v2244_v23, 0.0 }
 0xaf6   : > { %2249 = vst.msk [vmem:[#allocation2] sm:$0x7] %vm285_vm0, %v2245_v24 }
 0xaf7   :  { %2261 = vsyncpa [#allocation7], 1 }
 0xaf8   :  { %2262 = vsyncpa [#allocation9], 1 }
 0xaf9   :  { %2263 = vsyncpa [#allocation12], 1 }
 0xafa   :  { %2264 = vsyncpa [#allocation15], 1 }
 0xafb   :  { %2265 = vsyncpa [#allocation18], 1 }
 0xafc   :  { %2266 = vsyncpa [#allocation21], 1 }
 0xafd   :  { %2267 = vsyncpa [#allocation24], 1 }

</bundles_post_ra>
